<compile_context>
chip_gen: v7x
topology: tpu7x:2x2x1
jax: 0.10.0
libtpu: 0.0.40
codegen_flags: <defaults>
</compile_context>

<pallas_src>
import functools

import jax
import jax.numpy as jnp
from jax import lax
from jax.experimental import pallas as pl
from jax.experimental.pallas import tpu as pltpu

NEG_SLOPE = 0.2          # DGL GATConv default negative_slope
NEG_INF = -1e30          # large negative instead of -inf (avoids inf-inf NaNs)

# Model hyper-parameters (small, kernel-friendly shapes)
N_NODES = 128
IN_SIZE = 64
HID_SIZE = 16
HEADS = 4
OUT_SIZE = 8
NUM_LAYERS = 3           # conv1 + (NUM_LAYERS - 2) hidden + conv2

HID = HID_SIZE * HEADS                                     # 64
OUT_PAD = 128                                              # final layer padded to a lane-dense store
X_PAD = ((max(IN_SIZE, HID) + 1 + 127) // 128) * 128       # extended-input width (K=128, aligned)
B_PAD = max(X_PAD, OUT_PAD)                                # bias slab lane width


# --------------------------------------------------------------------------------------
# Kernel
# --------------------------------------------------------------------------------------
def _gat_heads(x_bf, w_bf, wal_bf, adj_ref, *, heads, out_f):
    """All heads of one GATConv layer on in-VMEM values.

    x_bf:   [N, X_PAD] bf16   extended input: [features | 1 | 0...]
    w_bf:   [X_PAD, H*F+1+H]  bf16 packed projection:
              cols [0 : H*F)        per-head W
              col  [H*F]            ones indicator (feat_ext[:, H*F] == 1 for every node)
              cols [H*F+1 : +H)     er projection  (W @ attn_r per head, dst side)
    wal_bf: [H, X_PAD] bf16   el projection (W @ attn_l per head, src side)
    adj_ref: [N, N] bf16 ref  additive edge mask (0 on edges j->i, NEG_INF otherwise)

    Returns a list of H f32 arrays [N, F] (pre-bias, pre-activation).
    """
    n_agg = heads * out_f + 1
    # One matmul produces per-head feat, the all-ones column, and the er logits.
    feat_ext = jnp.dot(x_bf, w_bf, preferred_element_type=jnp.float32)        # [N, n_agg+H]
    # elT[h, j] = <W@attn_l_h, x_j>; contraction on x's feature axis -> no activation
    # transpose, and this matmul only depends on x (parallel to feat_ext on the MXU).
    elT = lax.dot_general(wal_bf, x_bf, (((1,), (1,)), ((), ())),
                          preferred_element_type=jnp.float32)                 # [H, N]
    f_agg = feat_ext[:, :n_agg].astype(jnp.bfloat16)                          # shared MXU rhs

    outs = []
    for h in range(heads):                                                    # static unroll
        er = feat_ext[:, n_agg + h:n_agg + h + 1]                             # [N, 1] dst logits
        e = er + elT[h:h + 1, :]                                              # [N_dst, N_src]
        e = jnp.maximum(e, NEG_SLOPE * e)                                     # leaky_relu(0.2)
        e = e + adj_ref[...]                                                  # bf16 mask -> f32 add
        m = jnp.max(e, axis=-1, keepdims=True)
        p = jnp.exp(e - m).astype(jnp.bfloat16)                               # masked entries -> 0
        # One matmul yields the weighted sum AND (last column) the softmax denominator.
        o_ext = jnp.dot(p, f_agg, preferred_element_type=jnp.float32)         # [N, H*F+1]
        denom = o_ext[:, heads * out_f:heads * out_f + 1]                     # row-sum of p (>= 1)
        inv = pl.reciprocal(denom, approx=True)                               # EUP
        inv = inv * (2.0 - denom * inv)                                       # one Newton step
        outs.append(o_ext[:, h * out_f:(h + 1) * out_f] * inv)                # [N, F]
    return outs


def _gat_fused_kernel(x_ref, adj_ref, w_ref, wal_ref, b_ref, out_ref, h_ref, *, cfgs, hid):
    n = x_ref.shape[0]
    x_pad = x_ref.shape[1]
    n_layers = len(cfgs)

    # Scratch carries the next layer's extended input: ones column at `hid`, zeros beyond.
    h_ref[:, hid:hid + 1] = jnp.ones((n, 1), jnp.float32)
    if x_pad > hid + 1:
        h_ref[:, hid + 1:] = jnp.zeros((n, x_pad - hid - 1), jnp.float32)

    x_bf = x_ref[...].astype(jnp.bfloat16)                                    # layer-1 input

    for li, (w_off, w_cols, wal_off, heads, out_f) in enumerate(cfgs):
        w_bf = w_ref[:, w_off:w_off + w_cols]                                 # packed W slab slice
        wal_bf = wal_ref[wal_off:wal_off + heads, :]
        outs = _gat_heads(x_bf, w_bf, wal_bf, adj_ref, heads=heads, out_f=out_f)

        if li < n_layers - 1:
            # Per-head outputs go straight into lane slices of the scratch (no lane concat).
            for h, o in enumerate(outs):
                h_ref[:, h * out_f:(h + 1) * out_f] = o
            # Bias + ReLU on read-back; ones column survives (bias col == 0, relu(1) == 1).
            x_next = jnp.maximum(h_ref[...] + b_ref[li:li + 1, :], 0.0)       # [N, X_PAD]
            x_bf = x_next.astype(jnp.bfloat16)
            # TODO(synk): F.dropout(p=0.5) between layers is a no-op at inference; omitted.
        else:
            z = outs[0] + b_ref[li:li + 1, 0:out_f]                           # pads carry -1e30
            mx = jnp.max(z, axis=-1, keepdims=True)
            z = z - mx
            lse = jnp.log(jnp.sum(jnp.exp(z), axis=-1, keepdims=True))
            out_ref[...] = z - lse                                            # one lane-dense store


# --------------------------------------------------------------------------------------
# Wrapper: parameter packing + pallas_call
# --------------------------------------------------------------------------------------
def _prep_layer(w, al, ar, b, heads, out_f, pad_to=None):
    """Fold the attention projections + ones-indicator into one padded weight matrix."""
    f_in = w.shape[0]
    if pad_to is not None and pad_to > out_f:
        extra = pad_to - out_f
        w = jnp.pad(w, ((0, 0), (0, extra)))                           # zero feature columns
        al = jnp.pad(al, ((0, 0), (0, extra)))
        ar = jnp.pad(ar, ((0, 0), (0, extra)))
        b = jnp.pad(b, ((0, 0), (0, extra)), constant_values=NEG_INF)  # kill padded logits
        out_f = pad_to

    w_heads = w.reshape(f_in, heads, out_f)
    war = jnp.einsum("fhk,hk->fh", w_heads, ar)            # er = x @ war   (dst side)
    wal = jnp.einsum("fhk,hk->hf", w_heads, al)            # elT = wal . x  (src side)

    ncols = heads * out_f + 1 + heads
    w_ext = jnp.zeros((X_PAD, ncols), jnp.float32)
    w_ext = w_ext.at[:f_in, :heads * out_f].set(w)
    w_ext = w_ext.at[f_in, heads * out_f].set(1.0)         # ones-indicator column
    w_ext = w_ext.at[:f_in, heads * out_f + 1:].set(war)

    wal_ext = jnp.zeros((heads, X_PAD), jnp.float32).at[:, :f_in].set(wal)
    return w_ext, wal_ext, b, heads, out_f


def gat_forward(params, adj, features):
    n = features.shape[0]

    # Extended input: [features | 1 | zeros]  (ones column drives the denominator trick).
    x_ext = jnp.zeros((n, X_PAD), jnp.float32)
    x_ext = x_ext.at[:, :IN_SIZE].set(features).at[:, IN_SIZE].set(1.0)

    # Additive edge mask, bf16 (0 on j->i edges, -1e30 elsewhere; self-loops guaranteed).
    adj_bias = jnp.where(adj > 0.5, 0.0, NEG_INF).astype(jnp.bfloat16)

    # Per-layer packed parameters.
    layer_specs = []
    w, al, ar, b = params["conv1"]
    layer_specs.append(_prep_layer(w, al, ar, b, HEADS, HID_SIZE))
    for (w, al, ar, b) in params["hidden"]:
        layer_specs.append(_prep_layer(w, al, ar, b, 1, HID))
    w, al, ar, b = params["conv2"]
    layer_specs.append(_prep_layer(w, al, ar, b, 1, OUT_SIZE, pad_to=OUT_PAD))

    # Pack everything into three slabs (one DMA each).
    w_blocks, wal_blocks, b_rows, cfgs = [], [], [], []
    col_off, row_off = 0, 0
    for (w_ext, wal_ext, bb, heads, out_f) in layer_specs:
        ncols = w_ext.shape[1]
        region = ((ncols + 127) // 128) * 128                       # 128-aligned slab regions
        w_blocks.append(jnp.pad(w_ext, ((0, 0), (0, region - ncols))).astype(jnp.bfloat16))
        wal_blocks.append(wal_ext.astype(jnp.bfloat16))
        b_rows.append(jnp.pad(bb, ((0, 0), (0, B_PAD - bb.shape[1]))))
        cfgs.append((col_off, ncols, row_off, heads, out_f))
        col_off += region
        row_off += heads

    w_slab = jnp.concatenate(w_blocks, axis=1)                       # [X_PAD, 512] bf16
    wal_slab = jnp.concatenate(wal_blocks, axis=0)                   # [6, X_PAD]   bf16
    b_slab = jnp.concatenate(b_rows, axis=0).astype(jnp.float32)     # [L, B_PAD]   f32

    inputs = (x_ext, adj_bias, w_slab, wal_slab, b_slab)
    kernel = functools.partial(_gat_fused_kernel, cfgs=tuple(cfgs), hid=HID)

    out_padded = pl.pallas_call(
        kernel,
        out_shape=jax.ShapeDtypeStruct((n, OUT_PAD), jnp.float32),
        # No grid: single-shot kernel, whole arrays resident in VMEM (no pipelining /
        # double-buffering machinery for a size-1 grid).
        in_specs=[pl.BlockSpec(memory_space=pltpu.MemorySpace.VMEM) for _ in inputs],
        out_specs=pl.BlockSpec(memory_space=pltpu.MemorySpace.VMEM),
        scratch_shapes=[pltpu.VMEM((n, X_PAD), jnp.float32)],        # inter-layer features
    )(*inputs)
    return out_padded[:, :OUT_SIZE]


# --------------------------------------------------------------------------------------
# Pure-JAX reference (f32) — semantics of the PyTorch/DGL module
# --------------------------------------------------------------------------------------
def _gatconv_ref(x, adj, w, al, ar, b, heads, out_f):
    n = x.shape[0]
    feat = (x @ w).reshape(n, heads, out_f)
    er = jnp.einsum("nhf,hf->nh", feat, ar)                  # dst
    el = jnp.einsum("nhf,hf->nh", feat, al)                  # src
    e = er[:, None, :] + el[None, :, :]                      # [dst, src, h]
    e = jnp.where(e > 0, e, NEG_SLOPE * e)
    e = jnp.where(adj[:, :, None] > 0.5, e, -jnp.inf)
    a = jax.nn.softmax(e, axis=1)
    out = jnp.einsum("ijh,jhf->ihf", a, feat).reshape(n, heads * out_f)
    return out + b


def gat_reference(params, adj, features):
    w, al, ar, b = params["conv1"]
    h = jax.nn.relu(_gatconv_ref(features, adj, w, al, ar, b, HEADS, HID_SIZE))
    for (w, al, ar, b) in params["hidden"]:
        h = jax.nn.relu(_gatconv_ref(h, adj, w, al, ar, b, 1, HID))
    w, al, ar, b = params["conv2"]
    h = _gatconv_ref(h, adj, w, al, ar, b, 1, OUT_SIZE)
    return jax.nn.log_softmax(h, axis=-1)


# --------------------------------------------------------------------------------------
# Init + self-test
# --------------------------------------------------------------------------------------
def init_gatconv(key, f_in, f_out, heads, scale=0.1):
    k1, k2, k3, k4 = jax.random.split(key, 4)
    w = jax.random.normal(k1, (f_in, heads * f_out), jnp.float32) * scale
    al = jax.random.normal(k2, (heads, f_out), jnp.float32) * scale
    ar = jax.random.normal(k3, (heads, f_out), jnp.float32) * scale
    b = jax.random.normal(k4, (1, heads * f_out), jnp.float32) * scale
    return (w, al, ar, b)


def init_gat_params(key, in_size, hid_size, out_size, head, num_layers):
    keys = jax.random.split(key, num_layers)
    return {
        "conv1": init_gatconv(keys[0], in_size, hid_size, head),
        "hidden": [init_gatconv(keys[1 + i], hid_size * head, hid_size * head, 1)
                   for i in range(num_layers - 2)],
        "conv2": init_gatconv(keys[-1], hid_size * head, out_size, 1),
    }


if __name__ == "__main__":
    key = jax.random.PRNGKey(0)
    k_feat, k_adj, k_params = jax.random.split(key, 3)

    features = jax.random.normal(k_feat, (N_NODES, IN_SIZE), jnp.float32)

    # Random sparse-ish graph as a dense adjacency mask, with self-loops so every
    # destination node has at least one incoming edge (edge softmax well defined).
    adj = (jax.random.uniform(k_adj, (N_NODES, N_NODES)) < 0.08).astype(jnp.float32)
    adj = jnp.maximum(adj, jnp.eye(N_NODES, dtype=jnp.float32))

    params = init_gat_params(k_params, IN_SIZE, HID_SIZE, OUT_SIZE, HEADS, NUM_LAYERS)

    out = jax.jit(gat_forward)(params, adj, features)
    out = jax.block_until_ready(out)
    ref = gat_reference(params, adj, features)

    assert out.shape == (N_NODES, OUT_SIZE)
    assert bool(jnp.all(jnp.isfinite(out)))
    # rows of log_softmax should exp-sum to ~1
    assert bool(jnp.allclose(jnp.sum(jnp.exp(out), axis=1), 1.0, atol=1e-4))
    # matches the f32 reference up to bf16 matmul rounding
    assert bool(jnp.max(jnp.abs(out - ref)) < 1e-1)

    print("KERNEL_OK")
</pallas_src>

<mosaic_0001>
module attributes {stable_mosaic.version = 11 : i64} {
  func.func @_gat_fused_kernel(%arg0: memref<128x128xf32, #tpu.memory_space<vmem>>, %arg1: memref<128x128xbf16, #tpu.memory_space<vmem>>, %arg2: memref<128x512xbf16, #tpu.memory_space<vmem>>, %arg3: memref<6x128xbf16, #tpu.memory_space<vmem>>, %arg4: memref<3x128xf32, #tpu.memory_space<vmem>>, %arg5: memref<128x128xf32, #tpu.memory_space<vmem>>, %arg6: memref<128x128xf32, #tpu.memory_space<vmem>>) attributes {dimension_semantics = [], scalar_prefetch = 0 : i64, scratch_operands = 1 : i64, tpu.core_type = #tpu.core_type<tc>} {
    %cst = arith.constant 1.000000e+00 : f32
    %0 = vector.broadcast %cst : f32 to vector<128x1xf32>
    %c0 = arith.constant 0 : index
    %c64 = arith.constant 64 : index
    %1 = vector.load %arg6[%c0, %c64] : memref<128x128xf32, #tpu.memory_space<vmem>>, vector<128x1xf32>
    tpu.vector_store %arg6[%c0, %c64], %0 {strides = array<i32>} : memref<128x128xf32, #tpu.memory_space<vmem>>, vector<128x1xf32>,
    %cst_0 = arith.constant 0.000000e+00 : f32
    %2 = vector.broadcast %cst_0 : f32 to vector<128x63xf32>
    %c0_1 = arith.constant 0 : index
    %c65 = arith.constant 65 : index
    %3 = vector.load %arg6[%c0_1, %c65] : memref<128x128xf32, #tpu.memory_space<vmem>>, vector<128x63xf32>
    tpu.vector_store %arg6[%c0_1, %c65], %2 {strides = array<i32>} : memref<128x128xf32, #tpu.memory_space<vmem>>, vector<128x63xf32>,
    %c0_2 = arith.constant 0 : index
    %c0_3 = arith.constant 0 : index
    %4 = vector.load %arg0[%c0_2, %c0_3] : memref<128x128xf32, #tpu.memory_space<vmem>>, vector<128x128xf32>
    %5 = arith.truncf %4 : vector<128x128xf32> to vector<128x128xbf16>
    %c0_4 = arith.constant 0 : index
    %c0_5 = arith.constant 0 : index
    %6 = vector.load %arg2[%c0_4, %c0_5] : memref<128x512xbf16, #tpu.memory_space<vmem>>, vector<128x69xbf16>
    %c0_6 = arith.constant 0 : index
    %c0_7 = arith.constant 0 : index
    %7 = vector.load %arg3[%c0_6, %c0_7] : memref<6x128xbf16, #tpu.memory_space<vmem>>, vector<4x128xbf16>
    %cst_8 = arith.constant dense<0.000000e+00> : vector<128x69xf32>
    %8 = tpu.matmul %5, %6, %cst_8 {dimension_numbers = #tpu.dot_dimension_numbers<[1], [0], [0], [1], [0, 0, 1, 1], [], []>} : vector<128x128xbf16>, vector<128x69xbf16>, vector<128x69xf32> -> vector<128x69xf32>
    %cst_9 = arith.constant dense<0.000000e+00> : vector<4x128xf32>
    %9 = tpu.matmul %7, %5, %cst_9 {dimension_numbers = #tpu.dot_dimension_numbers<[1], [1], [0], [0], [0, 0, 1, 0], [], []>} : vector<4x128xbf16>, vector<128x128xbf16>, vector<4x128xf32> -> vector<4x128xf32>
    %10 = vector.extract_strided_slice %8 {offsets = [0, 0], sizes = [128, 65], strides = [1, 1]} : vector<128x69xf32> to vector<128x65xf32>
    %11 = arith.truncf %10 : vector<128x65xf32> to vector<128x65xbf16>
    %12 = vector.extract_strided_slice %8 {offsets = [0, 65], sizes = [128, 1], strides = [1, 1]} : vector<128x69xf32> to vector<128x1xf32>
    %13 = vector.extract_strided_slice %9 {offsets = [0, 0], sizes = [1, 128], strides = [1, 1]} : vector<4x128xf32> to vector<1x128xf32>
    %14 = vector.broadcast %12 : vector<128x1xf32> to vector<128x128xf32>
    %15 = vector.broadcast %13 : vector<1x128xf32> to vector<128x128xf32>
    %16 = arith.addf %14, %15 : vector<128x128xf32>
    %cst_10 = arith.constant 2.000000e-01 : f32
    %17 = vector.broadcast %cst_10 : f32 to vector<128x128xf32>
    %18 = arith.mulf %17, %16 : vector<128x128xf32>
    %19 = arith.maximumf %16, %18 : vector<128x128xf32>
    %c0_11 = arith.constant 0 : index
    %c0_12 = arith.constant 0 : index
    %20 = vector.load %arg1[%c0_11, %c0_12] : memref<128x128xbf16, #tpu.memory_space<vmem>>, vector<128x128xbf16>
    %21 = arith.extf %20 : vector<128x128xbf16> to vector<128x128xf32>
    %22 = arith.addf %19, %21 : vector<128x128xf32>
    %cst_13 = arith.constant dense<0xFF800000> : vector<128xf32>
    %23 = vector.multi_reduction <maximumf>, %22, %cst_13 [1] : vector<128x128xf32> to vector<128xf32>
    %24 = vector.shape_cast %23 : vector<128xf32> to vector<128x1xf32>
    %25 = vector.broadcast %24 : vector<128x1xf32> to vector<128x128xf32>
    %26 = arith.subf %22, %25 : vector<128x128xf32>
    %27 = math.exp %26 : vector<128x128xf32>
    %28 = arith.truncf %27 : vector<128x128xf32> to vector<128x128xbf16>
    %cst_14 = arith.constant dense<0.000000e+00> : vector<128x65xf32>
    %29 = tpu.matmul %28, %11, %cst_14 {dimension_numbers = #tpu.dot_dimension_numbers<[1], [0], [0], [1], [0, 0, 1, 1], [], []>} : vector<128x128xbf16>, vector<128x65xbf16>, vector<128x65xf32> -> vector<128x65xf32>
    %30 = vector.extract_strided_slice %29 {offsets = [0, 64], sizes = [128, 1], strides = [1, 1]} : vector<128x65xf32> to vector<128x1xf32>
    %31 = tpu.reciprocal %30 {approx = true} : vector<128x1xf32> -> vector<128x1xf32>
    %32 = arith.mulf %30, %31 : vector<128x1xf32>
    %cst_15 = arith.constant 2.000000e+00 : f32
    %33 = vector.broadcast %cst_15 : f32 to vector<128x1xf32>
    %34 = arith.subf %33, %32 : vector<128x1xf32>
    %35 = arith.mulf %31, %34 : vector<128x1xf32>
    %36 = vector.extract_strided_slice %29 {offsets = [0, 0], sizes = [128, 16], strides = [1, 1]} : vector<128x65xf32> to vector<128x16xf32>
    %37 = vector.broadcast %35 : vector<128x1xf32> to vector<128x16xf32>
    %38 = arith.mulf %36, %37 : vector<128x16xf32>
    %39 = vector.extract_strided_slice %8 {offsets = [0, 66], sizes = [128, 1], strides = [1, 1]} : vector<128x69xf32> to vector<128x1xf32>
    %40 = vector.extract_strided_slice %9 {offsets = [1, 0], sizes = [1, 128], strides = [1, 1]} : vector<4x128xf32> to vector<1x128xf32>
    %41 = vector.broadcast %39 : vector<128x1xf32> to vector<128x128xf32>
    %42 = vector.broadcast %40 : vector<1x128xf32> to vector<128x128xf32>
    %43 = arith.addf %41, %42 : vector<128x128xf32>
    %cst_16 = arith.constant 2.000000e-01 : f32
    %44 = vector.broadcast %cst_16 : f32 to vector<128x128xf32>
    %45 = arith.mulf %44, %43 : vector<128x128xf32>
    %46 = arith.maximumf %43, %45 : vector<128x128xf32>
    %c0_17 = arith.constant 0 : index
    %c0_18 = arith.constant 0 : index
    %47 = vector.load %arg1[%c0_17, %c0_18] : memref<128x128xbf16, #tpu.memory_space<vmem>>, vector<128x128xbf16>
    %48 = arith.extf %47 : vector<128x128xbf16> to vector<128x128xf32>
    %49 = arith.addf %46, %48 : vector<128x128xf32>
    %cst_19 = arith.constant dense<0xFF800000> : vector<128xf32>
    %50 = vector.multi_reduction <maximumf>, %49, %cst_19 [1] : vector<128x128xf32> to vector<128xf32>
    %51 = vector.shape_cast %50 : vector<128xf32> to vector<128x1xf32>
    %52 = vector.broadcast %51 : vector<128x1xf32> to vector<128x128xf32>
    %53 = arith.subf %49, %52 : vector<128x128xf32>
    %54 = math.exp %53 : vector<128x128xf32>
    %55 = arith.truncf %54 : vector<128x128xf32> to vector<128x128xbf16>
    %cst_20 = arith.constant dense<0.000000e+00> : vector<128x65xf32>
    %56 = tpu.matmul %55, %11, %cst_20 {dimension_numbers = #tpu.dot_dimension_numbers<[1], [0], [0], [1], [0, 0, 1, 1], [], []>} : vector<128x128xbf16>, vector<128x65xbf16>, vector<128x65xf32> -> vector<128x65xf32>
    %57 = vector.extract_strided_slice %56 {offsets = [0, 64], sizes = [128, 1], strides = [1, 1]} : vector<128x65xf32> to vector<128x1xf32>
    %58 = tpu.reciprocal %57 {approx = true} : vector<128x1xf32> -> vector<128x1xf32>
    %59 = arith.mulf %57, %58 : vector<128x1xf32>
    %cst_21 = arith.constant 2.000000e+00 : f32
    %60 = vector.broadcast %cst_21 : f32 to vector<128x1xf32>
    %61 = arith.subf %60, %59 : vector<128x1xf32>
    %62 = arith.mulf %58, %61 : vector<128x1xf32>
    %63 = vector.extract_strided_slice %56 {offsets = [0, 16], sizes = [128, 16], strides = [1, 1]} : vector<128x65xf32> to vector<128x16xf32>
    %64 = vector.broadcast %62 : vector<128x1xf32> to vector<128x16xf32>
    %65 = arith.mulf %63, %64 : vector<128x16xf32>
    %66 = vector.extract_strided_slice %8 {offsets = [0, 67], sizes = [128, 1], strides = [1, 1]} : vector<128x69xf32> to vector<128x1xf32>
    %67 = vector.extract_strided_slice %9 {offsets = [2, 0], sizes = [1, 128], strides = [1, 1]} : vector<4x128xf32> to vector<1x128xf32>
    %68 = vector.broadcast %66 : vector<128x1xf32> to vector<128x128xf32>
    %69 = vector.broadcast %67 : vector<1x128xf32> to vector<128x128xf32>
    %70 = arith.addf %68, %69 : vector<128x128xf32>
    %cst_22 = arith.constant 2.000000e-01 : f32
    %71 = vector.broadcast %cst_22 : f32 to vector<128x128xf32>
    %72 = arith.mulf %71, %70 : vector<128x128xf32>
    %73 = arith.maximumf %70, %72 : vector<128x128xf32>
    %c0_23 = arith.constant 0 : index
    %c0_24 = arith.constant 0 : index
    %74 = vector.load %arg1[%c0_23, %c0_24] : memref<128x128xbf16, #tpu.memory_space<vmem>>, vector<128x128xbf16>
    %75 = arith.extf %74 : vector<128x128xbf16> to vector<128x128xf32>
    %76 = arith.addf %73, %75 : vector<128x128xf32>
    %cst_25 = arith.constant dense<0xFF800000> : vector<128xf32>
    %77 = vector.multi_reduction <maximumf>, %76, %cst_25 [1] : vector<128x128xf32> to vector<128xf32>
    %78 = vector.shape_cast %77 : vector<128xf32> to vector<128x1xf32>
    %79 = vector.broadcast %78 : vector<128x1xf32> to vector<128x128xf32>
    %80 = arith.subf %76, %79 : vector<128x128xf32>
    %81 = math.exp %80 : vector<128x128xf32>
    %82 = arith.truncf %81 : vector<128x128xf32> to vector<128x128xbf16>
    %cst_26 = arith.constant dense<0.000000e+00> : vector<128x65xf32>
    %83 = tpu.matmul %82, %11, %cst_26 {dimension_numbers = #tpu.dot_dimension_numbers<[1], [0], [0], [1], [0, 0, 1, 1], [], []>} : vector<128x128xbf16>, vector<128x65xbf16>, vector<128x65xf32> -> vector<128x65xf32>
    %84 = vector.extract_strided_slice %83 {offsets = [0, 64], sizes = [128, 1], strides = [1, 1]} : vector<128x65xf32> to vector<128x1xf32>
    %85 = tpu.reciprocal %84 {approx = true} : vector<128x1xf32> -> vector<128x1xf32>
    %86 = arith.mulf %84, %85 : vector<128x1xf32>
    %cst_27 = arith.constant 2.000000e+00 : f32
    %87 = vector.broadcast %cst_27 : f32 to vector<128x1xf32>
    %88 = arith.subf %87, %86 : vector<128x1xf32>
    %89 = arith.mulf %85, %88 : vector<128x1xf32>
    %90 = vector.extract_strided_slice %83 {offsets = [0, 32], sizes = [128, 16], strides = [1, 1]} : vector<128x65xf32> to vector<128x16xf32>
    %91 = vector.broadcast %89 : vector<128x1xf32> to vector<128x16xf32>
    %92 = arith.mulf %90, %91 : vector<128x16xf32>
    %93 = vector.extract_strided_slice %8 {offsets = [0, 68], sizes = [128, 1], strides = [1, 1]} : vector<128x69xf32> to vector<128x1xf32>
    %94 = vector.extract_strided_slice %9 {offsets = [3, 0], sizes = [1, 128], strides = [1, 1]} : vector<4x128xf32> to vector<1x128xf32>
    %95 = vector.broadcast %93 : vector<128x1xf32> to vector<128x128xf32>
    %96 = vector.broadcast %94 : vector<1x128xf32> to vector<128x128xf32>
    %97 = arith.addf %95, %96 : vector<128x128xf32>
    %cst_28 = arith.constant 2.000000e-01 : f32
    %98 = vector.broadcast %cst_28 : f32 to vector<128x128xf32>
    %99 = arith.mulf %98, %97 : vector<128x128xf32>
    %100 = arith.maximumf %97, %99 : vector<128x128xf32>
    %c0_29 = arith.constant 0 : index
    %c0_30 = arith.constant 0 : index
    %101 = vector.load %arg1[%c0_29, %c0_30] : memref<128x128xbf16, #tpu.memory_space<vmem>>, vector<128x128xbf16>
    %102 = arith.extf %101 : vector<128x128xbf16> to vector<128x128xf32>
    %103 = arith.addf %100, %102 : vector<128x128xf32>
    %cst_31 = arith.constant dense<0xFF800000> : vector<128xf32>
    %104 = vector.multi_reduction <maximumf>, %103, %cst_31 [1] : vector<128x128xf32> to vector<128xf32>
    %105 = vector.shape_cast %104 : vector<128xf32> to vector<128x1xf32>
    %106 = vector.broadcast %105 : vector<128x1xf32> to vector<128x128xf32>
    %107 = arith.subf %103, %106 : vector<128x128xf32>
    %108 = math.exp %107 : vector<128x128xf32>
    %109 = arith.truncf %108 : vector<128x128xf32> to vector<128x128xbf16>
    %cst_32 = arith.constant dense<0.000000e+00> : vector<128x65xf32>
    %110 = tpu.matmul %109, %11, %cst_32 {dimension_numbers = #tpu.dot_dimension_numbers<[1], [0], [0], [1], [0, 0, 1, 1], [], []>} : vector<128x128xbf16>, vector<128x65xbf16>, vector<128x65xf32> -> vector<128x65xf32>
    %111 = vector.extract_strided_slice %110 {offsets = [0, 64], sizes = [128, 1], strides = [1, 1]} : vector<128x65xf32> to vector<128x1xf32>
    %112 = tpu.reciprocal %111 {approx = true} : vector<128x1xf32> -> vector<128x1xf32>
    %113 = arith.mulf %111, %112 : vector<128x1xf32>
    %cst_33 = arith.constant 2.000000e+00 : f32
    %114 = vector.broadcast %cst_33 : f32 to vector<128x1xf32>
    %115 = arith.subf %114, %113 : vector<128x1xf32>
    %116 = arith.mulf %112, %115 : vector<128x1xf32>
    %117 = vector.extract_strided_slice %110 {offsets = [0, 48], sizes = [128, 16], strides = [1, 1]} : vector<128x65xf32> to vector<128x16xf32>
    %118 = vector.broadcast %116 : vector<128x1xf32> to vector<128x16xf32>
    %119 = arith.mulf %117, %118 : vector<128x16xf32>
    %c0_34 = arith.constant 0 : index
    %c0_35 = arith.constant 0 : index
    %120 = vector.load %arg6[%c0_34, %c0_35] : memref<128x128xf32, #tpu.memory_space<vmem>>, vector<128x16xf32>
    tpu.vector_store %arg6[%c0_34, %c0_35], %38 {strides = array<i32>} : memref<128x128xf32, #tpu.memory_space<vmem>>, vector<128x16xf32>,
    %c0_36 = arith.constant 0 : index
    %c16 = arith.constant 16 : index
    %121 = vector.load %arg6[%c0_36, %c16] : memref<128x128xf32, #tpu.memory_space<vmem>>, vector<128x16xf32>
    tpu.vector_store %arg6[%c0_36, %c16], %65 {strides = array<i32>} : memref<128x128xf32, #tpu.memory_space<vmem>>, vector<128x16xf32>,
    %c0_37 = arith.constant 0 : index
    %c32 = arith.constant 32 : index
    %122 = vector.load %arg6[%c0_37, %c32] : memref<128x128xf32, #tpu.memory_space<vmem>>, vector<128x16xf32>
    tpu.vector_store %arg6[%c0_37, %c32], %92 {strides = array<i32>} : memref<128x128xf32, #tpu.memory_space<vmem>>, vector<128x16xf32>,
    %c0_38 = arith.constant 0 : index
    %c48 = arith.constant 48 : index
    %123 = vector.load %arg6[%c0_38, %c48] : memref<128x128xf32, #tpu.memory_space<vmem>>, vector<128x16xf32>
    tpu.vector_store %arg6[%c0_38, %c48], %119 {strides = array<i32>} : memref<128x128xf32, #tpu.memory_space<vmem>>, vector<128x16xf32>,
    %c0_39 = arith.constant 0 : index
    %c0_40 = arith.constant 0 : index
    %124 = vector.load %arg6[%c0_39, %c0_40] : memref<128x128xf32, #tpu.memory_space<vmem>>, vector<128x128xf32>
    %c0_41 = arith.constant 0 : index
    %c0_42 = arith.constant 0 : index
    %125 = vector.load %arg4[%c0_41, %c0_42] : memref<3x128xf32, #tpu.memory_space<vmem>>, vector<1x128xf32>
    %126 = vector.broadcast %125 : vector<1x128xf32> to vector<128x128xf32>
    %127 = arith.addf %124, %126 : vector<128x128xf32>
    %cst_43 = arith.constant 0.000000e+00 : f32
    %128 = vector.broadcast %cst_43 : f32 to vector<128x128xf32>
    %129 = arith.maximumf %127, %128 : vector<128x128xf32>
    %130 = arith.truncf %129 : vector<128x128xf32> to vector<128x128xbf16>
    %c0_44 = arith.constant 0 : index
    %c128 = arith.constant 128 : index
    %131 = vector.load %arg2[%c0_44, %c128] : memref<128x512xbf16, #tpu.memory_space<vmem>>, vector<128x66xbf16>
    %c4 = arith.constant 4 : index
    %c0_45 = arith.constant 0 : index
    %132 = vector.load %arg3[%c4, %c0_45] : memref<6x128xbf16, #tpu.memory_space<vmem>>, vector<1x128xbf16>
    %cst_46 = arith.constant dense<0.000000e+00> : vector<128x66xf32>
    %133 = tpu.matmul %130, %131, %cst_46 {dimension_numbers = #tpu.dot_dimension_numbers<[1], [0], [0], [1], [0, 0, 1, 1], [], []>} : vector<128x128xbf16>, vector<128x66xbf16>, vector<128x66xf32> -> vector<128x66xf32>
    %cst_47 = arith.constant dense<0.000000e+00> : vector<1x128xf32>
    %134 = tpu.matmul %132, %130, %cst_47 {dimension_numbers = #tpu.dot_dimension_numbers<[1], [1], [0], [0], [0, 0, 1, 0], [], []>} : vector<1x128xbf16>, vector<128x128xbf16>, vector<1x128xf32> -> vector<1x128xf32>
    %135 = vector.extract_strided_slice %133 {offsets = [0, 0], sizes = [128, 65], strides = [1, 1]} : vector<128x66xf32> to vector<128x65xf32>
    %136 = arith.truncf %135 : vector<128x65xf32> to vector<128x65xbf16>
    %137 = vector.extract_strided_slice %133 {offsets = [0, 65], sizes = [128, 1], strides = [1, 1]} : vector<128x66xf32> to vector<128x1xf32>
    %138 = vector.broadcast %137 : vector<128x1xf32> to vector<128x128xf32>
    %139 = vector.broadcast %134 : vector<1x128xf32> to vector<128x128xf32>
    %140 = arith.addf %138, %139 : vector<128x128xf32>
    %cst_48 = arith.constant 2.000000e-01 : f32
    %141 = vector.broadcast %cst_48 : f32 to vector<128x128xf32>
    %142 = arith.mulf %141, %140 : vector<128x128xf32>
    %143 = arith.maximumf %140, %142 : vector<128x128xf32>
    %c0_49 = arith.constant 0 : index
    %c0_50 = arith.constant 0 : index
    %144 = vector.load %arg1[%c0_49, %c0_50] : memref<128x128xbf16, #tpu.memory_space<vmem>>, vector<128x128xbf16>
    %145 = arith.extf %144 : vector<128x128xbf16> to vector<128x128xf32>
    %146 = arith.addf %143, %145 : vector<128x128xf32>
    %cst_51 = arith.constant dense<0xFF800000> : vector<128xf32>
    %147 = vector.multi_reduction <maximumf>, %146, %cst_51 [1] : vector<128x128xf32> to vector<128xf32>
    %148 = vector.shape_cast %147 : vector<128xf32> to vector<128x1xf32>
    %149 = vector.broadcast %148 : vector<128x1xf32> to vector<128x128xf32>
    %150 = arith.subf %146, %149 : vector<128x128xf32>
    %151 = math.exp %150 : vector<128x128xf32>
    %152 = arith.truncf %151 : vector<128x128xf32> to vector<128x128xbf16>
    %cst_52 = arith.constant dense<0.000000e+00> : vector<128x65xf32>
    %153 = tpu.matmul %152, %136, %cst_52 {dimension_numbers = #tpu.dot_dimension_numbers<[1], [0], [0], [1], [0, 0, 1, 1], [], []>} : vector<128x128xbf16>, vector<128x65xbf16>, vector<128x65xf32> -> vector<128x65xf32>
    %154 = vector.extract_strided_slice %153 {offsets = [0, 64], sizes = [128, 1], strides = [1, 1]} : vector<128x65xf32> to vector<128x1xf32>
    %155 = tpu.reciprocal %154 {approx = true} : vector<128x1xf32> -> vector<128x1xf32>
    %156 = arith.mulf %154, %155 : vector<128x1xf32>
    %cst_53 = arith.constant 2.000000e+00 : f32
    %157 = vector.broadcast %cst_53 : f32 to vector<128x1xf32>
    %158 = arith.subf %157, %156 : vector<128x1xf32>
    %159 = arith.mulf %155, %158 : vector<128x1xf32>
    %160 = vector.extract_strided_slice %153 {offsets = [0, 0], sizes = [128, 64], strides = [1, 1]} : vector<128x65xf32> to vector<128x64xf32>
    %161 = vector.broadcast %159 : vector<128x1xf32> to vector<128x64xf32>
    %162 = arith.mulf %160, %161 : vector<128x64xf32>
    %c0_54 = arith.constant 0 : index
    %c0_55 = arith.constant 0 : index
    %163 = vector.load %arg6[%c0_54, %c0_55] : memref<128x128xf32, #tpu.memory_space<vmem>>, vector<128x64xf32>
    tpu.vector_store %arg6[%c0_54, %c0_55], %162 {strides = array<i32>} : memref<128x128xf32, #tpu.memory_space<vmem>>, vector<128x64xf32>,
    %c0_56 = arith.constant 0 : index
    %c0_57 = arith.constant 0 : index
    %164 = vector.load %arg6[%c0_56, %c0_57] : memref<128x128xf32, #tpu.memory_space<vmem>>, vector<128x128xf32>
    %c1 = arith.constant 1 : index
    %c0_58 = arith.constant 0 : index
    %165 = vector.load %arg4[%c1, %c0_58] : memref<3x128xf32, #tpu.memory_space<vmem>>, vector<1x128xf32>
    %166 = vector.broadcast %165 : vector<1x128xf32> to vector<128x128xf32>
    %167 = arith.addf %164, %166 : vector<128x128xf32>
    %cst_59 = arith.constant 0.000000e+00 : f32
    %168 = vector.broadcast %cst_59 : f32 to vector<128x128xf32>
    %169 = arith.maximumf %167, %168 : vector<128x128xf32>
    %170 = arith.truncf %169 : vector<128x128xf32> to vector<128x128xbf16>
    %c0_60 = arith.constant 0 : index
    %c256 = arith.constant 256 : index
    %171 = vector.load %arg2[%c0_60, %c256] : memref<128x512xbf16, #tpu.memory_space<vmem>>, vector<128x130xbf16>
    %c5 = arith.constant 5 : index
    %c0_61 = arith.constant 0 : index
    %172 = vector.load %arg3[%c5, %c0_61] : memref<6x128xbf16, #tpu.memory_space<vmem>>, vector<1x128xbf16>
    %cst_62 = arith.constant dense<0.000000e+00> : vector<128x130xf32>
    %173 = tpu.matmul %170, %171, %cst_62 {dimension_numbers = #tpu.dot_dimension_numbers<[1], [0], [0], [1], [0, 0, 1, 1], [], []>} : vector<128x128xbf16>, vector<128x130xbf16>, vector<128x130xf32> -> vector<128x130xf32>
    %cst_63 = arith.constant dense<0.000000e+00> : vector<1x128xf32>
    %174 = tpu.matmul %172, %170, %cst_63 {dimension_numbers = #tpu.dot_dimension_numbers<[1], [1], [0], [0], [0, 0, 1, 0], [], []>} : vector<1x128xbf16>, vector<128x128xbf16>, vector<1x128xf32> -> vector<1x128xf32>
    %175 = vector.extract_strided_slice %173 {offsets = [0, 0], sizes = [128, 129], strides = [1, 1]} : vector<128x130xf32> to vector<128x129xf32>
    %176 = arith.truncf %175 : vector<128x129xf32> to vector<128x129xbf16>
    %177 = vector.extract_strided_slice %173 {offsets = [0, 129], sizes = [128, 1], strides = [1, 1]} : vector<128x130xf32> to vector<128x1xf32>
    %178 = vector.broadcast %177 : vector<128x1xf32> to vector<128x128xf32>
    %179 = vector.broadcast %174 : vector<1x128xf32> to vector<128x128xf32>
    %180 = arith.addf %178, %179 : vector<128x128xf32>
    %cst_64 = arith.constant 2.000000e-01 : f32
    %181 = vector.broadcast %cst_64 : f32 to vector<128x128xf32>
    %182 = arith.mulf %181, %180 : vector<128x128xf32>
    %183 = arith.maximumf %180, %182 : vector<128x128xf32>
    %c0_65 = arith.constant 0 : index
    %c0_66 = arith.constant 0 : index
    %184 = vector.load %arg1[%c0_65, %c0_66] : memref<128x128xbf16, #tpu.memory_space<vmem>>, vector<128x128xbf16>
    %185 = arith.extf %184 : vector<128x128xbf16> to vector<128x128xf32>
    %186 = arith.addf %183, %185 : vector<128x128xf32>
    %cst_67 = arith.constant dense<0xFF800000> : vector<128xf32>
    %187 = vector.multi_reduction <maximumf>, %186, %cst_67 [1] : vector<128x128xf32> to vector<128xf32>
    %188 = vector.shape_cast %187 : vector<128xf32> to vector<128x1xf32>
    %189 = vector.broadcast %188 : vector<128x1xf32> to vector<128x128xf32>
    %190 = arith.subf %186, %189 : vector<128x128xf32>
    %191 = math.exp %190 : vector<128x128xf32>
    %192 = arith.truncf %191 : vector<128x128xf32> to vector<128x128xbf16>
    %cst_68 = arith.constant dense<0.000000e+00> : vector<128x129xf32>
    %193 = tpu.matmul %192, %176, %cst_68 {dimension_numbers = #tpu.dot_dimension_numbers<[1], [0], [0], [1], [0, 0, 1, 1], [], []>} : vector<128x128xbf16>, vector<128x129xbf16>, vector<128x129xf32> -> vector<128x129xf32>
    %194 = vector.extract_strided_slice %193 {offsets = [0, 128], sizes = [128, 1], strides = [1, 1]} : vector<128x129xf32> to vector<128x1xf32>
    %195 = tpu.reciprocal %194 {approx = true} : vector<128x1xf32> -> vector<128x1xf32>
    %196 = arith.mulf %194, %195 : vector<128x1xf32>
    %cst_69 = arith.constant 2.000000e+00 : f32
    %197 = vector.broadcast %cst_69 : f32 to vector<128x1xf32>
    %198 = arith.subf %197, %196 : vector<128x1xf32>
    %199 = arith.mulf %195, %198 : vector<128x1xf32>
    %200 = vector.extract_strided_slice %193 {offsets = [0, 0], sizes = [128, 128], strides = [1, 1]} : vector<128x129xf32> to vector<128x128xf32>
    %201 = vector.broadcast %199 : vector<128x1xf32> to vector<128x128xf32>
    %202 = arith.mulf %200, %201 : vector<128x128xf32>
    %c2 = arith.constant 2 : index
    %c0_70 = arith.constant 0 : index
    %203 = vector.load %arg4[%c2, %c0_70] : memref<3x128xf32, #tpu.memory_space<vmem>>, vector<1x128xf32>
    %204 = vector.broadcast %203 : vector<1x128xf32> to vector<128x128xf32>
    %205 = arith.addf %202, %204 : vector<128x128xf32>
    %cst_71 = arith.constant dense<0xFF800000> : vector<128xf32>
    %206 = vector.multi_reduction <maximumf>, %205, %cst_71 [1] : vector<128x128xf32> to vector<128xf32>
    %207 = vector.shape_cast %206 : vector<128xf32> to vector<128x1xf32>
    %208 = vector.broadcast %207 : vector<128x1xf32> to vector<128x128xf32>
    %209 = arith.subf %205, %208 : vector<128x128xf32>
    %210 = math.exp %209 : vector<128x128xf32>
    %cst_72 = arith.constant dense<0.000000e+00> : vector<128xf32>
    %211 = vector.multi_reduction <add>, %210, %cst_72 [1] : vector<128x128xf32> to vector<128xf32>
    %212 = vector.shape_cast %211 : vector<128xf32> to vector<128x1xf32>
    %213 = math.log %212 : vector<128x1xf32>
    %214 = vector.broadcast %213 : vector<128x1xf32> to vector<128x128xf32>
    %215 = arith.subf %209, %214 : vector<128x128xf32>
    %c0_73 = arith.constant 0 : index
    %c0_74 = arith.constant 0 : index
    %216 = vector.load %arg5[%c0_73, %c0_74] : memref<128x128xf32, #tpu.memory_space<vmem>>, vector<128x128xf32>
    tpu.vector_store %arg5[%c0_73, %c0_74], %215 {strides = array<i32>} : memref<128x128xf32, #tpu.memory_space<vmem>>, vector<128x128xf32>,
    return
  }
}

</mosaic_0001>

<bundles_post_ra>
// kernel: gat_forward.1
= control target key start
LH: loop header
LB: loop body
LE: loop exit
PB: predicated region body
PF: predicated region fallthrough
CT: control target
= control target key end

     0   :  { %v7398_v1 = vmov 0.0   ;;  %vm5337_vm0 = vmmov 0   ;;  %v7396_v3 = vmov 65   ;;  %v5339_v41 = vmov 66   ;;  %s7390_s2 = inlined_call_operand.vmem [shape: bf16[128,512], index: 2, kind: input, shape index: {}]   ;;  %s7391_s0 = inlined_call_operand.vmem [shape: f32[128,128], index: 0, kind: input, shape index: {}]   ;;  %s7392_s3 = inlined_call_operand.vmem [shape: bf16[6,128], index: 3, kind: input, shape index: {}]   ;;  %s7393_s1 = inlined_call_operand.vmem [shape: bf16[128,128], index: 1, kind: input, shape index: {}]   ;;  %s7394_s4 = inlined_call_operand.vmem [shape: f32[3,128], index: 4, kind: input, shape index: {}]   ;;  %s7395_s5 = inlined_call_operand.vmem [shape: f32[128,128], index: 5, kind: output, shape index: {}]  }
   0x1   :  { %v4846_v0 = vld [vmem:[%s7390_s2] ss:$16 sps:$4 sm:$0xff]   ;;  %4533 = vmatprep.subr.bf16.mxu1 %v7398_v1  ;;  %4549 = vmatprep.mubr.msk.bf16.mxu1 %vm5337_vm0, %v7398_v1  ;;  %v56_v7 = vld [vmem:[%s7391_s0 + $0x8] sm:$0xff]  ;;  %v58_v12 = vld [vmem:[%s7391_s0 + $0x18] sm:$0xff]  ;;  %v5340_v44 = vmov 67   ;;  %v369_v61 = vlaneseq  ;;  %vm21_vm1 = vcmask 531968  }
   0x2   :  { %v4847_v2 = vld [vmem:[%s7390_s2 + $0x20] ss:$16 sps:$4 sm:$0xff]   ;;  %4795 = vset.pattern.permute.xlu1 %v7396_v3  ;;  %4798 = vset.pattern.permute.xlu0 %v7396_v3  ;;  %v60_v16 = vld [vmem:[%s7391_s0 + $0x28] sm:$0xff]  ;;  %v62_v20 = vld [vmem:[%s7391_s0 + $0x38] sm:$0xff]  ;;  %vm38_vm2 = vcmask 1048072   ;;  %vm2245_vm3 = vcmask 130048  }
   0x3   :  { %4501 = vmatprep.subr.bf16.mxu0 %v4846_v0  ;;  %v4848_v4 = vld [vmem:[%s7390_s2 + $0x40] ss:$16 sps:$4 sm:$0xff]   ;;  %v64_v23 = vld [vmem:[%s7391_s0 + $0x48] sm:$0xff]  ;;  %v66_v26 = vld [vmem:[%s7391_s0 + $0x58] sm:$0xff]  ;;  %v5569_v62 = vshrl.u32 %v369_v61, 7  ;;  %vm2262_vm4 = vcmask 261248  }
   0x4   :  { %4502 = vmatpush3.bf16.msra.mxu0 %v4846_v0  ;;  %v4849_v5 = vld [vmem:[%s7390_s2 + $0x60] ss:$16 sps:$4 sm:$0xff]   ;;  %v68_v28 = vld [vmem:[%s7391_s0 + $0x68] sm:$0xff]  ;;  %v70_v32 = vld [vmem:[%s7391_s0 + $0x78] sm:$0xff]  ;;  %vm2279_vm5 = vcmask 392448   ;;  %vm2296_vm6 = vcmask 523648  }
   0x5   :  { %4503 = vmatprep.subr.bf16.mxu0 %v4847_v2  ;;  %v55_v6 = vld [vmem:[%s7391_s0] sm:$0xff]  ;;  %v57_v11 = vld [vmem:[%s7391_s0 + $0x10] sm:$0xff]  ;;  %v880_v63 = vsub.s32 1, %v5569_v62  ;;  %v1357_v0 = vsub.s32 2, %v5569_v62  ;;  %vm3114_vm7 = vcmask 523264  }
   0x6   :  { %v71_v8 = vpack.c.bf16 %v56_v7, %v55_v6  ;;  %v4850_v9 = vld [vmem:[%s7390_s2 + $0x80] ss:$16 sps:$4 sm:$0xff]   ;;  %v72_v14 = vpack.c.bf16 %v58_v12, %v57_v11  ;;  %v5341_v11 = vmov 68   ;;  %v5646_v12 = vsub.s32 0, %v5569_v62 }
   0x7   :  { %v4851_v10 = vld [vmem:[%s7390_s2 + $0xa0] ss:$16 sps:$4 sm:$0xff]  }
   0x8   :  { %4504 = vmatpush3.bf16.msra.mxu0 %v4847_v2  ;;  %4517 = vmatprep.mubr.bf16.mxu0 %v71_v8  ;;  %v4852_v13 = vld [vmem:[%s7390_s2 + $0xc0] ss:$16 sps:$4 sm:$0xff]   ;;  %v1834_v2 = vsub.s32 3, %v5569_v62  ;;  %7486 = vst [vmem:[#allocation20_spill] sm:$0xff] %v5646_v12 }
   0x9   :  { %4505 = vmatprep.subr.bf16.mxu0 %v4848_v4  ;;  %4534 = vmatpush3.bf16.xpose.msra.mxu1 %v71_v8  ;;  %v59_v15 = vld [vmem:[%s7391_s0 + $0x20] sm:$0xff]  ;;  %v61_v19 = vld [vmem:[%s7391_s0 + $0x30] sm:$0xff] }
   0xa   :  { %4535 = vmatprep.subr.bf16.mxu1 %v7398_v1  ;;  %v4853_v17 = vld [vmem:[%s7390_s2 + $0xe0] ss:$16 sps:$4 sm:$0xff]   ;;  %v73_v18 = vpack.c.bf16 %v60_v16, %v59_v15  ;;  %v74_v21 = vpack.c.bf16 %v62_v20, %v61_v19  ;;  %v4341_v19 = vld [vmem:[%s7393_s1 + $0x8] sm:$0xff]  }
   0xb   :  { %v63_v22 = vld [vmem:[%s7391_s0 + $0x40] sm:$0xff]  ;;  %v65_v25 = vld [vmem:[%s7391_s0 + $0x50] sm:$0xff] }
   0xc   :  { %4506 = vmatpush3.bf16.msra.mxu0 %v4848_v4  ;;  %v75_v24 = vpack.c.bf16 %v64_v23, %v63_v22  ;;  %v67_v27 = vld [vmem:[%s7391_s0 + $0x60] sm:$0xff]  ;;  %v76_v29 = vpack.c.bf16 %v66_v26, %v65_v25  ;;  %v69_v31 = vld [vmem:[%s7391_s0 + $0x70] sm:$0xff] }
   0xd   :  { %4507 = vmatprep.subr.bf16.mxu0 %v4849_v5  ;;  %v77_v30 = vpack.c.bf16 %v68_v28, %v67_v27  ;;  %v78_v33 = vpack.c.bf16 %v70_v32, %v69_v31  ;;  %v95_v34 = vld [vmem:[%s7392_s3] sm:$0x3] }
   0xe   :  { %v4246_v25 = vld [vmem:[%s7393_s1] sm:$0xff]  }
  0x10   :  { %4508 = vmatpush3.bf16.msra.mxu0 %v4849_v5 }
  0x11   :  { %4509 = vmatprep.subr.bf16.mxu0 %v4850_v9  ;;  %4536 = vmatpush3.bf16.xpose.msra.mxu1 %v72_v14 }
  0x12   :  { %4537 = vmatprep.subr.bf16.mxu1 %v7398_v1 }
  0x14   :  { %4510 = vmatpush3.bf16.msra.mxu0 %v4850_v9 }
  0x15   :  { %4511 = vmatprep.subr.bf16.mxu0 %v4851_v10 }
  0x18   :  { %4512 = vmatpush3.bf16.msra.mxu0 %v4851_v10 }
  0x19   :  { %4513 = vmatprep.subr.bf16.mxu0 %v4852_v13  ;;  %4538 = vmatpush3.bf16.xpose.msra.mxu1 %v73_v18 }
  0x1a   :  { %4539 = vmatprep.subr.bf16.mxu1 %v7398_v1 }
  0x1c   :  { %4514 = vmatpush3.bf16.msra.mxu0 %v4852_v13 }
  0x1d   :  { %4515 = vmatprep.subr.bf16.mxu0 %v4853_v17 }
  0x20   :  { %4516 = vmatpush3.bf16.msra.mxu0 %v4853_v17 }
  0x21   :  { %4540 = vmatpush3.bf16.xpose.msra.mxu1 %v74_v21 }
  0x22   :  { %4541 = vmatprep.subr.bf16.mxu1 %v7398_v1 }
  0x23   :  { %4518 = vmatmul.mubr.bf16.vlgmr.msra.gmra.mrb[0].mxu0 %v72_v14 }
  0x24   :  { %4521 = vmatprep.mubr.bf16.mxu0 %v73_v18 }
  0x29   :  { %4542 = vmatpush3.bf16.xpose.msra.mxu1 %v75_v24 }
  0x2a   :  { %4543 = vmatprep.subr.bf16.mxu1 %v7398_v1 }
  0x2b   :  { %4522 = vmatmul.mubr.bf16.gmra.mrb[4].mxu0 %v74_v21 }
  0x2c   :  { %4525 = vmatprep.mubr.bf16.mxu0 %v75_v24  ;;  %v5661_v24 = vunpack.c.l.bf16 %v4341_v19 }
  0x31   :  { %4544 = vmatpush3.bf16.xpose.msra.mxu1 %v76_v29 }
  0x32   :  { %4545 = vmatprep.subr.bf16.mxu1 %v7398_v1 }
  0x33   :  { %4526 = vmatmul.mubr.bf16.gmra.mrb[8].mxu0 %v76_v29 }
  0x34   :  { %4529 = vmatprep.mubr.bf16.mxu0 %v77_v30 }
  0x39   :  { %4546 = vmatpush3.bf16.xpose.msra.mxu1 %v77_v30  ;;  %v5673_v30 = vunpack.c.l.bf16 %v4246_v25 }
  0x3a   :  { %4547 = vmatprep.subr.bf16.mxu1 %v7398_v1 }
  0x3b   :  { %4530 = vmatmul.mubr.bf16.gmra.mrb[12].mxu0 %v78_v33 }
  0x41   :  { %4548 = vmatpush3.bf16.xpose.msra.mxu1 %v78_v33 }
  0x48   :  { %4550 = vmatmul.mubr.bf16.vlgmr.msra.gmra.mrb[0].mxu1 %v95_v34 }
  0xf6   :  { %v5463_v35 = vpop.f32.mrb[0].mxu0 }
  0xf7   :  { %301 = vperm.xlu1 %4795, %v5463_v35   ;;  %v5466_v36 = vpop.f32.mrb[1].mxu0 }
  0xf8   :  { %291 = vperm.xlu0 %4798, %v5466_v36   ;;  %v5469_v37 = vpop.f32.mrb[2].mxu0 }
  0xf9   :  { %v5473_v38 = vpack.c.bf16 %v5469_v37, %v5463_v35  ;;  %v5475_v39 = vpop.f32.mrb[3].mxu0 }
  0xfa   :  { %v5479_v40 = vpack.c.bf16 %v5475_v39, %v5466_v36 }
  0xfb   :  { %4796 = vset.pattern.permute.xlu1 %v5339_v41 }
  0xfc   :  { %823 = vperm.xlu1 %4796, %v5463_v35   ;;  %4799 = vset.pattern.permute.xlu0 %v5339_v41 }
  0xfd   :  { %4553 = vmatprep.subr.bf16.mxu0 %v5479_v40  ;;  %815 = vperm.xlu0 %4799, %v5466_v36  }
  0xfe   :  { %4554 = vmatpush3.bf16.msra.mxu0 %v5479_v40  ;;  %v5487_v42 = vpop.f32.mrb[4].mxu0 }
  0xff   :  { %7469 = vst [vmem:[#allocation3_spill] sm:$0xff] %v5487_v42  ;;  %4555 = vmatprep.subr.bf16.mxu0 %v5473_v38  ;;  %v5490_v43 = vpop.f32.mrb[5].mxu0 }
 0x100   :  { %7470 = vst [vmem:[#allocation4_spill] sm:$0xff] %v5490_v43  ;;  %4797 = vset.pattern.permute.xlu1 %v5340_v44  ;;  %v5493_v45 = vpop.f32.mrb[6].mxu0 }
 0x101   :  { %v5497_v46 = vpack.c.bf16 %v5493_v45, %v5487_v42  ;;  %1300 = vperm.xlu1 %4797, %v5463_v35   ;;  %827 = vperm.xlu0 %4799, %v5469_v37   ;;  %v5501_v47 = vpop.f32.mrb[7].mxu0 }
 0x102   :  { %v5505_v48 = vpack.c.bf16 %v5501_v47, %v5490_v43  ;;  %4556 = vmatpush3.bf16.msra.mxu0 %v5473_v38 }
 0x103   :  { %7471 = vst [vmem:[#allocation5_spill] sm:$0xff] %v5497_v46 }
 0x104   :  { %7472 = vst [vmem:[#allocation6_spill] sm:$0xff] %v5505_v48  ;;  %4557 = vmatprep.subr.bf16.mxu0 %v5505_v48 }
 0x105   :  { %1292 = vperm.xlu1 %4797, %v5466_v36   ;;  %4802 = vset.pattern.permute.xlu0 %v7396_v3 }
 0x106   :  { %4558 = vmatpush3.bf16.msra.mxu0 %v5505_v48  ;;  %296 = vperm.xlu0 %4802, %v5475_v39   ;;  %v5513_v49 = vpop.f32.mrb[8].mxu0 }
 0x107   :  { %7473 = vst [vmem:[#allocation7_spill] sm:$0xff] %v5513_v49  ;;  %v5515_v50 = vpop.f32.mrb[9].mxu0  ;;  %4559 = vmatprep.subr.bf16.mxu0 %v5497_v46 }
 0x108   :  { %7474 = vst [vmem:[#allocation8_spill] sm:$0xff] %v5515_v50  ;;  %v5518_v51 = vpop.f32.mrb[10].mxu0 }
 0x109   :  { %7475 = vst [vmem:[#allocation9_spill] sm:$0xff] %v5518_v51  ;;  %v5522_v52 = vpack.c.bf16 %v5518_v51, %v5513_v49  ;;  %4800 = vset.pattern.permute.xlu1 %v7396_v3  ;;  %v5525_v53 = vpop.f32.mrb[11].mxu0 }
 0x10a   :  { %7477 = vst [vmem:[#allocation11_spill] sm:$0xff] %v5525_v53  ;;  %v5529_v54 = vpack.c.bf16 %v5525_v53, %v5515_v50  ;;  %4560 = vmatpush3.bf16.msra.mxu0 %v5497_v46  ;;  %306 = vperm.xlu1 %4800, %v5469_v37  }
 0x10b   :  { %7476 = vst [vmem:[#allocation10_spill] sm:$0xff] %v5522_v52  ;;  %4804 = vset.pattern.permute.xlu0 %v5340_v44 }
 0x10c   :  { %7478 = vst [vmem:[#allocation12_spill] sm:$0xff] %v5529_v54  ;;  %1296 = vperm.xlu0 %4804, %v5475_v39   ;;  %4561 = vmatprep.subr.bf16.mxu0 %v5529_v54 }
 0x10e   :  { %4562 = vmatpush3.bf16.msra.mxu0 %v5529_v54  ;;  %4801 = vset.pattern.permute.xlu1 %v5340_v44  ;;  %v5538_v55 = vpop.f32.mrb[12].mxu0 }
 0x10f   :  { %7479 = vst [vmem:[#allocation13_spill] sm:$0xff] %v5538_v55  ;;  %1304 = vperm.xlu1 %4801, %v5469_v37   ;;  %v5541_v56 = vpop.f32.mrb[13].mxu0  ;;  %4563 = vmatprep.subr.bf16.mxu0 %v5522_v52 }
 0x110   :  { %7480 = vst [vmem:[#allocation14_spill] sm:$0xff] %v5541_v56  ;;  %4805 = vset.pattern.permute.xlu0 %v7396_v3  ;;  %v5545_v57 = vpop.f32.mrb[14].mxu0 }
 0x111   :  { %7481 = vst [vmem:[#allocation15_spill] sm:$0xff] %v5545_v57  ;;  %321 = vperm.xlu0 %4805, %v5487_v42   ;;  %v5550_v58 = vpack.c.bf16 %v5545_v57, %v5538_v55  ;;  %v5552_v59 = vpop.f32.mrb[15].mxu0 }
 0x112   :  { %7483 = vst [vmem:[#allocation17_spill] sm:$0xff] %v5552_v59  ;;  %v5556_v60 = vpack.c.bf16 %v5552_v59, %v5541_v56  ;;  %4564 = vmatpush3.bf16.msra.mxu0 %v5522_v52 }
 0x113   :  { %7482 = vst [vmem:[#allocation16_spill] sm:$0xff] %v5550_v58  ;;  %4803 = vset.pattern.permute.xlu1 %v5339_v41 }
 0x114   :  { %7484 = vst [vmem:[#allocation18_spill] sm:$0xff] %v5556_v60  ;;  %819 = vperm.xlu1 %4803, %v5475_v39   ;;  %4565 = vmatprep.subr.bf16.mxu0 %v5556_v60 }
 0x115   :  { %4806 = vset.pattern.permute.xlu0 %v5340_v44 }
 0x116   :  { %1316 = vperm.xlu0 %4806, %v5487_v42   ;;  %4566 = vmatpush3.bf16.msra.mxu0 %v5556_v60 }
 0x117   :  { %4567 = vmatprep.subr.bf16.mxu0 %v5550_v58 }
 0x118   :  { %839 = vperm.xlu1 %4803, %v5487_v42  }
 0x11a   :  { %4807 = vset.pattern.permute.xlu0 %v7396_v3  ;;  %4568 = vmatpush3.bf16.msra.mxu0 %v5550_v58 }
 0x11b   :  { %311 = vperm.xlu0 %4807, %v5490_v43   ;;  %4585 = vmatprep.subr.bf16.mxu0 %v5479_v40  ;;  %v5578_v4 = vpop.f32.mrb[0].mxu1 }
 0x11c   :  { %831 = vperm.xlu1 %4803, %v5490_v43   ;;  %v5583_v5 = vrot.slane %v5578_v4, %v880_v63  ;;  %v5586_v6 = vrot.slane %v5578_v4, %v1357_v0  ;;  %v4551_v7 = vpop.f32.mrb[1].mxu1  ;;  %v5590_v8 = vrot.slane %v5578_v4, %v1834_v2  ;;  %v5650_v13 = vrot.slane %v5578_v4, %v5646_v12 }
 0x11d   :  { %v278_v9 = vpop.f32.mrb[2].mxu1  ;;  %v5688_v4 = vunpack.c.h.bf16 %v4341_v19 }
 0x11e   :  { %7485 = vst [vmem:[#allocation19_spill] sm:$0xff] %v5590_v8  ;;  %v4552_v10 = vpop.f32.mrb[3].mxu1 }
 0x11f   :  { %4808 = vset.pattern.permute.xlu0 %v5340_v44 }
 0x120   :  { %1308 = vperm.xlu0 %4808, %v5490_v43   ;;  %4809 = vset.pattern.permute.xlu1 %v7396_v3 }
 0x121   :  { %326 = vperm.xlu1 %4809, %v5493_v45  }
 0x124   :  { %4810 = vset.pattern.permute.xlu0 %v5339_v41 }
 0x125   :  { %843 = vperm.xlu0 %4810, %v5493_v45   ;;  %4811 = vset.pattern.permute.xlu1 %v5340_v44 }
 0x126   :  { %1320 = vperm.xlu1 %4811, %v5493_v45  }
 0x129   :  { %835 = vperm.xlu0 %4810, %v5501_v47  }
 0x12a   :  { %4812 = vset.pattern.permute.xlu1 %v7396_v3 }
 0x12b   :  { %316 = vperm.xlu1 %4812, %v5501_v47  }
 0x12d   :  { %4814 = vset.pattern.permute.xlu0 %v7396_v3 }
 0x12e   :  { %341 = vperm.xlu0 %4814, %v5513_v49  }
 0x12f   :  { %4813 = vset.pattern.permute.xlu1 %v5340_v44 }
 0x130   :  { %1312 = vperm.xlu1 %4813, %v5501_v47  }
 0x132   :  { %4816 = vset.pattern.permute.xlu0 %v5340_v44 }
 0x133   :  { %1332 = vperm.xlu0 %4816, %v5513_v49  }
 0x134   :  { %4815 = vset.pattern.permute.xlu1 %v5339_v41 }
 0x135   :  { %855 = vperm.xlu1 %4815, %v5513_v49  }
 0x137   :  { %4817 = vset.pattern.permute.xlu0 %v7396_v3 }
 0x138   :  { %331 = vperm.xlu0 %4817, %v5515_v50  }
 0x139   :  { %847 = vperm.xlu1 %4815, %v5515_v50  }
 0x13c   :  { %4818 = vset.pattern.permute.xlu0 %v5340_v44 }
 0x13d   :  { %1324 = vperm.xlu0 %4818, %v5515_v50   ;;  %4819 = vset.pattern.permute.xlu1 %v7396_v3 }
 0x13e   :  { %346 = vperm.xlu1 %4819, %v5518_v51  }
 0x141   :  { %4820 = vset.pattern.permute.xlu0 %v5339_v41 }
 0x142   :  { %859 = vperm.xlu0 %4820, %v5518_v51   ;;  %4821 = vset.pattern.permute.xlu1 %v5340_v44 }
 0x143   :  { %1336 = vperm.xlu1 %4821, %v5518_v51  }
 0x146   :  { %851 = vperm.xlu0 %4820, %v5525_v53  }
 0x147   :  { %4822 = vset.pattern.permute.xlu1 %v7396_v3 }
 0x148   :  { %336 = vperm.xlu1 %4822, %v5525_v53  }
 0x14a   :  { %4824 = vset.pattern.permute.xlu0 %v7396_v3 }
 0x14b   :  { %361 = vperm.xlu0 %4824, %v5538_v55  }
 0x14c   :  { %4823 = vset.pattern.permute.xlu1 %v5340_v44 }
 0x14d   :  { %1328 = vperm.xlu1 %4823, %v5525_v53  }
 0x14f   :  { %4826 = vset.pattern.permute.xlu0 %v5340_v44 }
 0x150   :  { %1348 = vperm.xlu0 %4826, %v5538_v55  }
 0x151   :  { %4825 = vset.pattern.permute.xlu1 %v5339_v41 }
 0x152   :  { %871 = vperm.xlu1 %4825, %v5538_v55  }
 0x154   :  { %4827 = vset.pattern.permute.xlu0 %v7396_v3 }
 0x155   :  { %351 = vperm.xlu0 %4827, %v5541_v56  }
 0x156   :  { %863 = vperm.xlu1 %4825, %v5541_v56  }
 0x159   :  { %4828 = vset.pattern.permute.xlu0 %v5340_v44 }
 0x15a   :  { %1340 = vperm.xlu0 %4828, %v5541_v56   ;;  %4829 = vset.pattern.permute.xlu1 %v7396_v3 }
 0x15b   :  { %366 = vperm.xlu1 %4829, %v5545_v57  }
 0x15e   :  { %4830 = vset.pattern.permute.xlu0 %v5339_v41 }
 0x15f   :  { %875 = vperm.xlu0 %4830, %v5545_v57   ;;  %4831 = vset.pattern.permute.xlu1 %v5340_v44 }
 0x160   :  { %1352 = vperm.xlu1 %4831, %v5545_v57  }
 0x163   :  { %867 = vperm.xlu0 %4830, %v5552_v59  }
 0x164   :  { %4832 = vset.pattern.permute.xlu1 %v7396_v3 }
 0x165   :  { %356 = vperm.xlu1 %4832, %v5552_v59  }
 0x167   :  { %4835 = vset.pattern.permute.xlu0 %v5341_v11 }
 0x169   :  { %4833 = vset.pattern.permute.xlu1 %v5340_v44 }
 0x16a   :  { %1344 = vperm.xlu1 %4833, %v5552_v59  }
 0x16e   :  { %4834 = vset.pattern.permute.xlu1 %v5341_v11  ;;  %v5693_v11 = vunpack.c.h.bf16 %v4246_v25 }
 0x176   :  { %v302_v14 = vpop.permute.xlu1 %301 }
 0x177   :  { %v375_v15 = vadd.f32 %v5650_v13, %v302_v14  ;;  %v292_v16 = vpop.permute.xlu0 %291  ;;  %v4343_v14 = vld [vmem:[%s7393_s1 + $0x18] sm:$0xff]  }
 0x178   :  { %v373_v17 = vadd.f32 %v5650_v13, %v292_v16  ;;  %v5731_v3 = vunpack.c.h.bf16 %v4343_v14 }
 0x179   :  { %v391_v18 = vmul.f32 0.2, %v375_v15 }
 0x17a   :  { %v389_v21 = vmul.f32 0.2, %v373_v17 }
 0x17b   :  { %v5657_v20 = vpop.permute.xlu1 %823  ;;  %v407_v23 = vmax.f32 %v375_v15, %v391_v18  ;;  %v5702_v18 = vunpack.c.l.bf16 %v4343_v14  ;;  %v4345_v14 = vld [vmem:[%s7393_s1 + $0x28] sm:$0xff]  }
 0x17c   :  { %v5659_v22 = vpop.permute.xlu0 %815  ;;  %v405_v29 = vmax.f32 %v373_v17, %v389_v21  ;;  %v5752_v49 = vunpack.c.l.bf16 %v4345_v14  ;;  %v5781_v52 = vunpack.c.h.bf16 %v4345_v14 }
 0x17d   :  { %v5671_v28 = vadd.f32 %v5661_v24, %v407_v23 }
 0x17e   :  { %v5679_v32 = vadd.f32 %v5673_v30, %v405_v29 }
 0x180   :  { %v5666_v26 = vpop.permute.xlu1 %1300  ;;  %v5668_v27 = vpop.permute.xlu0 %827 }
 0x182   :  { %473 = vmax.xlane.f32.xlu0 %v5671_v28 }
 0x184   :  { %v5676_v31 = vpop.permute.xlu1 %1292 }
 0x185   :  { %v297_v33 = vpop.permute.xlu0 %296 }
 0x186   :  { %469 = vmax.xlane.f32.xlu0 %v5679_v32  ;;  %v374_v34 = vadd.f32 %v5650_v13, %v297_v33 }
 0x188   :  { %v390_v62 = vmul.f32 0.2, %v374_v34 }
 0x189   :  { %v307_v41 = vpop.permute.xlu1 %306 }
 0x18a   :  { %v376_v44 = vadd.f32 %v5650_v13, %v307_v41  ;;  %v406_v10 = vmax.f32 %v374_v34, %v390_v62  ;;  %v4342_v34 = vld [vmem:[%s7393_s1 + $0x10] sm:$0xff]  }
 0x18b   :  { %v5684_v61 = vpop.permute.xlu0 %1296 }
 0x18c   :  { %v392_v63 = vmul.f32 0.2, %v376_v44  ;;  %v5705_v19 = vadd.f32 %v5693_v11, %v406_v10 }
 0x18e   :  { %v5686_v0 = vpop.permute.xlu1 %1304  ;;  %v408_v2 = vmax.f32 %v376_v44, %v392_v63  ;;  %v5722_v63 = vunpack.c.l.bf16 %v4342_v34 }
 0x190   :  { %v322_v7 = vpop.permute.xlu0 %321  ;;  %v5691_v9 = vadd.f32 %v5688_v4, %v408_v2  ;;  %7489 = vst [vmem:[#allocation23_spill] sm:$0xff] %v5722_v63 }
 0x191   :  { %v379_v15 = vadd.f32 %v5650_v13, %v322_v7 }
 0x192   :  { %475 = vmax.xlane.f32.xlu1 %v5691_v9 }
 0x193   :  { %v395_v16 = vmul.f32 0.2, %v379_v15  ;;  %v5700_v17 = vpop.permute.xlu1 %819 }
 0x195   :  { %v5707_v21 = vpop.permute.xlu0 %1316  ;;  %v411_v23 = vmax.f32 %v379_v15, %v395_v16 }
 0x196   :  { %7487 = vst [vmem:[#allocation21_spill] sm:$0xff] %v5707_v21  ;;  %471 = vmax.xlane.f32.xlu1 %v5705_v19 }
 0x197   :  { %v5710_v25 = vpop.permute.xlu1 %839  ;;  %v5713_v29 = vadd.f32 %v5702_v18, %v411_v23 }
 0x199   :  { %7488 = vst [vmem:[#allocation22_spill] sm:$0xff] %v5713_v29  ;;  %481 = vmax.xlane.f32.xlu0 %v5713_v29 }
 0x19a   :  { %v312_v33 = vpop.permute.xlu0 %311 }
 0x19b   :  { %v377_v41 = vadd.f32 %v5650_v13, %v312_v33  ;;  %v5720_v44 = vpop.permute.xlu1 %831 }
 0x19d   :  { %v393_v62 = vmul.f32 0.2, %v377_v41 }
 0x19f   :  { %v5724_v2 = vpop.permute.xlu0 %1308  ;;  %v409_v7 = vmax.f32 %v377_v41, %v393_v62 }
 0x1a0   :  { %7490 = vst [vmem:[#allocation24_spill] sm:$0xff] %v5724_v2  ;;  %v327_v10 = vpop.permute.xlu1 %326 }
 0x1a1   :  { %v380_v15 = vadd.f32 %v5650_v13, %v327_v10  ;;  %v5728_v16 = vadd.f32 %v5722_v63, %v409_v7 }
 0x1a3   :  { %v396_v23 = vmul.f32 0.2, %v380_v15  ;;  %477 = vmax.xlane.f32.xlu0 %v5728_v16 }
 0x1a4   :  { %v5733_v33 = vpop.permute.xlu0 %843 }
 0x1a5   :  { %v5735_v1 = vpop.permute.xlu1 %1320  ;;  %v412_v12 = vmax.f32 %v380_v15, %v396_v23 }
 0x1a6   :  { %7491 = vst [vmem:[#allocation25_spill] sm:$0xff] %v5735_v1 }
 0x1a7   :  { %v5738_v21 = vadd.f32 %v5731_v3, %v412_v12  ;;  %v5750_v12 = vunpack.c.h.bf16 %v4342_v34 }
 0x1a8   :  { %v5740_v41 = vpop.permute.xlu0 %835 }
 0x1a9   :  { %7492 = vst [vmem:[#allocation26_spill] sm:$0xff] %v5738_v21  ;;  %483 = vmax.xlane.f32.xlu1 %v5738_v21 }
 0x1aa   :  { %v317_v62 = vpop.permute.xlu1 %316 }
 0x1ab   :  { %v378_v7 = vadd.f32 %v5650_v13, %v317_v62 }
 0x1ad   :  { %v394_v10 = vmul.f32 0.2, %v378_v7  ;;  %v342_v55 = vpop.permute.xlu0 %341 }
 0x1ae   :  { %v383_v8 = vadd.f32 %v5650_v13, %v342_v55 }
 0x1af   :  { %v5748_v56 = vpop.permute.xlu1 %1312  ;;  %v410_v15 = vmax.f32 %v378_v7, %v394_v10  ;;  %v4344_v7 = vld [vmem:[%s7393_s1 + $0x20] sm:$0xff]  }
 0x1b0   :  { %v399_v23 = vmul.f32 0.2, %v383_v8 }
 0x1b1   :  { %v5755_v50 = vadd.f32 %v5750_v12, %v410_v15 }
 0x1b2   :  { %v5757_v62 = vpop.permute.xlu0 %1332  ;;  %v415_v42 = vmax.f32 %v383_v8, %v399_v23  ;;  %v5772_v8 = vunpack.c.l.bf16 %v4344_v7 }
 0x1b3   :  { %7493 = vst [vmem:[#allocation27_spill] sm:$0xff] %v5755_v50  ;;  %7494 = vst [vmem:[#allocation28_spill] sm:$0xff] %v5757_v62  ;;  %479 = vmax.xlane.f32.xlu1 %v5755_v50 }
 0x1b4   :  { %v5760_v43 = vpop.permute.xlu1 %855  ;;  %v5763_v55 = vadd.f32 %v5752_v49, %v415_v42 }
 0x1b6   :  { %7495 = vst [vmem:[#allocation29_spill] sm:$0xff] %v5763_v55  ;;  %489 = vmax.xlane.f32.xlu0 %v5763_v55 }
 0x1b7   :  { %v332_v34 = vpop.permute.xlu0 %331 }
 0x1b8   :  { %v381_v10 = vadd.f32 %v5650_v13, %v332_v34  ;;  %v5770_v15 = vpop.permute.xlu1 %847 }
 0x1ba   :  { %v397_v62 = vmul.f32 0.2, %v381_v10 }
 0x1bc   :  { %v5774_v23 = vpop.permute.xlu0 %1324  ;;  %v413_v1 = vmax.f32 %v381_v10, %v397_v62 }
 0x1bd   :  { %7496 = vst [vmem:[#allocation30_spill] sm:$0xff] %v5774_v23  ;;  %v347_v58 = vpop.permute.xlu1 %346 }
 0x1be   :  { %v384_v42 = vadd.f32 %v5650_v13, %v347_v58  ;;  %v5778_v55 = vadd.f32 %v5772_v8, %v413_v1 }
 0x1c0   :  { %7497 = vst [vmem:[#allocation31_spill] sm:$0xff] %v5778_v55  ;;  %v400_v60 = vmul.f32 0.2, %v384_v42  ;;  %485 = vmax.xlane.f32.xlu0 %v5778_v55  ;;  %v5794_v55 = vunpack.c.h.bf16 %v4344_v7 }
 0x1c1   :  { %v860_v34 = vpop.permute.xlu0 %859 }
 0x1c2   :  { %v5783_v57 = vpop.permute.xlu1 %1336  ;;  %v416_v54 = vmax.f32 %v384_v42, %v400_v60 }
 0x1c3   :  { %7498 = vst [vmem:[#allocation32_spill] sm:$0xff] %v5783_v57 }
 0x1c4   :  { %v5786_v59 = vadd.f32 %v5781_v52, %v416_v54 }
 0x1c5   :  { %v852_v23 = vpop.permute.xlu0 %851 }
 0x1c6   :  { %7499 = vst [vmem:[#allocation33_spill] sm:$0xff] %v5786_v59  ;;  %491 = vmax.xlane.f32.xlu1 %v5786_v59 }
 0x1c7   :  { %v337_v62 = vpop.permute.xlu1 %336 }
 0x1c8   :  { %v382_v58 = vadd.f32 %v5650_v13, %v337_v62  ;;  %v4346_v62 = vld [vmem:[%s7393_s1 + $0x30] sm:$0xff]  }
 0x1ca   :  { %v398_v1 = vmul.f32 0.2, %v382_v58  ;;  %v5790_v10 = vpop.permute.xlu0 %361 }
 0x1cc   :  { %v5792_v50 = vpop.permute.xlu1 %1328  ;;  %v414_v14 = vmax.f32 %v382_v58, %v398_v1  ;;  %v5810_v58 = vunpack.c.l.bf16 %v4346_v62 }
 0x1cd   :  { %7500 = vst [vmem:[#allocation34_spill] sm:$0xff] %v5792_v50 }
 0x1ce   :  { %v5797_v57 = vadd.f32 %v5794_v55, %v414_v14 }
 0x1cf   :  { %v5799_v60 = vpop.permute.xlu0 %1348 }
 0x1d0   :  { %7501 = vst [vmem:[#allocation35_spill] sm:$0xff] %v5797_v57  ;;  %7502 = vst [vmem:[#allocation36_spill] sm:$0xff] %v5799_v60  ;;  %487 = vmax.xlane.f32.xlu1 %v5797_v57 }
 0x1d1   :  { %v5802_v54 = vpop.permute.xlu1 %871 }
 0x1d4   :  { %v352_v42 = vpop.permute.xlu0 %351 }
 0x1d5   :  { %v385_v59 = vadd.f32 %v5650_v13, %v352_v42  ;;  %v5808_v50 = vpop.permute.xlu1 %863  ;;  %v887_v42 = vadd.f32 %v5583_v5, %v5740_v41 }
 0x1d7   :  { %v401_v7 = vmul.f32 0.2, %v385_v59 }
 0x1d9   :  { %v417_v1 = vmax.f32 %v385_v59, %v401_v7  ;;  %v5822_v2 = vpop.permute.xlu0 %1340  ;;  %v5824_v7 = vunpack.c.h.bf16 %v4346_v62 }
 0x1da   :  { %v367_v14 = vpop.permute.xlu1 %366  ;;  %7505 = vst [vmem:[#allocation39_spill] sm:$0xff] %v5822_v2 }
 0x1db   :  { %v5813_v60 = vadd.f32 %v5810_v58, %v417_v1  ;;  %v388_v46 = vadd.f32 %v5650_v13, %v367_v14  ;;  %v4347_v1 = vld [vmem:[%s7393_s1 + $0x38] sm:$0xff]   ;;  %v889_v14 = vadd.f32 %v5583_v5, %v5733_v33  ;;  %v893_v33 = vadd.f32 %v5583_v5, %v860_v34 }
 0x1dd   :  { %7503 = vst [vmem:[#allocation37_spill] sm:$0xff] %v5813_v60  ;;  %493 = vmax.xlane.f32.xlu1 %v5813_v60  ;;  %v404_v48 = vmul.f32 0.2, %v388_v46  ;;  %v5829_v60 = vunpack.c.h.bf16 %v4347_v1 }
 0x1de   :  { %v876_v2 = vpop.permute.xlu0 %875 }
 0x1df   :  { %v5816_v57 = vpop.permute.xlu1 %1352  ;;  %v420_v41 = vmax.f32 %v388_v46, %v404_v48 }
 0x1e0   :  { %7504 = vst [vmem:[#allocation38_spill] sm:$0xff] %v5816_v57 }
 0x1e1   :  { %v5840_v62 = vadd.f32 %v5829_v60, %v420_v41 }
 0x1e4   :  { %v357_v51 = vpop.permute.xlu1 %356 }
 0x1e5   :  { %v386_v29 = vadd.f32 %v5650_v13, %v357_v51  ;;  %v903_v51 = vmul.f32 0.2, %v887_v42 }
 0x1e7   :  { %v402_v21 = vmul.f32 0.2, %v386_v29  ;;  %v919_v53 = vmax.f32 %v887_v42, %v903_v51 }
 0x1e9   :  { %v418_v59 = vmax.f32 %v386_v29, %v402_v21  ;;  %v905_v21 = vmul.f32 0.2, %v889_v14  ;;  %v891_v29 = vadd.f32 %v5583_v5, %v852_v23  ;;  %v5846_v46 = vadd.f32 %v5750_v12, %v919_v53 }
 0x1eb   :  { %v5834_v57 = vadd.f32 %v5824_v7, %v418_v59  ;;  %v907_v59 = vmul.f32 0.2, %v891_v29  ;;  %v921_v48 = vmax.f32 %v889_v14, %v905_v21  ;;  %v1360_v14 = vadd.f32 %v5586_v6, %v5684_v61 }
 0x1ec   :  { %v1364_v61 = vadd.f32 %v5586_v6, %v5748_v56 }
 0x1ed   :  { %7506 = vst [vmem:[#allocation40_spill] sm:$0xff] %v5834_v57  ;;  %495 = vmax.xlane.f32.xlu0 %v5834_v57  ;;  %v868_v57 = vpop.permute.xlu0 %867  ;;  %v5851_v41 = vadd.f32 %v5731_v3, %v921_v48  ;;  %v923_v42 = vmax.f32 %v891_v29, %v907_v59  ;;  %v1376_v29 = vmul.f32 0.2, %v1360_v14 }
 0x1ee   :  { %1773 = vperm.xlu1 %4834, %v5475_v39   ;;  %v909_v39 = vmul.f32 0.2, %v893_v33  ;;  %v895_v23 = vadd.f32 %v5583_v5, %v868_v57 }
 0x1ef   :  { %v5856_v51 = vadd.f32 %v5794_v55, %v923_v42 }
 0x1f0   :  { %v911_v34 = vmul.f32 0.2, %v895_v23  ;;  %v925_v53 = vmax.f32 %v893_v33, %v909_v39 }
 0x1f1   :  { %499 = vmax.xlane.f32.xlu0 %v5840_v62 }
 0x1f2   :  { %1777 = vperm.xlu1 %4834, %v5463_v35   ;;  %v897_v35 = vadd.f32 %v5583_v5, %v876_v2  ;;  %v5862_v57 = vadd.f32 %v5781_v52, %v925_v53  ;;  %v927_v48 = vmax.f32 %v895_v23, %v911_v34  ;;  %v1362_v2 = vadd.f32 %v5586_v6, %v5686_v0 }
 0x1f3   :  { %v1392_v23 = vmax.f32 %v1360_v14, %v1376_v29  ;;  %v387_v34 = vadd.f32 %v5650_v13, %v5790_v10  ;;  %v1380_v0 = vmul.f32 0.2, %v1364_v61  ;;  %v883_v13 = vadd.f32 %v5583_v5, %v5700_v17 }
 0x1f4   :  { %v913_v21 = vmul.f32 0.2, %v897_v35  ;;  %v5868_v59 = vadd.f32 %v5824_v7, %v927_v48  ;;  %v1378_v39 = vmul.f32 0.2, %v1362_v2 }
 0x1f5   :  { %956 = vmax.xlane.f32.xlu0 %v5846_v46  ;;  %v5880_v53 = vadd.f32 %v5693_v11, %v1392_v23  ;;  %v403_v48 = vmul.f32 0.2, %v387_v34  ;;  %v1396_v14 = vmax.f32 %v1364_v61, %v1380_v0 }
 0x1f6   :  { %v929_v33 = vmax.f32 %v897_v35, %v913_v21  ;;  %v1394_v35 = vmax.f32 %v1362_v2, %v1378_v39  ;;  %v882_v21 = vadd.f32 %v5583_v5, %v5659_v22  ;;  %v884_v22 = vadd.f32 %v5583_v5, %v5657_v20  ;;  %v5909_v20 = vpop.permute.xlu1 %1344 }
 0x1f7   :  { %7508 = vst [vmem:[#allocation42_spill] sm:$0xff] %v5880_v53  ;;  %v419_v10 = vmax.f32 %v387_v34, %v403_v48  ;;  %v5894_v2 = vadd.f32 %v5750_v12, %v1396_v14  ;;  %v899_v39 = vmul.f32 0.2, %v883_v13 }
 0x1f8   :  { %v5874_v42 = vadd.f32 %v5829_v60, %v929_v33  ;;  %v5886_v56 = vadd.f32 %v5688_v4, %v1394_v35  ;;  %v898_v29 = vmul.f32 0.2, %v882_v21  ;;  %v5890_v33 = vunpack.c.l.bf16 %v4347_v1 }
 0x1f9   :  { %960 = vmax.xlane.f32.xlu0 %v5851_v41  ;;  %7510 = vst [vmem:[#allocation44_spill] sm:$0xff] %v5894_v2  ;;  %v900_v17 = vmul.f32 0.2, %v884_v22  ;;  %v885_v1 = vadd.f32 %v5583_v5, %v5668_v27  ;;  %v915_v35 = vmax.f32 %v883_v13, %v899_v39  ;;  %v888_v27 = vadd.f32 %v5583_v5, %v5710_v25 }
 0x1fa   :  { %7507 = vst [vmem:[#allocation41_spill] sm:$0xff] %v5874_v42  ;;  %7509 = vst [vmem:[#allocation43_spill] sm:$0xff] %v5886_v56  ;;  %v5899_v23 = vadd.f32 %v5890_v33, %v419_v10  ;;  %v914_v61 = vmax.f32 %v882_v21, %v898_v29  ;;  %v886_v21 = vadd.f32 %v5583_v5, %v5720_v44 }
 0x1fb   :  { %v901_v14 = vmul.f32 0.2, %v885_v1  ;;  %v5914_v29 = vadd.f32 %v5693_v11, %v915_v35  ;;  %v916_v10 = vmax.f32 %v884_v22, %v900_v17  ;;  %v904_v22 = vmul.f32 0.2, %v888_v27 }
 0x1fc   :  { %v5906_v34 = vadd.f32 %v5673_v30, %v914_v61  ;;  %v902_v39 = vmul.f32 0.2, %v886_v21 }
 0x1fd   :  { %964 = vmax.xlane.f32.xlu0 %v5856_v51 }
 0x201   :  { %968 = vmax.xlane.f32.xlu0 %v5862_v57 }
 0x205   :  { %972 = vmax.xlane.f32.xlu0 %v5868_v59 }
 0x209   :  { %976 = vmax.xlane.f32.xlu0 %v5874_v42 }
 0x20d   :  { %1425 = vmax.xlane.f32.xlu0 %v5880_v53  ;;  %v917_v53 = vmax.f32 %v885_v1, %v901_v14 }
 0x20f   :  { %v474_v0 = vpop.xlane.xlu0 %473  ;;  %v5930_v42 = vadd.f32 %v5688_v4, %v917_v53  ;;  %v894_v53 = vadd.f32 %v5583_v5, %v5808_v50 }
 0x210   :  { %v503_v44 = vsub.f32 %v5671_v28, %v474_v0  ;;  %v920_v28 = vmax.f32 %v888_v27, %v904_v22  ;;  %v896_v27 = vadd.f32 %v5583_v5, %v5802_v54 }
 0x211   :  { %1429 = vmax.xlane.f32.xlu0 %v5886_v56  ;;  %v5922_v56 = vadd.f32 %v5661_v24, %v916_v10 }
 0x212   :  { %v521_v10 = vmul.f32 1.442695, %v503_v44  ;;  %v5943_v14 = vadd.f32 %v5702_v18, %v920_v28  ;;  %v912_v22 = vmul.f32 0.2, %v896_v27 }
 0x213   :  { %v470_v48 = vpop.xlane.xlu0 %469 }
 0x215   :  { %1433 = vmax.xlane.f32.xlu0 %v5894_v2  ;;  %v501_v2 = vsub.f32 %v5679_v32, %v470_v48  ;;  %v890_v48 = vadd.f32 %v5583_v5, %v5770_v15 }
 0x216   :  { %497 = vmax.xlane.f32.xlu1 %v5899_v23 }
 0x217   :  { %v517_v35 = vmul.f32 1.442695, %v501_v2  ;;  %v892_v2 = vadd.f32 %v5583_v5, %v5760_v43  ;;  %v906_v0 = vmul.f32 0.2, %v890_v48 }
 0x219   :  { %4888 = vpow2.f32 %v517_v35  ;;  %v1359_v35 = vadd.f32 %v5586_v6, %v5676_v31 }
 0x21a   :  { %946 = vmax.xlane.f32.xlu1 %v5906_v34 }
 0x21e   :  { %948 = vmax.xlane.f32.xlu1 %v5914_v29 }
 0x21f   :  { %v476_v13 = vpop.xlane.xlu1 %475 }
 0x220   :  { %v504_v61 = vsub.f32 %v5691_v9, %v476_v13  ;;  %v918_v9 = vmax.f32 %v886_v21, %v902_v39  ;;  %v922_v21 = vmax.f32 %v890_v48, %v906_v0  ;;  %v910_v13 = vmul.f32 0.2, %v894_v53  ;;  %v7513_v0 = vld [vmem:[#allocation26_spill] sm:$0xff] }
 0x221   :  { %v1361_v48 = vadd.f32 %v5586_v6, %v5666_v26  ;;  %v7511_v26 = vld [vmem:[#allocation11_spill] sm:$0xff] }
 0x222   :  { %950 = vmax.xlane.f32.xlu1 %v5922_v56  ;;  %v523_v32 = vmul.f32 1.442695, %v504_v61  ;;  %v5936_v15 = vadd.f32 %v5722_v63, %v918_v9  ;;  %v5950_v39 = vadd.f32 %v5772_v8, %v922_v21  ;;  %v928_v9 = vmax.f32 %v896_v27, %v912_v22  ;;  %v7515_v27 = vld [vmem:[#allocation22_spill] sm:$0xff] }
 0x223   :  { %v472_v17 = vpop.xlane.xlu1 %471  ;;  %v4889_v43 = vpop.eup %4888 }
 0x224   :  { %v502_v25 = vsub.f32 %v5705_v19, %v472_v17  ;;  %4890 = vpow2.f32 %v523_v32  ;;  %v908_v19 = vmul.f32 0.2, %v892_v2  ;;  %v926_v17 = vmax.f32 %v894_v53, %v910_v13  ;;  %v7514_v53 = vld [vmem:[#allocation6_spill] sm:$0xff] }
 0x225   :  { %v5977_v21 = vadd.f32 %v5890_v33, %v928_v9  ;;  %v7520_v9 = vld [vmem:[#allocation12_spill] sm:$0xff] }
 0x226   :  { %v519_v1 = vmul.f32 1.442695, %v502_v25  ;;  %952 = vmax.xlane.f32.xlu1 %v5930_v42  ;;  %v482_v32 = vpop.xlane.xlu0 %481  ;;  %v5966_v25 = vadd.f32 %v5810_v58, %v926_v17  ;;  %v7518_v17 = vld [vmem:[#allocation27_spill] sm:$0xff] }
 0x227   :  { %v507_v13 = vsub.f32 %v7515_v27, %v482_v32 }
 0x228   :  { %4892 = vpow2.f32 %v519_v1  ;;  %v1377_v1 = vmul.f32 0.2, %v1361_v48 }
 0x229   :  { %4894 = vpow2.f32 %v521_v10 }
 0x22a   :  { %954 = vmax.xlane.f32.xlu1 %v5936_v15 }
 0x22b   :  { %1769 = vperm.xlu0 %4835, %v5466_v36   ;;  %v924_v36 = vmax.f32 %v892_v2, %v908_v19  ;;  %v7512_v2 = vld [vmem:[#allocation24_spill] sm:$0xff] }
 0x22d   :  { %v5957_v5 = vadd.f32 %v5752_v49, %v924_v36  ;;  %v7516_v36 = vld [vmem:[#allocation9_spill] sm:$0xff] }
 0x22e   :  { %958 = vmax.xlane.f32.xlu1 %v5943_v14  ;;  %v4891_v61 = vpop.eup %4890 }
 0x22f   :  { %1781 = vperm.xlu0 %4835, %v5469_v37  }
 0x230   :  { %v478_v31 = vpop.xlane.xlu0 %477 }
 0x231   :  { %v505_v28 = vsub.f32 %v5728_v16, %v478_v31  ;;  %v7519_v31 = vld [vmem:[#allocation17_spill] sm:$0xff] }
 0x232   :  { %v4893_v44 = vpop.eup %4892  ;;  %962 = vmax.xlane.f32.xlu1 %v5950_v39 }
 0x233   :  { %v4895_v50 = vpop.eup %4894  ;;  %1789 = vperm.xlu0 %4835, %v5501_v47   ;;  %v549_v37 = vpack.c.bf16 %v4893_v44, %v4889_v43  ;;  %v1375_v47 = vmul.f32 0.2, %v1359_v35  ;;  %v525_v16 = vmul.f32 1.442695, %v505_v28 }
 0x234   :  { %v550_v54 = vpack.c.bf16 %v4891_v61, %v4895_v50  ;;  %v7517_v50 = vld [vmem:[#allocation5_spill] sm:$0xff] }
 0x235   :  { %4569 = vmatprep.mubr.bf16.mxu0 %v549_v37  ;;  %v1391_v43 = vmax.f32 %v1359_v35, %v1375_v47  ;;  %v529_v47 = vmul.f32 1.442695, %v507_v13  ;;  %4896 = vpow2.f32 %v525_v16 }
 0x236   :  { %966 = vmax.xlane.f32.xlu1 %v5957_v5  ;;  %4570 = vmatmul.mubr.bf16.vlgmr.msra.gmra.mrb[16].mxu0 %v550_v54  ;;  %v484_v10 = vpop.xlane.xlu1 %483  ;;  %v1393_v54 = vmax.f32 %v1361_v48, %v1377_v1  ;;  %v7521_v48 = vld [vmem:[#allocation15_spill] sm:$0xff]  ;;  %v7522_v1 = vld [vmem:[#allocation10_spill] sm:$0xff] }
 0x237   :  { %4586 = vmatpush3.bf16.msra.mxu0 %v5479_v40  ;;  %1797 = vperm.xlu0 %4835, %v5493_v45   ;;  %v1363_v45 = vadd.f32 %v5586_v6, %v7512_v2  ;;  %v508_v19 = vsub.f32 %v7513_v0, %v484_v10  ;;  %v5985_v22 = vadd.f32 %v5673_v30, %v1391_v43  ;;  %v7524_v2 = vld [vmem:[#allocation18_spill] sm:$0xff]  ;;  %v7525_v43 = vld [vmem:[#allocation16_spill] sm:$0xff] }
 0x238   :  { %4587 = vmatprep.subr.bf16.mxu0 %v5473_v38  ;;  %v5993_v10 = vadd.f32 %v5661_v24, %v1393_v54 }
 0x239   :  { %v1379_v61 = vmul.f32 0.2, %v1363_v45  ;;  %v531_v44 = vmul.f32 1.442695, %v508_v19 }
 0x23a   :  { %970 = vmax.xlane.f32.xlu1 %v5966_v25 }
 0x23b   :  { %4588 = vmatpush3.bf16.msra.mxu0 %v5473_v38  ;;  %1805 = vperm.xlu0 %4835, %v7511_v26   ;;  %4898 = vpow2.f32 %v531_v44  ;;  %v1395_v28 = vmax.f32 %v1363_v45, %v1379_v61 }
 0x23c   :  { %4589 = vmatprep.subr.bf16.mxu0 %v7514_v53 }
 0x23d   :  { %v6000_v26 = vadd.f32 %v5722_v63, %v1395_v28  ;;  %v7529_v28 = vld [vmem:[#allocation29_spill] sm:$0xff]  ;;  %v7532_v63 = vld [vmem:[#allocation35_spill] sm:$0xff] }
 0x23e   :  { %974 = vmax.xlane.f32.xlu1 %v5977_v21 }
 0x23f   :  { %4590 = vmatpush3.bf16.msra.mxu0 %v7514_v53  ;;  %1813 = vperm.xlu0 %4835, %v7516_v36   ;;  %7523 = vst [vmem:[#allocation11_spill] sm:$0xff] %v6000_v26  ;;  %v4897_v45 = vpop.eup %4896 }
 0x240   :  { %4591 = vmatprep.subr.bf16.mxu0 %v7517_v50  ;;  %v480_v37 = vpop.xlane.xlu1 %479 }
 0x241   :  { %v506_v35 = vsub.f32 %v7518_v17, %v480_v37  ;;  %v7526_v37 = vld [vmem:[#allocation25_spill] sm:$0xff]  ;;  %v7527_v17 = vld [vmem:[#allocation31_spill] sm:$0xff] }
 0x242   :  { %1423 = vmax.xlane.f32.xlu1 %v5985_v22  ;;  %v1366_v54 = vadd.f32 %v5586_v6, %v7526_v37 }
 0x243   :  { %v527_v32 = vmul.f32 1.442695, %v506_v35  ;;  %4592 = vmatpush3.bf16.msra.mxu0 %v7517_v50  ;;  %1821 = vperm.xlu0 %4835, %v7519_v31   ;;  %v490_v16 = vpop.xlane.xlu0 %489 }
 0x244   :  { %4593 = vmatprep.subr.bf16.mxu0 %v7520_v9  ;;  %v1382_v31 = vmul.f32 0.2, %v1366_v54 }
 0x245   :  { %4900 = vpow2.f32 %v527_v32  ;;  %v4899_v0 = vpop.eup %4898 }
 0x246   :  { %1427 = vmax.xlane.f32.xlu1 %v5993_v10  ;;  %4902 = vpow2.f32 %v529_v47  ;;  %v7528_v47 = vld [vmem:[#allocation33_spill] sm:$0xff]  ;;  %v1398_v37 = vmax.f32 %v1366_v54, %v1382_v31  ;;  %v7538_v31 = vld [vmem:[#allocation38_spill] sm:$0xff] }
 0x247   :  { %4594 = vmatpush3.bf16.msra.mxu0 %v7520_v9  ;;  %1829 = vperm.xlu0 %4835, %v7521_v48   ;;  %v511_v48 = vsub.f32 %v7529_v28, %v490_v16 }
 0x248   :  { %4595 = vmatprep.subr.bf16.mxu0 %v7522_v1  ;;  %v6025_v28 = vadd.f32 %v5731_v3, %v1398_v37 }
 0x24a   :  { %1431 = vmax.xlane.f32.xlu1 %v6000_v26  ;;  %v7533_v26 = vld [vmem:[#allocation3_spill] sm:$0xff]  ;;  %7536 = vst [vmem:[#allocation24_spill] sm:$0xff] %v6025_v28 }
 0x24b   :  { %4596 = vmatpush3.bf16.msra.mxu0 %v7522_v1 }
 0x24c   :  { %4597 = vmatprep.subr.bf16.mxu0 %v7524_v2 }
 0x24d   :  { %v486_v61 = vpop.xlane.xlu0 %485 }
 0x24e   :  { %v509_v35 = vsub.f32 %v7527_v17, %v486_v61  ;;  %v7534_v61 = vld [vmem:[#allocation32_spill] sm:$0xff] }
 0x24f   :  { %v4901_v19 = vpop.eup %4900  ;;  %4598 = vmatpush3.bf16.msra.mxu0 %v7524_v2  ;;  %v537_v2 = vmul.f32 1.442695, %v511_v48 }
 0x250   :  { %4599 = vmatprep.subr.bf16.mxu0 %v7525_v43  ;;  %v551_v27 = vpack.c.bf16 %v4901_v19, %v4897_v45  ;;  %v4903_v13 = vpop.eup %4902  ;;  %v7530_v45 = vld [vmem:[#allocation4_spill] sm:$0xff] }
 0x251   :  { %v552_v36 = vpack.c.bf16 %v4899_v0, %v4903_v13  ;;  %v7531_v0 = vld [vmem:[#allocation34_spill] sm:$0xff] }
 0x252   :  { %4573 = vmatprep.mubr.bf16.mxu0 %v551_v27  ;;  %v1368_v19 = vadd.f32 %v5586_v6, %v7531_v0  ;;  %v533_v27 = vmul.f32 1.442695, %v509_v35 }
 0x253   :  { %4600 = vmatpush3.bf16.msra.mxu0 %v7525_v43  ;;  %v492_v44 = vpop.xlane.xlu1 %491 }
 0x254   :  { %4574 = vmatmul.mubr.bf16.gmra.mrb[20].mxu0 %v552_v36  ;;  %4617 = vmatprep.subr.bf16.mxu0 %v5479_v40  ;;  %v512_v32 = vsub.f32 %v7528_v47, %v492_v44  ;;  %v1370_v44 = vadd.f32 %v5586_v6, %v7534_v61  ;;  %v1384_v17 = vmul.f32 0.2, %v1368_v19  ;;  %4904 = vpow2.f32 %v533_v27  ;;  %v7535_v47 = vld [vmem:[#allocation8_spill] sm:$0xff] }
 0x256   :  { %v539_v13 = vmul.f32 1.442695, %v512_v32  ;;  %v1386_v35 = vmul.f32 0.2, %v1370_v44  ;;  %v1400_v32 = vmax.f32 %v1368_v19, %v1384_v17  ;;  %v7540_v19 = vld [vmem:[#allocation14_spill] sm:$0xff] }
 0x258   :  { %4906 = vpow2.f32 %v539_v13  ;;  %v1402_v54 = vmax.f32 %v1370_v44, %v1386_v35 }
 0x25a   :  { %v6037_v37 = vadd.f32 %v5781_v52, %v1402_v54 }
 0x25b   :  { %1785 = vperm.xlu1 %4834, %v7530_v45  }
 0x25c   :  { %7541 = vst [vmem:[#allocation6_spill] sm:$0xff] %v6037_v37 }
 0x25d   :  { %v488_v36 = vpop.xlane.xlu1 %487 }
 0x25e   :  { %v510_v43 = vsub.f32 %v7532_v63, %v488_v36  ;;  %v1372_v63 = vadd.f32 %v5586_v6, %v5909_v20  ;;  %v4905_v45 = vpop.eup %4904 }
 0x25f   :  { %1793 = vperm.xlu1 %4834, %v7533_v26   ;;  %v7537_v26 = vld [vmem:[#allocation7_spill] sm:$0xff] }
 0x260   :  { %v535_v16 = vmul.f32 1.442695, %v510_v43  ;;  %v1374_v43 = vadd.f32 %v5586_v6, %v7538_v31  ;;  %v1388_v48 = vmul.f32 0.2, %v1372_v63 }
 0x262   :  { %4908 = vpow2.f32 %v535_v16  ;;  %v4907_v20 = vpop.eup %4906  ;;  %v1390_v13 = vmul.f32 0.2, %v1374_v43  ;;  %v1404_v36 = vmax.f32 %v1372_v63, %v1388_v48 }
 0x263   :  { %4910 = vpow2.f32 %v537_v2  ;;  %1801 = vperm.xlu1 %4834, %v7535_v47   ;;  %v6032_v2 = vadd.f32 %v5794_v55, %v1400_v32  ;;  %v7542_v47 = vld [vmem:[#allocation19_spill] sm:$0xff]  ;;  %v7543_v32 = vld [vmem:[#allocation13_spill] sm:$0xff] }
 0x264   :  { %v6043_v31 = vadd.f32 %v5824_v7, %v1404_v36 }
 0x265   :  { %7539 = vst [vmem:[#allocation26_spill] sm:$0xff] %v6032_v2 }
 0x266   :  { %1437 = vmax.xlane.f32.xlu0 %v6025_v28  ;;  %7544 = vst [vmem:[#allocation22_spill] sm:$0xff] %v6043_v31 }
 0x267   :  { %1809 = vperm.xlu1 %4834, %v7537_v26   ;;  %v1406_v26 = vmax.f32 %v1374_v43, %v1390_v13  ;;  %v7548_v13 = vld [vmem:[#allocation40_spill] sm:$0xff] }
 0x269   :  { %v6047_v48 = vadd.f32 %v5829_v60, %v1406_v26 }
 0x26a   :  { %v494_v0 = vpop.xlane.xlu1 %493  ;;  %1441 = vmax.xlane.f32.xlu0 %v6032_v2 }
 0x26b   :  { %1817 = vperm.xlu1 %4834, %v7540_v19   ;;  %7545 = vst [vmem:[#allocation9_spill] sm:$0xff] %v6047_v48 }
 0x26c   :  { %v4909_v27 = vpop.eup %4908 }
 0x26d   :  { %v4911_v61 = vpop.eup %4910  ;;  %v553_v44 = vpack.c.bf16 %v4909_v27, %v4905_v45  ;;  %v7546_v45 = vld [vmem:[#allocation37_spill] sm:$0xff] }
 0x26e   :  { %v1774_v17 = vpop.permute.xlu1 %1773  ;;  %1445 = vmax.xlane.f32.xlu0 %v6037_v37  ;;  %v554_v16 = vpack.c.bf16 %v4907_v20, %v4911_v61  ;;  %v513_v19 = vsub.f32 %v7546_v45, %v494_v0 }
 0x26f   :  { %v1837_v35 = vadd.f32 %v7542_v47, %v1774_v17  ;;  %1825 = vperm.xlu1 %4834, %v7543_v32   ;;  %4577 = vmatprep.mubr.bf16.mxu0 %v553_v44 }
 0x270   :  { %4578 = vmatmul.mubr.bf16.gmra.mrb[24].mxu0 %v554_v16  ;;  %v541_v27 = vmul.f32 1.442695, %v513_v19  ;;  %v7549_v16 = vld [vmem:[#allocation21_spill] sm:$0xff] }
 0x271   :  { %v1853_v63 = vmul.f32 0.2, %v1837_v35  ;;  %v1365_v0 = vadd.f32 %v5586_v6, %v7549_v16 }
 0x272   :  { %1449 = vmax.xlane.f32.xlu0 %v6043_v31  ;;  %4912 = vpow2.f32 %v541_v27 }
 0x273   :  { %v1869_v54 = vmax.f32 %v1837_v35, %v1853_v63  ;;  %v1381_v26 = vmul.f32 0.2, %v1365_v0  ;;  %v7550_v63 = vld [vmem:[#allocation30_spill] sm:$0xff] }
 0x275   :  { %v6052_v20 = vadd.f32 %v5693_v11, %v1869_v54  ;;  %v1367_v54 = vadd.f32 %v5586_v6, %v7550_v63  ;;  %v1397_v27 = vmax.f32 %v1365_v0, %v1381_v26  ;;  %v7554_v0 = vld [vmem:[#allocation36_spill] sm:$0xff] }
 0x276   :  { %1453 = vmax.xlane.f32.xlu0 %v6047_v48  ;;  %v7552_v48 = vld [vmem:[#allocation39_spill] sm:$0xff] }
 0x277   :  { %7547 = vst [vmem:[#allocation5_spill] sm:$0xff] %v6052_v20  ;;  %v1371_v31 = vadd.f32 %v5586_v6, %v7552_v48  ;;  %v6073_v37 = vadd.f32 %v5702_v18, %v1397_v27 }
 0x279   :  { %7553 = vst [vmem:[#allocation27_spill] sm:$0xff] %v6073_v37  ;;  %v1387_v26 = vmul.f32 0.2, %v1371_v31 }
 0x27a   :  { %v496_v43 = vpop.xlane.xlu0 %495  ;;  %1902 = vmax.xlane.f32.xlu0 %v6052_v20 }
 0x27b   :  { %v514_v36 = vsub.f32 %v7548_v13, %v496_v43  ;;  %v7551_v43 = vld [vmem:[#allocation28_spill] sm:$0xff] }
 0x27c   :  { %v4913_v32 = vpop.eup %4912  ;;  %v1369_v13 = vadd.f32 %v5586_v6, %v7551_v43 }
 0x27d   :  { %v543_v61 = vmul.f32 1.442695, %v514_v36  ;;  %v1383_v36 = vmul.f32 0.2, %v1367_v54 }
 0x27e   :  { %v500_v44 = vpop.xlane.xlu0 %499  ;;  %v1385_v16 = vmul.f32 0.2, %v1369_v13 }
 0x27f   :  { %4914 = vpow2.f32 %v543_v61  ;;  %v1399_v20 = vmax.f32 %v1367_v54, %v1383_v36  ;;  %v1403_v54 = vmax.f32 %v1371_v31, %v1387_v26 }
 0x282   :  { %v6056_v17 = vpop.xlane.xlu0 %956 }
 0x286   :  { %v6060_v35 = vpop.xlane.xlu0 %960 }
 0x289   :  { %v4915_v11 = vpop.eup %4914 }
 0x28a   :  { %v6064_v45 = vpop.xlane.xlu0 %964  ;;  %v555_v19 = vpack.c.bf16 %v4915_v11, %v4913_v32  ;;  %v1401_v32 = vmax.f32 %v1369_v13, %v1385_v16  ;;  %v1373_v11 = vadd.f32 %v5586_v6, %v7554_v0  ;;  %v6093_v6 = vadd.f32 %v5810_v58, %v1403_v54 }
 0x28b   :  { %v7447_v16 = vmov 64   ;;  %v516_v0 = vsub.f32 %v5840_v62, %v500_v44 }
 0x28c   :  { %4581 = vmatprep.mubr.bf16.mxu0 %v555_v19  ;;  %v6081_v19 = vadd.f32 %v5772_v8, %v1399_v20  ;;  %v1389_v48 = vmul.f32 0.2, %v1373_v11  ;;  %v6087_v27 = vadd.f32 %v5752_v49, %v1401_v32  ;;  %7557 = vst [vmem:[#allocation15_spill] sm:$0xff] %v6093_v6  ;;  %4836 = vset.pattern.permute.xlu1 %v7447_v16  ;;  %v1778_v20 = vpop.permute.xlu1 %1777 }
 0x28d   :  { %4837 = vset.pattern.permute.xlu0 %v7447_v16  ;;  %v547_v26 = vmul.f32 1.442695, %v516_v0  ;;  %v1838_v44 = vadd.f32 %v7542_v47, %v1778_v20 }
 0x28e   :  { %v6068_v61 = vpop.xlane.xlu0 %968  ;;  %7555 = vst [vmem:[#allocation17_spill] sm:$0xff] %v6081_v19  ;;  %7556 = vst [vmem:[#allocation12_spill] sm:$0xff] %v6087_v27  ;;  %v1405_v13 = vmax.f32 %v1373_v11, %v1389_v48 }
 0x28f   :  { %4916 = vpow2.f32 %v547_v26 }
 0x290   :  { %v6102_v32 = vadd.f32 %v5890_v33, %v1405_v13 }
 0x292   :  { %v6075_v63 = vpop.xlane.xlu0 %972  ;;  %7558 = vst [vmem:[#allocation10_spill] sm:$0xff] %v6102_v32 }
 0x293   :  { %1435 = vmax.xlane.f32.xlu1 %v6073_v37  ;;  %v1854_v37 = vmul.f32 0.2, %v1838_v44 }
 0x295   :  { %v1870_v20 = vmax.f32 %v1838_v44, %v1854_v37 }
 0x296   :  { %v6083_v43 = vpop.xlane.xlu0 %976 }
 0x297   :  { %1439 = vmax.xlane.f32.xlu1 %v6081_v19  ;;  %v6126_v44 = vadd.f32 %v5661_v24, %v1870_v20 }
 0x29a   :  { %v6089_v36 = vpop.xlane.xlu0 %1425 }
 0x29b   :  { %1443 = vmax.xlane.f32.xlu1 %v6087_v27 }
 0x29e   :  { %v6099_v31 = vpop.xlane.xlu0 %1429 }
 0x29f   :  { %1447 = vmax.xlane.f32.xlu1 %v6093_v6 }
 0x2a2   :  { %v6106_v54 = vpop.xlane.xlu0 %1433 }
 0x2a3   :  { %1451 = vmax.xlane.f32.xlu1 %v6102_v32  ;;  %v498_v11 = vpop.xlane.xlu1 %497 }
 0x2a4   :  { %v515_v48 = vsub.f32 %v5899_v23, %v498_v11 }
 0x2a6   :  { %v545_v27 = vmul.f32 1.442695, %v515_v48 }
 0x2a7   :  { %v947_v16 = vpop.xlane.xlu1 %946 }
 0x2a8   :  { %4918 = vpow2.f32 %v545_v27  ;;  %v978_v62 = vsub.f32 %v5906_v34, %v947_v16  ;;  %v4917_v16 = vpop.eup %4916 }
 0x2aa   :  { %v1770_v6 = vpop.permute.xlu0 %1769  ;;  %v994_v19 = vmul.f32 1.442695, %v978_v62 }
 0x2ab   :  { %v1836_v13 = vadd.f32 %v7542_v47, %v1770_v6  ;;  %v949_v0 = vpop.xlane.xlu1 %948 }
 0x2ac   :  { %v979_v32 = vsub.f32 %v5914_v29, %v949_v0  ;;  %4920 = vpow2.f32 %v994_v19  ;;  %v983_v29 = vsub.f32 %v5846_v46, %v6056_v17 }
 0x2ad   :  { %v1852_v2 = vmul.f32 0.2, %v1836_v13 }
 0x2ae   :  { %v996_v23 = vmul.f32 1.442695, %v979_v32  ;;  %v1782_v11 = vpop.permute.xlu0 %1781  ;;  %v1004_v46 = vmul.f32 1.442695, %v983_v29 }
 0x2af   :  { %v1868_v48 = vmax.f32 %v1836_v13, %v1852_v2  ;;  %v1839_v26 = vadd.f32 %v7542_v47, %v1782_v11  ;;  %v951_v27 = vpop.xlane.xlu1 %950 }
 0x2b0   :  { %4922 = vpow2.f32 %v996_v23  ;;  %v980_v34 = vsub.f32 %v5922_v56, %v951_v27 }
 0x2b1   :  { %v1855_v62 = vmul.f32 0.2, %v1839_v26  ;;  %v6115_v6 = vadd.f32 %v5673_v30, %v1868_v48  ;;  %v985_v48 = vsub.f32 %v5851_v41, %v6060_v35  ;;  %v987_v41 = vsub.f32 %v5856_v51, %v6064_v45 }
 0x2b2   :  { %v4919_v28 = vpop.eup %4918  ;;  %v1790_v32 = vpop.permute.xlu0 %1789  ;;  %v998_v19 = vmul.f32 1.442695, %v980_v34 }
 0x2b3   :  { %v1871_v0 = vmax.f32 %v1839_v26, %v1855_v62  ;;  %v1841_v2 = vadd.f32 %v7542_v47, %v1790_v32  ;;  %v953_v13 = vpop.xlane.xlu1 %952  ;;  %1900 = vmax.xlane.f32.xlu1 %v6115_v6  ;;  %v556_v23 = vpack.c.bf16 %v4917_v16, %v4919_v28  ;;  %v1008_v62 = vmul.f32 1.442695, %v985_v48 }
 0x2b4   :  { %v981_v56 = vsub.f32 %v5930_v42, %v953_v13  ;;  %4924 = vpow2.f32 %v998_v19  ;;  %v1012_v13 = vmul.f32 1.442695, %v987_v41 }
 0x2b5   :  { %v1857_v37 = vmul.f32 0.2, %v1841_v2  ;;  %4582 = vmatmul.mubr.bf16.gmra.mrb[28].mxu0 %v556_v23  ;;  %v6123_v30 = vadd.f32 %v5688_v4, %v1871_v0  ;;  %v989_v23 = vsub.f32 %v5862_v57, %v6068_v61 }
 0x2b6   :  { %v1000_v17 = vmul.f32 1.442695, %v981_v56  ;;  %v1798_v11 = vpop.permute.xlu0 %1797  ;;  %v4921_v24 = vpop.eup %4920 }
 0x2b7   :  { %v1873_v26 = vmax.f32 %v1841_v2, %v1857_v37  ;;  %v1843_v28 = vadd.f32 %v7542_v47, %v1798_v11  ;;  %v955_v27 = vpop.xlane.xlu1 %954  ;;  %1906 = vmax.xlane.f32.xlu0 %v6123_v30  ;;  %1904 = vmax.xlane.f32.xlu1 %v6126_v44 }
 0x2b8   :  { %4926 = vpow2.f32 %v1000_v17  ;;  %v982_v4 = vsub.f32 %v5936_v15, %v955_v27 }
 0x2b9   :  { %v1859_v42 = vmul.f32 0.2, %v1843_v28  ;;  %v6135_v34 = vadd.f32 %v5750_v12, %v1873_v26  ;;  %4928 = vpow2.f32 %v1004_v46  ;;  %v991_v26 = vsub.f32 %v5868_v59, %v6075_v63 }
 0x2ba   :  { %v4923_v16 = vpop.eup %4922  ;;  %v1002_v35 = vmul.f32 1.442695, %v982_v4  ;;  %v1806_v20 = vpop.permute.xlu0 %1805 }
 0x2bb   :  { %v1875_v29 = vmax.f32 %v1843_v28, %v1859_v42  ;;  %v1845_v32 = vadd.f32 %v7542_v47, %v1806_v20  ;;  %v959_v0 = vpop.xlane.xlu1 %958  ;;  %1910 = vmax.xlane.f32.xlu0 %v6135_v34  ;;  %v1026_v15 = vpack.c.bf16 %v4923_v16, %v4921_v24  ;;  %v1016_v28 = vmul.f32 1.442695, %v989_v23  ;;  %v7560_v23 = vld [vmem:[#allocation42_spill] sm:$0xff] }
 0x2bc   :  { %4930 = vpow2.f32 %v1002_v35  ;;  %v984_v19 = vsub.f32 %v5943_v14, %v959_v0  ;;  %v1020_v63 = vmul.f32 1.442695, %v991_v26  ;;  %v7559_v35 = vld [vmem:[#allocation41_spill] sm:$0xff]  ;;  %v7561_v26 = vld [vmem:[#allocation43_spill] sm:$0xff] }
 0x2bd   :  { %v1861_v12 = vmul.f32 0.2, %v1845_v32  ;;  %4601 = vmatprep.mubr.bf16.mxu0 %v1026_v15  ;;  %v6143_v2 = vadd.f32 %v5731_v3, %v1875_v29  ;;  %4932 = vpow2.f32 %v1008_v62  ;;  %v993_v20 = vsub.f32 %v7559_v35, %v6083_v43 }
 0x2be   :  { %v1006_v51 = vmul.f32 1.442695, %v984_v19  ;;  %v1814_v45 = vpop.permute.xlu0 %1813  ;;  %v4925_v17 = vpop.eup %4924 }
 0x2bf   :  { %v1877_v56 = vmax.f32 %v1845_v32, %v1861_v12  ;;  %v1847_v37 = vadd.f32 %v7542_v47, %v1814_v45  ;;  %v963_v46 = vpop.xlane.xlu1 %962  ;;  %1914 = vmax.xlane.f32.xlu0 %v6143_v2  ;;  %v1024_v45 = vmul.f32 1.442695, %v993_v20 }
 0x2c0   :  { %4934 = vpow2.f32 %v1006_v51  ;;  %v986_v14 = vsub.f32 %v5950_v39, %v963_v46 }
 0x2c1   :  { %v1863_v11 = vmul.f32 0.2, %v1847_v37  ;;  %v6151_v3 = vadd.f32 %v5794_v55, %v1877_v56  ;;  %4936 = vpow2.f32 %v1012_v13  ;;  %v1456_v56 = vsub.f32 %v7560_v23, %v6089_v36 }
 0x2c2   :  { %v4927_v48 = vpop.eup %4926  ;;  %v1010_v57 = vmul.f32 1.442695, %v986_v14  ;;  %v1822_v61 = vpop.permute.xlu0 %1821 }
 0x2c3   :  { %v1879_v27 = vmax.f32 %v1847_v37, %v1863_v11  ;;  %v1849_v4 = vadd.f32 %v7542_v47, %v1822_v61  ;;  %v967_v24 = vpop.xlane.xlu1 %966  ;;  %1918 = vmax.xlane.f32.xlu0 %v6151_v3  ;;  %v1027_v39 = vpack.c.bf16 %v4927_v48, %v4925_v17  ;;  %v4929_v42 = vpop.eup %4928  ;;  %v1473_v36 = vmul.f32 1.442695, %v1456_v56 }
 0x2c4   :  { %4938 = vpow2.f32 %v1010_v57  ;;  %v988_v55 = vsub.f32 %v5957_v5, %v967_v24  ;;  %v1458_v57 = vsub.f32 %v7561_v26, %v6099_v31 }
 0x2c5   :  { %v1865_v16 = vmul.f32 0.2, %v1849_v4  ;;  %4602 = vmatmul.mubr.bf16.vlgmr.msra.gmra.mrb[32].mxu0 %v1027_v39  ;;  %v6159_v41 = vadd.f32 %v5781_v52, %v1879_v27  ;;  %4940 = vpow2.f32 %v1016_v28  ;;  %v7562_v39 = vld [vmem:[#allocation44_spill] sm:$0xff] }
 0x2c6   :  { %v4931_v59 = vpop.eup %4930  ;;  %v1014_v62 = vmul.f32 1.442695, %v988_v55  ;;  %4618 = vmatpush3.bf16.msra.mxu0 %v5479_v40  ;;  %v1830_v29 = vpop.permute.xlu0 %1829  ;;  %v1477_v24 = vmul.f32 1.442695, %v1458_v57  ;;  %v1460_v31 = vsub.f32 %v7562_v39, %v6106_v54  ;;  %v7563_v54 = vld [vmem:[#allocation11_spill] sm:$0xff] }
 0x2c7   :  { %v1881_v32 = vmax.f32 %v1849_v4, %v1865_v16  ;;  %4619 = vmatprep.subr.bf16.mxu0 %v5473_v38  ;;  %v1851_v5 = vadd.f32 %v7542_v47, %v1830_v29  ;;  %v971_v0 = vpop.xlane.xlu1 %970  ;;  %1922 = vmax.xlane.f32.xlu0 %v6159_v41  ;;  %v1028_v52 = vpack.c.bf16 %v4929_v42, %v4931_v59  ;;  %v4933_v19 = vpop.eup %4932 }
 0x2c8   :  { %4942 = vpow2.f32 %v1014_v62  ;;  %v990_v15 = vsub.f32 %v5966_v25, %v971_v0  ;;  %v1481_v35 = vmul.f32 1.442695, %v1460_v31 }
 0x2c9   :  { %v1867_v12 = vmul.f32 0.2, %v1851_v5  ;;  %4605 = vmatprep.mubr.bf16.mxu0 %v1028_v52  ;;  %v6169_v43 = vadd.f32 %v5824_v7, %v1881_v32  ;;  %4944 = vpow2.f32 %v1020_v63 }
 0x2ca   :  { %v4935_v13 = vpop.eup %4934  ;;  %v1018_v51 = vmul.f32 1.442695, %v990_v15  ;;  %4620 = vmatpush3.bf16.msra.mxu0 %v5473_v38 }
 0x2cb   :  { %v1883_v37 = vmax.f32 %v1851_v5, %v1867_v12  ;;  %4621 = vmatprep.subr.bf16.mxu0 %v7514_v53  ;;  %v975_v46 = vpop.xlane.xlu1 %974  ;;  %1926 = vmax.xlane.f32.xlu0 %v6169_v43  ;;  %v1029_v25 = vpack.c.bf16 %v4933_v19, %v4935_v13  ;;  %v4937_v14 = vpop.eup %4936 }
 0x2cc   :  { %4946 = vpow2.f32 %v1018_v51  ;;  %v992_v7 = vsub.f32 %v5977_v21, %v975_v46 }
 0x2cd   :  { %4606 = vmatmul.mubr.bf16.gmra.mrb[36].mxu0 %v1029_v25  ;;  %v6178_v17 = vadd.f32 %v5829_v60, %v1883_v37  ;;  %4948 = vpow2.f32 %v1024_v45  ;;  %v7565_v45 = vld [vmem:[#allocation16_spill] sm:$0xff] }
 0x2ce   :  { %v4939_v11 = vpop.eup %4938  ;;  %v1022_v48 = vmul.f32 1.442695, %v992_v7  ;;  %4622 = vmatpush3.bf16.msra.mxu0 %v7514_v53 }
 0x2cf   :  { %4623 = vmatprep.subr.bf16.mxu0 %v7517_v50  ;;  %v1424_v61 = vpop.xlane.xlu1 %1423  ;;  %1930 = vmax.xlane.f32.xlu0 %v6178_v17  ;;  %v1030_v28 = vpack.c.bf16 %v4937_v14, %v4939_v11  ;;  %v4941_v60 = vpop.eup %4940  ;;  %v7566_v11 = vld [vmem:[#allocation23_spill] sm:$0xff] }
 0x2d0   :  { %4950 = vpow2.f32 %v1022_v48  ;;  %v1455_v21 = vsub.f32 %v5985_v22, %v1424_v61 }
 0x2d1   :  { %4609 = vmatprep.mubr.bf16.mxu0 %v1030_v28  ;;  %4952 = vpow2.f32 %v1473_v36 }
 0x2d2   :  { %v4943_v27 = vpop.eup %4942  ;;  %v1471_v4 = vmul.f32 1.442695, %v1455_v21  ;;  %4624 = vmatpush3.bf16.msra.mxu0 %v7517_v50 }
 0x2d3   :  { %4625 = vmatprep.subr.bf16.mxu0 %v7520_v9  ;;  %v1428_v42 = vpop.xlane.xlu1 %1427  ;;  %v1031_v55 = vpack.c.bf16 %v4941_v60, %v4943_v27  ;;  %v4945_v16 = vpop.eup %4944 }
 0x2d4   :  { %4954 = vpow2.f32 %v1471_v4  ;;  %v1457_v59 = vsub.f32 %v5993_v10, %v1428_v42  ;;  %v7564_v10 = vld [vmem:[#allocation18_spill] sm:$0xff] }
 0x2d5   :  { %4610 = vmatmul.mubr.bf16.gmra.mrb[40].mxu0 %v1031_v55  ;;  %4956 = vpow2.f32 %v1477_v24 }
 0x2d6   :  { %v4947_v22 = vpop.eup %4946  ;;  %v1475_v63 = vmul.f32 1.442695, %v1457_v59  ;;  %4626 = vmatpush3.bf16.msra.mxu0 %v7520_v9 }
 0x2d7   :  { %4627 = vmatprep.subr.bf16.mxu0 %v7522_v1  ;;  %v1432_v20 = vpop.xlane.xlu1 %1431  ;;  %v1032_v62 = vpack.c.bf16 %v4945_v16, %v4947_v22  ;;  %v4949_v32 = vpop.eup %4948 }
 0x2d8   :  { %4958 = vpow2.f32 %v1475_v63  ;;  %v1459_v29 = vsub.f32 %v7563_v54, %v1432_v20 }
 0x2d9   :  { %4613 = vmatprep.mubr.bf16.mxu0 %v1032_v62  ;;  %4960 = vpow2.f32 %v1481_v35 }
 0x2da   :  { %v4951_v5 = vpop.eup %4950  ;;  %v1479_v0 = vmul.f32 1.442695, %v1459_v29  ;;  %4628 = vmatpush3.bf16.msra.mxu0 %v7522_v1 }
 0x2db   :  { %4629 = vmatprep.subr.bf16.mxu0 %v7564_v10  ;;  %v1786_v52 = vpop.permute.xlu1 %1785  ;;  %v1033_v15 = vpack.c.bf16 %v4949_v32, %v4951_v5  ;;  %v4953_v12 = vpop.eup %4952 }
 0x2dc   :  { %4962 = vpow2.f32 %v1479_v0  ;;  %v1840_v19 = vadd.f32 %v7542_v47, %v1786_v52 }
 0x2dd   :  { %4614 = vmatmul.mubr.bf16.gmra.mrb[44].mxu0 %v1033_v15 }
 0x2de   :  { %v4955_v13 = vpop.eup %4954  ;;  %v1856_v51 = vmul.f32 0.2, %v1840_v19  ;;  %4630 = vmatpush3.bf16.msra.mxu0 %v7564_v10 }
 0x2df   :  { %4631 = vmatprep.subr.bf16.mxu0 %v7565_v45  ;;  %v1794_v23 = vpop.permute.xlu1 %1793  ;;  %v1503_v56 = vpack.c.bf16 %v4953_v12, %v4955_v13  ;;  %v4957_v25 = vpop.eup %4956 }
 0x2e0   :  { %v1872_v37 = vmax.f32 %v1840_v19, %v1856_v51  ;;  %v1842_v46 = vadd.f32 %v7542_v47, %v1794_v23 }
 0x2e1   :  { %4633 = vmatprep.mubr.bf16.mxu0 %v1503_v56 }
 0x2e2   :  { %v4959_v14 = vpop.eup %4958  ;;  %v1858_v7 = vmul.f32 0.2, %v1842_v46  ;;  %4632 = vmatpush3.bf16.msra.mxu0 %v7565_v45  ;;  %v6202_v48 = vadd.f32 %v7566_v11, %v1872_v37  ;;  %v7569_v11 = vld [vmem:[#allocation26_spill] sm:$0xff] }
 0x2e3   :  { %4649 = vmatprep.subr.bf16.mxu0 %v5479_v40  ;;  %v1802_v36 = vpop.permute.xlu1 %1801  ;;  %v1504_v26 = vpack.c.bf16 %v4957_v25, %v4959_v14  ;;  %v4961_v28 = vpop.eup %4960  ;;  %v5343_v14 = vmov 1.0  }
 0x2e4   :  { %v1874_v57 = vmax.f32 %v1842_v46, %v1858_v7  ;;  %v1844_v61 = vadd.f32 %v7542_v47, %v1802_v36  ;;  %1908 = vmax.xlane.f32.xlu1 %v6202_v48  ;;  %22 = vst.msk [vmem:[#allocation2] sm:$0xff] %vm21_vm1, %v5343_v14  ;;  %23 = vst.msk [vmem:[#allocation2 + $0x8] sm:$0xff] %vm21_vm1, %v5343_v14 }
 0x2e5   :  { %4634 = vmatmul.mubr.bf16.vlgmr.msra.gmra.mrb[48].mxu0 %v1504_v26  ;;  %24 = vst.msk [vmem:[#allocation2 + $0x10] sm:$0xff] %vm21_vm1, %v5343_v14  ;;  %25 = vst.msk [vmem:[#allocation2 + $0x18] sm:$0xff] %vm21_vm1, %v5343_v14 }
 0x2e6   :  { %v4963_v21 = vpop.eup %4962  ;;  %v1860_v60 = vmul.f32 0.2, %v1844_v61  ;;  %4650 = vmatpush3.bf16.msra.mxu0 %v5479_v40  ;;  %v6209_v27 = vadd.f32 %v5702_v18, %v1874_v57  ;;  %26 = vst.msk [vmem:[#allocation2 + $0x20] sm:$0xff] %vm21_vm1, %v5343_v14  ;;  %27 = vst.msk [vmem:[#allocation2 + $0x28] sm:$0xff] %vm21_vm1, %v5343_v14  ;;  %v7570_v57 = vld [vmem:[#allocation27_spill] sm:$0xff] }
 0x2e7   :  { %4651 = vmatprep.subr.bf16.mxu0 %v5473_v38  ;;  %v1810_v4 = vpop.permute.xlu1 %1809  ;;  %v1505_v24 = vpack.c.bf16 %v4961_v28, %v4963_v21  ;;  %28 = vst.msk [vmem:[#allocation2 + $0x30] sm:$0xff] %vm21_vm1, %v5343_v14  ;;  %29 = vst.msk [vmem:[#allocation2 + $0x38] sm:$0xff] %vm21_vm1, %v5343_v14 }
 0x2e8   :  { %v1876_v39 = vmax.f32 %v1844_v61, %v1860_v60  ;;  %v1846_v31 = vadd.f32 %v7542_v47, %v1810_v4  ;;  %1912 = vmax.xlane.f32.xlu1 %v6209_v27  ;;  %30 = vst.msk [vmem:[#allocation2 + $0x40] sm:$0xff] %vm21_vm1, %v5343_v14  ;;  %31 = vst.msk [vmem:[#allocation2 + $0x48] sm:$0xff] %vm21_vm1, %v5343_v14 }
 0x2e9   :  { %4637 = vmatprep.mubr.bf16.mxu0 %v1505_v24  ;;  %32 = vst.msk [vmem:[#allocation2 + $0x50] sm:$0xff] %vm21_vm1, %v5343_v14  ;;  %33 = vst.msk [vmem:[#allocation2 + $0x58] sm:$0xff] %vm21_vm1, %v5343_v14  ;;  %v7571_v24 = vld [vmem:[#allocation6_spill] sm:$0xff] }
 0x2ea   :  { %v1862_v42 = vmul.f32 0.2, %v1846_v31  ;;  %4652 = vmatpush3.bf16.msra.mxu0 %v5473_v38  ;;  %v6216_v55 = vadd.f32 %v5772_v8, %v1876_v39  ;;  %34 = vst.msk [vmem:[#allocation2 + $0x60] sm:$0xff] %vm21_vm1, %v5343_v14  ;;  %35 = vst.msk [vmem:[#allocation2 + $0x68] sm:$0xff] %vm21_vm1, %v5343_v14 }
 0x2eb   :  { %4653 = vmatprep.subr.bf16.mxu0 %v7514_v53  ;;  %v1818_v40 = vpop.permute.xlu1 %1817  ;;  %36 = vst.msk [vmem:[#allocation2 + $0x70] sm:$0xff] %vm21_vm1, %v5343_v14  ;;  %37 = vst.msk [vmem:[#allocation2 + $0x78] sm:$0xff] %vm21_vm1, %v5343_v14 }
 0x2ec   :  { %v1878_v18 = vmax.f32 %v1846_v31, %v1862_v42  ;;  %v1848_v16 = vadd.f32 %v7542_v47, %v1818_v40  ;;  %1916 = vmax.xlane.f32.xlu1 %v6216_v55  ;;  %v7572_v42 = vld [vmem:[#allocation17_spill] sm:$0xff] }
 0x2ee   :  { %v1864_v59 = vmul.f32 0.2, %v1848_v16  ;;  %4654 = vmatpush3.bf16.msra.mxu0 %v7514_v53  ;;  %v6223_v22 = vadd.f32 %v5752_v49, %v1878_v18 }
 0x2ef   :  { %4655 = vmatprep.subr.bf16.mxu0 %v7517_v50  ;;  %v1826_v38 = vpop.permute.xlu1 %1825 }
 0x2f0   :  { %v1880_v63 = vmax.f32 %v1848_v16, %v1864_v59  ;;  %v1850_v8 = vadd.f32 %v7542_v47, %v1826_v38  ;;  %1920 = vmax.xlane.f32.xlu1 %v6223_v22  ;;  %v7573_v38 = vld [vmem:[#allocation22_spill] sm:$0xff] }
 0x2f2   :  { %v1866_v35 = vmul.f32 0.2, %v1850_v8  ;;  %4656 = vmatpush3.bf16.msra.mxu0 %v7517_v50  ;;  %v6230_v20 = vadd.f32 %v5810_v58, %v1880_v63  ;;  %v7567_v58 = vmov 0.0  }
 0x2f3   :  { %4657 = vmatprep.subr.bf16.mxu0 %v7520_v9  ;;  %v1438_v47 = vpop.xlane.xlu0 %1437  ;;  %39 = vst.msk [vmem:[#allocation2] sm:$0xff] %vm38_vm2, %v7567_v58  ;;  %40 = vst.msk [vmem:[#allocation2 + $0x8] sm:$0xff] %vm38_vm2, %v7567_v58 }
 0x2f4   :  { %v1882_v53 = vmax.f32 %v1850_v8, %v1866_v35  ;;  %1924 = vmax.xlane.f32.xlu1 %v6230_v20  ;;  %41 = vst.msk [vmem:[#allocation2 + $0x10] sm:$0xff] %vm38_vm2, %v7567_v58  ;;  %42 = vst.msk [vmem:[#allocation2 + $0x18] sm:$0xff] %vm38_vm2, %v7567_v58 }
 0x2f5   :  { %43 = vst.msk [vmem:[#allocation2 + $0x20] sm:$0xff] %vm38_vm2, %v7567_v58  ;;  %44 = vst.msk [vmem:[#allocation2 + $0x28] sm:$0xff] %vm38_vm2, %v7567_v58 }
 0x2f6   :  { %4658 = vmatpush3.bf16.msra.mxu0 %v7520_v9  ;;  %v6236_v49 = vadd.f32 %v5890_v33, %v1882_v53  ;;  %45 = vst.msk [vmem:[#allocation2 + $0x30] sm:$0xff] %vm38_vm2, %v7567_v58  ;;  %46 = vst.msk [vmem:[#allocation2 + $0x38] sm:$0xff] %vm38_vm2, %v7567_v58 }
 0x2f7   :  { %4659 = vmatprep.subr.bf16.mxu0 %v7522_v1  ;;  %v1442_v0 = vpop.xlane.xlu0 %1441  ;;  %47 = vst.msk [vmem:[#allocation2 + $0x40] sm:$0xff] %vm38_vm2, %v7567_v58  ;;  %48 = vst.msk [vmem:[#allocation2 + $0x48] sm:$0xff] %vm38_vm2, %v7567_v58 }
 0x2f8   :  { %1928 = vmax.xlane.f32.xlu1 %v6236_v49  ;;  %49 = vst.msk [vmem:[#allocation2 + $0x50] sm:$0xff] %vm38_vm2, %v7567_v58  ;;  %50 = vst.msk [vmem:[#allocation2 + $0x58] sm:$0xff] %vm38_vm2, %v7567_v58  ;;  %v1464_v36 = vsub.f32 %v7569_v11, %v1442_v0  ;;  %v7575_v0 = vld [vmem:[#allocation9_spill] sm:$0xff] }
 0x2f9   :  { %51 = vst.msk [vmem:[#allocation2 + $0x60] sm:$0xff] %vm38_vm2, %v7567_v58  ;;  %52 = vst.msk [vmem:[#allocation2 + $0x68] sm:$0xff] %vm38_vm2, %v7567_v58 }
 0x2fa   :  { %4660 = vmatpush3.bf16.msra.mxu0 %v7522_v1  ;;  %53 = vst.msk [vmem:[#allocation2 + $0x70] sm:$0xff] %vm38_vm2, %v7567_v58  ;;  %54 = vst.msk [vmem:[#allocation2 + $0x78] sm:$0xff] %vm38_vm2, %v7567_v58  ;;  %v1489_v4 = vmul.f32 1.442695, %v1464_v36 }
 0x2fb   :  { %4661 = vmatprep.subr.bf16.mxu0 %v7564_v10  ;;  %v1446_v56 = vpop.xlane.xlu0 %1445 }
 0x2fc   :  { %v1466_v39 = vsub.f32 %v7571_v24, %v1446_v56 }
 0x2fe   :  { %4662 = vmatpush3.bf16.msra.mxu0 %v7564_v10  ;;  %v1493_v59 = vmul.f32 1.442695, %v1466_v39 }
 0x2ff   :  { %4663 = vmatprep.subr.bf16.mxu0 %v7565_v45  ;;  %v1450_v21 = vpop.xlane.xlu0 %1449 }
 0x300   :  { %v1468_v63 = vsub.f32 %v7573_v38, %v1450_v21 }
 0x302   :  { %4664 = vmatpush3.bf16.msra.mxu0 %v7565_v45  ;;  %v7568_v45 = vld [vmem:[#allocation24_spill] sm:$0xff] }
 0x303   :  { %4713 = vmatprep.subr.bf16.mxu0 %v7567_v58  ;;  %v1462_v23 = vsub.f32 %v7568_v45, %v1438_v47  ;;  %v1454_v53 = vpop.xlane.xlu0 %1453  ;;  %v7574_v47 = vld [vmem:[#allocation12_spill] sm:$0xff] }
 0x305   :  { %v1485_v7 = vmul.f32 1.442695, %v1462_v23 }
 0x309   :  { %v6246_v50 = vpop.f32.mrb[16].mxu0 }
 0x30a   :  { %4964 = vrcp.f32 %v6246_v50  ;;  %v6249_v33 = vpop.f32.mrb[17].mxu0 }
 0x30b   :  { %4966 = vrcp.f32 %v6249_v33  ;;  %v6252_v9 = vpop.f32.mrb[18].mxu0 }
 0x30c   :  { %v6254_v1 = vpop.f32.mrb[19].mxu0  ;;  %4968 = vrcp.f32 %v6252_v9 }
 0x30d   :  { %4970 = vrcp.f32 %v6254_v1 }
 0x30e   :  { %4972 = vpow2.f32 %v1485_v7 }
 0x314   :  { %v4965_v62 = vpop.eup %4964 }
 0x315   :  { %v4967_v54 = vpop.eup %4966  ;;  %v672_v29 = vmul.f32 %v4965_v62, %v6246_v50 }
 0x316   :  { %v670_v32 = vmul.f32 %v4967_v54, %v6249_v33  ;;  %v4969_v5 = vpop.eup %4968 }
 0x317   :  { %v4971_v10 = vpop.eup %4970  ;;  %v688_v19 = vsub.f32 2.0, %v672_v29  ;;  %v673_v13 = vmul.f32 %v4969_v5, %v6252_v9 }
 0x318   :  { %v686_v52 = vsub.f32 2.0, %v670_v32  ;;  %v671_v15 = vmul.f32 %v4971_v10, %v6254_v1 }
 0x319   :  { %v704_v46 = vmul.f32 %v4965_v62, %v688_v19  ;;  %v689_v25 = vsub.f32 2.0, %v673_v13 }
 0x31a   :  { %v702_v12 = vmul.f32 %v4967_v54, %v686_v52  ;;  %v687_v51 = vsub.f32 2.0, %v671_v15  ;;  %v7576_v15 = vld [vmem:[#allocation15_spill] sm:$0xff] }
 0x31b   :  { %v705_v28 = vmul.f32 %v4969_v5, %v689_v25  ;;  %v1497_v5 = vmul.f32 1.442695, %v1468_v63 }
 0x31c   :  { %720 = vperm.xlu1 %4836, %v702_v12   ;;  %v703_v37 = vmul.f32 %v4971_v10, %v687_v51  ;;  %v1470_v10 = vsub.f32 %v7575_v0, %v1454_v53  ;;  %v4973_v12 = vpop.eup %4972 }
 0x31e   :  { %725 = vperm.xlu0 %4837, %v703_v37   ;;  %v1501_v45 = vmul.f32 1.442695, %v1470_v10  ;;  %v7577_v37 = vld [vmem:[#allocation10_spill] sm:$0xff] }
 0x320   :  { %v1436_v26 = vpop.xlane.xlu1 %1435  ;;  %730 = vperm.xlu1 %4836, %v704_v46  }
 0x321   :  { %v1461_v61 = vsub.f32 %v7570_v57, %v1436_v26 }
 0x323   :  { %v1483_v60 = vmul.f32 1.442695, %v1461_v61  ;;  %v1903_v61 = vpop.xlane.xlu0 %1902 }
 0x324   :  { %v1440_v31 = vpop.xlane.xlu1 %1439  ;;  %735 = vperm.xlu1 %4836, %v705_v28  }
 0x325   :  { %4974 = vpow2.f32 %v1483_v60  ;;  %v1463_v40 = vsub.f32 %v7572_v42, %v1440_v31  ;;  %v7578_v60 = vld [vmem:[#allocation5_spill] sm:$0xff] }
 0x326   :  { %4976 = vpow2.f32 %v1489_v4  ;;  %v1933_v4 = vsub.f32 %v7578_v60, %v1903_v61 }
 0x327   :  { %v1487_v18 = vmul.f32 1.442695, %v1463_v40  ;;  %v6315_v16 = vpop.f32.mrb[20].mxu0 }
 0x328   :  { %v1444_v8 = vpop.xlane.xlu1 %1443  ;;  %v6318_v35 = vpop.f32.mrb[21].mxu0  ;;  %v1950_v42 = vmul.f32 1.442695, %v1933_v4 }
 0x329   :  { %4978 = vpow2.f32 %v1487_v18  ;;  %v1465_v62 = vsub.f32 %v7574_v47, %v1444_v8  ;;  %v6321_v54 = vpop.f32.mrb[22].mxu0 }
 0x32a   :  { %v6323_v29 = vpop.f32.mrb[23].mxu0  ;;  %4980 = vpow2.f32 %v1493_v59 }
 0x32b   :  { %v1491_v32 = vmul.f32 1.442695, %v1465_v62 }
 0x32c   :  { %v1448_v52 = vpop.xlane.xlu1 %1447 }
 0x32d   :  { %4982 = vpow2.f32 %v1491_v32  ;;  %v1467_v19 = vsub.f32 %v7576_v15, %v1448_v52 }
 0x32e   :  { %4984 = vpow2.f32 %v1497_v5 }
 0x32f   :  { %v4975_v13 = vpop.eup %4974  ;;  %v1495_v51 = vmul.f32 1.442695, %v1467_v19 }
 0x330   :  { %v1452_v23 = vpop.xlane.xlu1 %1451  ;;  %v1506_v56 = vpack.c.bf16 %v4973_v12, %v4975_v13  ;;  %v4977_v25 = vpop.eup %4976 }
 0x331   :  { %4986 = vpow2.f32 %v1495_v51  ;;  %v1469_v46 = vsub.f32 %v7577_v37, %v1452_v23 }
 0x332   :  { %4638 = vmatmul.mubr.bf16.gmra.mrb[52].mxu0 %v1506_v56  ;;  %4988 = vpow2.f32 %v1501_v45 }
 0x333   :  { %v4979_v14 = vpop.eup %4978  ;;  %v1499_v7 = vmul.f32 1.442695, %v1469_v46 }
 0x334   :  { %v1507_v11 = vpack.c.bf16 %v4977_v25, %v4979_v14  ;;  %v4981_v36 = vpop.eup %4980 }
 0x335   :  { %4990 = vpow2.f32 %v1499_v7 }
 0x336   :  { %4641 = vmatprep.mubr.bf16.mxu0 %v1507_v11  ;;  %4992 = vpow2.f32 %v1950_v42 }
 0x337   :  { %v4983_v26 = vpop.eup %4982 }
 0x338   :  { %v1508_v57 = vpack.c.bf16 %v4981_v36, %v4983_v26  ;;  %v4985_v28 = vpop.eup %4984 }
 0x33a   :  { %4642 = vmatmul.mubr.bf16.gmra.mrb[56].mxu0 %v1508_v57 }
 0x33b   :  { %v4987_v21 = vpop.eup %4986 }
 0x33c   :  { %v1509_v24 = vpack.c.bf16 %v4985_v28, %v4987_v21  ;;  %v4989_v39 = vpop.eup %4988 }
 0x33e   :  { %4645 = vmatprep.mubr.bf16.mxu0 %v1509_v24 }
 0x33f   :  { %v4991_v31 = vpop.eup %4990 }
 0x340   :  { %v1901_v40 = vpop.xlane.xlu1 %1900  ;;  %v1510_v18 = vpack.c.bf16 %v4989_v39, %v4991_v31 }
 0x341   :  { %v1932_v59 = vsub.f32 %v6115_v6, %v1901_v40  ;;  %v4993_v6 = vpop.eup %4992 }
 0x342   :  { %4646 = vmatmul.mubr.bf16.gmra.mrb[60].mxu0 %v1510_v18 }
 0x343   :  { %v1948_v38 = vmul.f32 1.442695, %v1932_v59  ;;  %v6330_v63 = vpop.f32.mrb[24].mxu0 }
 0x344   :  { %7579 = vst [vmem:[#allocation25_spill] sm:$0xff] %v6330_v63  ;;  %v1907_v8 = vpop.xlane.xlu0 %1906  ;;  %v1905_v53 = vpop.xlane.xlu1 %1904 }
 0x345   :  { %4994 = vpow2.f32 %v1948_v38  ;;  %v1935_v47 = vsub.f32 %v6123_v30, %v1907_v8  ;;  %v1934_v62 = vsub.f32 %v6126_v44, %v1905_v53  ;;  %v6334_v32 = vpop.f32.mrb[25].mxu0 }
 0x346   :  { %7580 = vst [vmem:[#allocation31_spill] sm:$0xff] %v6334_v32  ;;  %v6336_v5 = vpop.f32.mrb[26].mxu0 }
 0x347   :  { %v1954_v0 = vmul.f32 1.442695, %v1935_v47  ;;  %v1952_v10 = vmul.f32 1.442695, %v1934_v62  ;;  %v6338_v52 = vpop.f32.mrb[27].mxu0 }
 0x348   :  { %7581 = vst [vmem:[#allocation33_spill] sm:$0xff] %v6338_v52  ;;  %v1911_v30 = vpop.xlane.xlu0 %1910 }
 0x349   :  { %4996 = vpow2.f32 %v1954_v0  ;;  %v1937_v23 = vsub.f32 %v6135_v34, %v1911_v30 }
 0x34a   :  { %4998 = vpow2.f32 %v1952_v10 }
 0x34b   :  { %v1958_v56 = vmul.f32 1.442695, %v1937_v23 }
 0x34c   :  { %v1915_v44 = vpop.xlane.xlu0 %1914 }
 0x34d   :  { %v1939_v37 = vsub.f32 %v6143_v2, %v1915_v44  ;;  %5000 = vpow2.f32 %v1958_v56 }
 0x34f   :  { %v4995_v15 = vpop.eup %4994  ;;  %v1962_v11 = vmul.f32 1.442695, %v1939_v37 }
 0x350   :  { %v1980_v19 = vpack.c.bf16 %v4993_v6, %v4995_v15  ;;  %v1919_v45 = vpop.xlane.xlu0 %1918 }
 0x351   :  { %v1941_v36 = vsub.f32 %v6151_v3, %v1919_v45 }
 0x352   :  { %4665 = vmatprep.mubr.bf16.mxu0 %v1980_v19 }
 0x353   :  { %v4997_v12 = vpop.eup %4996  ;;  %v1966_v34 = vmul.f32 1.442695, %v1941_v36 }
 0x354   :  { %v4999_v13 = vpop.eup %4998  ;;  %v1923_v25 = vpop.xlane.xlu0 %1922 }
 0x355   :  { %v1981_v51 = vpack.c.bf16 %v4997_v12, %v4999_v13  ;;  %v1943_v21 = vsub.f32 %v6159_v41, %v1923_v25 }
 0x357   :  { %4666 = vmatmul.mubr.bf16.vlgmr.msra.gmra.mrb[64].mxu0 %v1981_v51  ;;  %v1970_v4 = vmul.f32 1.442695, %v1943_v21  ;;  %v5001_v31 = vpop.eup %5000 }
 0x358   :  { %v1927_v61 = vpop.xlane.xlu0 %1926 }
 0x359   :  { %v1945_v24 = vsub.f32 %v6169_v43, %v1927_v61 }
 0x35b   :  { %v1974_v18 = vmul.f32 1.442695, %v1945_v24 }
 0x35c   :  { %v1931_v39 = vpop.xlane.xlu0 %1930 }
 0x35d   :  { %v1947_v41 = vsub.f32 %v6178_v17, %v1931_v39 }
 0x35f   :  { %v1978_v47 = vmul.f32 1.442695, %v1947_v41 }
 0x371   :  { %v1909_v46 = vpop.xlane.xlu1 %1908 }
 0x372   :  { %v1936_v14 = vsub.f32 %v6202_v48, %v1909_v46 }
 0x374   :  { %v1956_v7 = vmul.f32 1.442695, %v1936_v14 }
 0x375   :  { %v1913_v26 = vpop.xlane.xlu1 %1912 }
 0x376   :  { %5002 = vpow2.f32 %v1956_v7  ;;  %v1938_v57 = vsub.f32 %v6209_v27, %v1913_v26 }
 0x377   :  { %5004 = vpow2.f32 %v1962_v11 }
 0x378   :  { %v1960_v28 = vmul.f32 1.442695, %v1938_v57 }
 0x379   :  { %v1917_v2 = vpop.xlane.xlu1 %1916 }
 0x37a   :  { %5006 = vpow2.f32 %v1960_v28  ;;  %v1940_v60 = vsub.f32 %v6216_v55, %v1917_v2 }
 0x37b   :  { %5008 = vpow2.f32 %v1966_v34 }
 0x37c   :  { %v1964_v48 = vmul.f32 1.442695, %v1940_v60 }
 0x37d   :  { %v1921_v3 = vpop.xlane.xlu1 %1920 }
 0x37e   :  { %5010 = vpow2.f32 %v1964_v48  ;;  %v1942_v27 = vsub.f32 %v6223_v22, %v1921_v3 }
 0x37f   :  { %5012 = vpow2.f32 %v1970_v4 }
 0x380   :  { %v5003_v42 = vpop.eup %5002  ;;  %v1968_v40 = vmul.f32 1.442695, %v1942_v27 }
 0x381   :  { %v1925_v59 = vpop.xlane.xlu1 %1924  ;;  %v1982_v38 = vpack.c.bf16 %v5001_v31, %v5003_v42  ;;  %v5005_v8 = vpop.eup %5004 }
 0x382   :  { %5014 = vpow2.f32 %v1968_v40  ;;  %v1944_v55 = vsub.f32 %v6230_v20, %v1925_v59 }
 0x383   :  { %4669 = vmatprep.mubr.bf16.mxu0 %v1982_v38  ;;  %5016 = vpow2.f32 %v1974_v18 }
 0x384   :  { %v5007_v43 = vpop.eup %5006  ;;  %v1972_v53 = vmul.f32 1.442695, %v1944_v55 }
 0x385   :  { %v1929_v62 = vpop.xlane.xlu1 %1928  ;;  %v1983_v22 = vpack.c.bf16 %v5005_v8, %v5007_v43  ;;  %v5009_v10 = vpop.eup %5008 }
 0x386   :  { %5018 = vpow2.f32 %v1972_v53  ;;  %v1946_v0 = vsub.f32 %v6236_v49, %v1929_v62 }
 0x387   :  { %4670 = vmatmul.mubr.bf16.gmra.mrb[68].mxu0 %v1983_v22  ;;  %5020 = vpow2.f32 %v1978_v47 }
 0x388   :  { %v5011_v6 = vpop.eup %5010  ;;  %v1976_v17 = vmul.f32 1.442695, %v1946_v0  ;;  %v6352_v15 = vpop.f32.mrb[28].mxu0 }
 0x389   :  { %v6354_v19 = vpop.f32.mrb[29].mxu0  ;;  %v1984_v20 = vpack.c.bf16 %v5009_v10, %v5011_v6  ;;  %v5013_v13 = vpop.eup %5012 }
 0x38a   :  { %5022 = vpow2.f32 %v1976_v17  ;;  %v6356_v12 = vpop.f32.mrb[30].mxu0 }
 0x38b   :  { %v6358_v51 = vpop.f32.mrb[31].mxu0  ;;  %4673 = vmatprep.mubr.bf16.mxu0 %v1984_v20 }
 0x38c   :  { %v5015_v30 = vpop.eup %5014 }
 0x38d   :  { %v1985_v44 = vpack.c.bf16 %v5013_v13, %v5015_v30  ;;  %v5017_v49 = vpop.eup %5016 }
 0x38f   :  { %4674 = vmatmul.mubr.bf16.gmra.mrb[72].mxu0 %v1985_v44 }
 0x390   :  { %v5019_v45 = vpop.eup %5018 }
 0x391   :  { %v1986_v23 = vpack.c.bf16 %v5017_v49, %v5019_v45  ;;  %v5021_v56 = vpop.eup %5020 }
 0x393   :  { %4677 = vmatprep.mubr.bf16.mxu0 %v1986_v23 }
 0x394   :  { %v5023_v37 = vpop.eup %5022 }
 0x395   :  { %v1987_v46 = vpack.c.bf16 %v5021_v56, %v5023_v37 }
 0x397   :  { %4678 = vmatmul.mubr.bf16.gmra.mrb[76].mxu0 %v1987_v46 }
 0x398   :  { %v6360_v25 = vpop.f32.mrb[32].mxu0  ;;  %4729 = vmatprep.mubr.msk.bf16.mxu0 %vm5337_vm0, %v7567_v58  ;;  %v4859_v58 = vld [vmem:[%s7390_s2 + $0x64] ss:$16 sps:$4 sm:$0xff]  }
 0x399   :  { %v6364_v14 = vpop.f32.mrb[33].mxu0 }
 0x39a   :  { %5024 = vrcp.f32 %v6364_v14  ;;  %v6367_v7 = vpop.f32.mrb[34].mxu0 }
 0x39b   :  { %5026 = vrcp.f32 %v6360_v25  ;;  %v6370_v11 = vpop.f32.mrb[35].mxu0  ;;  %v721_v36 = vpop.permute.xlu1 %720 }
 0x39c   :  { %5028 = vrcp.f32 %v6370_v11  ;;  %v798_v26 = vmul.f32 %v721_v36, %v6249_v33 }
 0x39d   :  { %v726_v57 = vpop.permute.xlu0 %725  ;;  %5030 = vrcp.f32 %v6367_v7 }
 0x39e   :  { %2246 = vst.msk [vmem:[#allocation2] sm:$0xff] %vm2245_vm3, %v798_v26  ;;  %v799_v61 = vmul.f32 %v726_v57, %v6254_v1 }
 0x39f   :  { %v731_v28 = vpop.permute.xlu1 %730 }
 0x3a0   :  { %v800_v34 = vmul.f32 %v6246_v50, %v731_v28  ;;  %v6378_v21 = vpop.f32.mrb[36].mxu0  ;;  %2247 = vst.msk [vmem:[#allocation2 + $0x8] sm:$0xff] %vm2245_vm3, %v799_v61 }
 0x3a1   :  { %7582 = vst [vmem:[#allocation29_spill] sm:$0xff] %v6378_v21  ;;  %v6381_v2 = vpop.f32.mrb[37].mxu0 }
 0x3a2   :  { %7583 = vst [vmem:[#allocation4_spill] sm:$0xff] %v6381_v2  ;;  %2248 = vst.msk [vmem:[#allocation2 + $0x10] sm:$0xff] %vm2245_vm3, %v800_v34  ;;  %v6384_v60 = vpop.f32.mrb[38].mxu0 }
 0x3a3   :  { %7584 = vst [vmem:[#allocation34_spill] sm:$0xff] %v6384_v60  ;;  %v6386_v33 = vpop.f32.mrb[39].mxu0  ;;  %v736_v48 = vpop.permute.xlu1 %735 }
 0x3a4   :  { %v5025_v4 = vpop.eup %5024  ;;  %v801_v1 = vmul.f32 %v6252_v9, %v736_v48 }
 0x3a5   :  { %v5027_v24 = vpop.eup %5026  ;;  %v1147_v3 = vmul.f32 %v5025_v4, %v6364_v14 }
 0x3a6   :  { %v5029_v50 = vpop.eup %5028  ;;  %2249 = vst.msk [vmem:[#allocation2 + $0x18] sm:$0xff] %vm2245_vm3, %v801_v1  ;;  %v1149_v42 = vmul.f32 %v5027_v24, %v6360_v25 }
 0x3a7   :  { %v1163_v39 = vsub.f32 2.0, %v1147_v3  ;;  %v1148_v27 = vmul.f32 %v5029_v50, %v6370_v11  ;;  %v5031_v59 = vpop.eup %5030 }
 0x3a8   :  { %v6392_v31 = vpop.f32.mrb[40].mxu0  ;;  %v1165_v55 = vsub.f32 2.0, %v1149_v42  ;;  %v1150_v8 = vmul.f32 %v5031_v59, %v6367_v7 }
 0x3a9   :  { %v1179_v40 = vmul.f32 %v5025_v4, %v1163_v39  ;;  %v1164_v18 = vsub.f32 2.0, %v1148_v27  ;;  %v6395_v41 = vpop.f32.mrb[41].mxu0 }
 0x3aa   :  { %v6397_v38 = vpop.f32.mrb[42].mxu0  ;;  %v1181_v47 = vmul.f32 %v5027_v24, %v1165_v55  ;;  %v1166_v62 = vsub.f32 2.0, %v1150_v8 }
 0x3ab   :  { %1197 = vperm.xlu1 %4836, %v1179_v40   ;;  %v6399_v9 = vpop.f32.mrb[43].mxu0  ;;  %v1180_v43 = vmul.f32 %v5029_v50, %v1164_v18 }
 0x3ac   :  { %v1182_v6 = vmul.f32 %v5031_v59, %v1166_v62 }
 0x3af   :  { %1202 = vperm.xlu1 %4836, %v1180_v43  }
 0x3b0   :  { %v6402_v53 = vpop.f32.mrb[44].mxu0 }
 0x3b1   :  { %v6404_v22 = vpop.f32.mrb[45].mxu0 }
 0x3b2   :  { %v6406_v0 = vpop.f32.mrb[46].mxu0 }
 0x3b3   :  { %7585 = vst [vmem:[#allocation35_spill] sm:$0xff] %v6406_v0  ;;  %1207 = vperm.xlu1 %4836, %v1181_v47   ;;  %v6408_v10 = vpop.f32.mrb[47].mxu0 }
 0x3b7   :  { %1212 = vperm.xlu1 %4836, %v1182_v6  }
 0x3b8   :  { %v6410_v17 = vpop.f32.mrb[48].mxu0 }
 0x3b9   :  { %5032 = vrcp.f32 %v6410_v17  ;;  %v6413_v20 = vpop.f32.mrb[49].mxu0 }
 0x3ba   :  { %5034 = vrcp.f32 %v6413_v20  ;;  %v6416_v13 = vpop.f32.mrb[50].mxu0 }
 0x3bb   :  { %5036 = vrcp.f32 %v6416_v13  ;;  %v6419_v30 = vpop.f32.mrb[51].mxu0 }
 0x3bc   :  { %5038 = vrcp.f32 %v6419_v30 }
 0x3bd   :  { %5040 = vrcp.f32 %v6318_v35 }
 0x3c3   :  { %v5033_v44 = vpop.eup %5032 }
 0x3c4   :  { %v5035_v49 = vpop.eup %5034  ;;  %v1626_v23 = vmul.f32 %v5033_v44, %v6410_v17 }
 0x3c5   :  { %v5037_v45 = vpop.eup %5036  ;;  %v1624_v56 = vmul.f32 %v5035_v49, %v6413_v20 }
 0x3c6   :  { %v5039_v37 = vpop.eup %5038  ;;  %v1627_v36 = vmul.f32 %v5037_v45, %v6416_v13  ;;  %v1642_v57 = vsub.f32 2.0, %v1626_v23 }
 0x3c7   :  { %v1640_v46 = vsub.f32 2.0, %v1624_v56  ;;  %v1625_v26 = vmul.f32 %v5039_v37, %v6419_v30  ;;  %v4856_v56 = vld [vmem:[%s7390_s2 + $0x4] ss:$16 sps:$4 sm:$0xff]  }
 0x3c8   :  { %v1643_v34 = vsub.f32 2.0, %v1627_v36  ;;  %v1658_v4 = vmul.f32 %v5033_v44, %v1642_v57  ;;  %4681 = vmatprep.subr.bf16.mxu1 %v4856_v56  ;;  %v4857_v36 = vld [vmem:[%s7390_s2 + $0x24] ss:$16 sps:$4 sm:$0xff]  }
 0x3c9   :  { %v1656_v61 = vmul.f32 %v5035_v49, %v1640_v46  ;;  %v1641_v28 = vsub.f32 2.0, %v1625_v26  ;;  %4682 = vmatpush3.bf16.msra.mxu1 %v4856_v56  ;;  %v4858_v26 = vld [vmem:[%s7390_s2 + $0x44] ss:$16 sps:$4 sm:$0xff]  }
 0x3ca   :  { %v1659_v1 = vmul.f32 %v5037_v45, %v1643_v34  ;;  %4683 = vmatprep.subr.bf16.mxu1 %v4857_v36 }
 0x3cb   :  { %v1657_v48 = vmul.f32 %v5039_v37, %v1641_v28  ;;  %1674 = vperm.xlu1 %4836, %v1656_v61  }
 0x3cd   :  { %1679 = vperm.xlu0 %4837, %v1657_v48   ;;  %4684 = vmatpush3.bf16.msra.mxu1 %v4857_v36 }
 0x3ce   :  { %4685 = vmatprep.subr.bf16.mxu1 %v4858_v26 }
 0x3cf   :  { %1684 = vperm.xlu1 %4836, %v1658_v4  }
 0x3d1   :  { %1689 = vperm.xlu0 %4837, %v1659_v1   ;;  %4686 = vmatpush3.bf16.msra.mxu1 %v4858_v26 }
 0x3d2   :  { %4687 = vmatprep.subr.bf16.mxu1 %v4859_v58 }
 0x3d5   :  { %4688 = vmatpush3.bf16.msra.mxu1 %v4859_v58 }
 0x405   :  { %v6426_v24 = vpop.f32.mrb[52].mxu0 }
 0x406   :  { %v6428_v3 = vpop.f32.mrb[53].mxu0 }
 0x407   :  { %v6430_v50 = vpop.f32.mrb[54].mxu0 }
 0x408   :  { %v6432_v39 = vpop.f32.mrb[55].mxu0 }
 0x40d   :  { %v6434_v27 = vpop.f32.mrb[56].mxu0 }
 0x40e   :  { %v6436_v42 = vpop.f32.mrb[57].mxu0 }
 0x40f   :  { %v6438_v40 = vpop.f32.mrb[58].mxu0 }
 0x410   :  { %v6440_v18 = vpop.f32.mrb[59].mxu0 }
 0x415   :  { %v6442_v59 = vpop.f32.mrb[60].mxu0 }
 0x416   :  { %v6444_v55 = vpop.f32.mrb[61].mxu0 }
 0x417   :  { %7586 = vst [vmem:[#allocation3_spill] sm:$0xff] %v6444_v55  ;;  %v6446_v8 = vpop.f32.mrb[62].mxu0 }
 0x418   :  { %v6448_v43 = vpop.f32.mrb[63].mxu0 }
 0x42a   :  { %v1198_v47 = vpop.permute.xlu1 %1197  ;;  %v6452_v6 = vpop.f32.mrb[64].mxu0 }
 0x42b   :  { %v1275_v62 = vmul.f32 %v1198_v47, %v6364_v14  ;;  %5042 = vrcp.f32 %v6452_v6  ;;  %v6455_v44 = vpop.f32.mrb[65].mxu0 }
 0x42c   :  { %5044 = vrcp.f32 %v6455_v44  ;;  %v6459_v49 = vpop.f32.mrb[66].mxu0 }
 0x42d   :  { %2263 = vst.msk [vmem:[#allocation2] sm:$0xff] %vm2262_vm4, %v1275_v62  ;;  %7587 = vst [vmem:[#allocation32_spill] sm:$0xff] %v6459_v49  ;;  %5046 = vrcp.f32 %v6459_v49  ;;  %v6462_v45 = vpop.f32.mrb[67].mxu0 }
 0x42e   :  { %v1203_v23 = vpop.permute.xlu1 %1202  ;;  %5048 = vrcp.f32 %v6462_v45 }
 0x42f   :  { %v1276_v14 = vmul.f32 %v1203_v23, %v6370_v11  ;;  %5050 = vrcp.f32 %v6323_v29  ;;  %v5041_v11 = vpop.eup %5040 }
 0x430   :  { %5052 = vrcp.f32 %v6315_v16 }
 0x431   :  { %2264 = vst.msk [vmem:[#allocation2 + $0x8] sm:$0xff] %vm2262_vm4, %v1276_v14  ;;  %5054 = vrcp.f32 %v6321_v54 }
 0x432   :  { %v1208_v37 = vpop.permute.xlu1 %1207  ;;  %5056 = vrcp.f32 %v6381_v2 }
 0x433   :  { %v1277_v46 = vmul.f32 %v6360_v25, %v1208_v37  ;;  %5058 = vrcp.f32 %v6386_v33 }
 0x434   :  { %5060 = vrcp.f32 %v6378_v21 }
 0x435   :  { %2265 = vst.msk [vmem:[#allocation2 + $0x10] sm:$0xff] %vm2262_vm4, %v1277_v46  ;;  %v5043_v57 = vpop.eup %5042  ;;  %5062 = vrcp.f32 %v6384_v60 }
 0x436   :  { %v1213_v61 = vpop.permute.xlu1 %1212  ;;  %v5045_v28 = vpop.eup %5044  ;;  %v2103_v48 = vmul.f32 %v5043_v57, %v6452_v6  ;;  %5064 = vrcp.f32 %v6428_v3 }
 0x437   :  { %v1278_v25 = vmul.f32 %v6367_v7, %v1213_v61  ;;  %v5047_v34 = vpop.eup %5046  ;;  %v2101_v4 = vmul.f32 %v5045_v28, %v6455_v44  ;;  %v674_v7 = vmul.f32 %v5041_v11, %v6318_v35  ;;  %5066 = vrcp.f32 %v6432_v39 }
 0x438   :  { %v5049_v1 = vpop.eup %5048  ;;  %v2104_v62 = vmul.f32 %v5047_v34, %v6459_v49  ;;  %v2119_v56 = vsub.f32 2.0, %v2103_v48  ;;  %5068 = vrcp.f32 %v6426_v24 }
 0x439   :  { %2266 = vst.msk [vmem:[#allocation2 + $0x18] sm:$0xff] %vm2262_vm4, %v1278_v25  ;;  %v2117_v47 = vsub.f32 2.0, %v2101_v4  ;;  %v2102_v23 = vmul.f32 %v5049_v1, %v6462_v45  ;;  %v5051_v14 = vpop.eup %5050  ;;  %5070 = vrcp.f32 %v6430_v50 }
 0x43a   :  { %v5053_v36 = vpop.eup %5052  ;;  %v675_v61 = vmul.f32 %v5051_v14, %v6323_v29  ;;  %v2120_v25 = vsub.f32 2.0, %v2104_v62  ;;  %5072 = vrcp.f32 %v6334_v32 }
 0x43b   :  { %v2133_v37 = vmul.f32 %v5045_v28, %v2117_v47  ;;  %v2118_v46 = vsub.f32 2.0, %v2102_v23  ;;  %v5055_v49 = vpop.eup %5054  ;;  %v676_v48 = vmul.f32 %v5053_v36, %v6315_v16  ;;  %v690_v28 = vsub.f32 2.0, %v674_v7 }
 0x43c   :  { %v2135_v47 = vmul.f32 %v5043_v57, %v2119_v56  ;;  %v5057_v26 = vpop.eup %5056  ;;  %v691_v62 = vsub.f32 2.0, %v675_v61  ;;  %v2136_v23 = vmul.f32 %v5047_v34, %v2120_v25  ;;  %v4861_v25 = vld [vmem:[%s7390_s2 + $0xa4] ss:$16 sps:$4 sm:$0xff]  }
 0x43d   :  { %v2134_v4 = vmul.f32 %v5049_v1, %v2118_v46  ;;  %2151 = vperm.xlu1 %4836, %v2133_v37   ;;  %v677_v1 = vmul.f32 %v5055_v49, %v6321_v54  ;;  %v4860_v37 = vld [vmem:[%s7390_s2 + $0x84] ss:$16 sps:$4 sm:$0xff]   ;;  %v5059_v46 = vpop.eup %5058  ;;  %v692_v7 = vsub.f32 2.0, %v676_v48  ;;  %v706_v57 = vmul.f32 %v5041_v11, %v690_v28 }
 0x43e   :  { %v1151_v56 = vmul.f32 %v5057_v26, %v6381_v2  ;;  %4689 = vmatprep.subr.bf16.mxu1 %v4860_v37  ;;  %v707_v34 = vmul.f32 %v5051_v14, %v691_v62  ;;  %v1152_v61 = vmul.f32 %v5059_v46, %v6386_v33 }
 0x43f   :  { %2156 = vperm.xlu0 %4837, %v2134_v4   ;;  %v5061_v4 = vpop.eup %5060  ;;  %4690 = vmatpush3.bf16.msra.mxu1 %v4860_v37  ;;  %v693_v58 = vsub.f32 2.0, %v677_v1  ;;  %v708_v48 = vmul.f32 %v5053_v36, %v692_v7  ;;  %v4862_v37 = vld [vmem:[%s7390_s2 + $0xc4] ss:$16 sps:$4 sm:$0xff]  }
 0x440   :  { %v1153_v11 = vmul.f32 %v5061_v4, %v6378_v21  ;;  %v1167_v28 = vsub.f32 2.0, %v1151_v56  ;;  %4691 = vmatprep.subr.bf16.mxu1 %v4861_v25  ;;  %v1168_v14 = vsub.f32 2.0, %v1152_v61 }
 0x441   :  { %2161 = vperm.xlu1 %4836, %v2135_v47   ;;  %v5063_v47 = vpop.eup %5062  ;;  %v709_v2 = vmul.f32 %v5055_v49, %v693_v58 }
 0x442   :  { %v1154_v1 = vmul.f32 %v5063_v47, %v6384_v60  ;;  %v1169_v7 = vsub.f32 2.0, %v1153_v11  ;;  %v1183_v56 = vmul.f32 %v5057_v26, %v1167_v28 }
 0x443   :  { %2166 = vperm.xlu0 %4837, %v2136_v23   ;;  %v5065_v23 = vpop.eup %5064  ;;  %4692 = vmatpush3.bf16.msra.mxu1 %v4861_v25 }
 0x444   :  { %4693 = vmatprep.subr.bf16.mxu1 %v4862_v37  ;;  %v1170_v61 = vsub.f32 2.0, %v1154_v1  ;;  %v1185_v11 = vmul.f32 %v5061_v4, %v1169_v7 }
 0x445   :  { %740 = vperm.xlu1 %4836, %v706_v57   ;;  %v5067_v57 = vpop.eup %5066 }
 0x446   :  { %v5069_v49 = vpop.eup %5068  ;;  %v1629_v60 = vmul.f32 %v5067_v57, %v6432_v39 }
 0x447   :  { %745 = vperm.xlu0 %4837, %v707_v34   ;;  %v1628_v34 = vmul.f32 %v5065_v23, %v6428_v3  ;;  %4694 = vmatpush3.bf16.msra.mxu1 %v4862_v37  ;;  %v5071_v26 = vpop.eup %5070  ;;  %v1630_v28 = vmul.f32 %v5069_v49, %v6426_v24 }
 0x448   :  { %v1645_v37 = vsub.f32 2.0, %v1629_v60 }
 0x449   :  { %750 = vperm.xlu1 %4836, %v708_v48   ;;  %v1184_v48 = vmul.f32 %v5059_v46, %v1168_v14  ;;  %v1186_v14 = vmul.f32 %v5063_v47, %v1170_v61 }
 0x44a   :  { %v1675_v62 = vpop.permute.xlu1 %1674 }
 0x44b   :  { %v1752_v36 = vmul.f32 %v1675_v62, %v6413_v20  ;;  %755 = vperm.xlu0 %4837, %v709_v2   ;;  %v4863_v20 = vld [vmem:[%s7390_s2 + $0xe4] ss:$16 sps:$4 sm:$0xff]   ;;  %v1631_v62 = vmul.f32 %v5071_v26, %v6430_v50 }
 0x44c   :  { %v1680_v25 = vpop.permute.xlu0 %1679  ;;  %4695 = vmatprep.subr.bf16.mxu1 %v4863_v20 }
 0x44d   :  { %2280 = vst.msk [vmem:[#allocation2] sm:$0xff] %vm2279_vm5, %v1752_v36  ;;  %v1753_v58 = vmul.f32 %v1680_v25, %v6419_v30  ;;  %1217 = vperm.xlu1 %4836, %v1183_v56   ;;  %v1644_v30 = vsub.f32 2.0, %v1628_v34  ;;  %4696 = vmatpush3.bf16.msra.mxu1 %v4863_v20  ;;  %v1647_v4 = vsub.f32 2.0, %v1631_v62  ;;  %v1661_v36 = vmul.f32 %v5067_v57, %v1645_v37  ;;  %v5073_v25 = vpop.eup %5072 }
 0x44e   :  { %v1685_v21 = vpop.permute.xlu1 %1684  ;;  %v678_v62 = vmul.f32 %v5073_v25, %v6334_v32 }
 0x44f   :  { %2281 = vst.msk [vmem:[#allocation2 + $0x8] sm:$0xff] %vm2279_vm5, %v1753_v58  ;;  %v1754_v2 = vmul.f32 %v6410_v17, %v1685_v21  ;;  %1222 = vperm.xlu0 %4837, %v1184_v48   ;;  %v1646_v21 = vsub.f32 2.0, %v1630_v28  ;;  %v1660_v17 = vmul.f32 %v5065_v23, %v1644_v30  ;;  %v1663_v56 = vmul.f32 %v5071_v26, %v1647_v4 }
 0x450   :  { %v1690_v1 = vpop.permute.xlu0 %1689 }
 0x451   :  { %2282 = vst.msk [vmem:[#allocation2 + $0x10] sm:$0xff] %vm2279_vm5, %v1754_v2  ;;  %v1755_v46 = vmul.f32 %v6416_v13, %v1690_v1  ;;  %1227 = vperm.xlu1 %4836, %v1185_v11   ;;  %v1662_v7 = vmul.f32 %v5069_v49, %v1646_v21 }
 0x453   :  { %2283 = vst.msk [vmem:[#allocation2 + $0x18] sm:$0xff] %vm2279_vm5, %v1755_v46  ;;  %1232 = vperm.xlu0 %4837, %v1186_v14  }
 0x455   :  { %1694 = vperm.xlu1 %4836, %v1660_v17  }
 0x457   :  { %1699 = vperm.xlu0 %4837, %v1661_v36  }
 0x459   :  { %1704 = vperm.xlu1 %4836, %v1662_v7  }
 0x45a   :  { %v6531_v13 = vpop.f32.mrb[68].mxu0 }
 0x45b   :  { %7588 = vst [vmem:[#allocation8_spill] sm:$0xff] %v6531_v13  ;;  %5074 = vrcp.f32 %v6531_v13  ;;  %v6534_v60 = vpop.f32.mrb[69].mxu0  ;;  %1709 = vperm.xlu0 %4837, %v1663_v56  }
 0x45c   :  { %7589 = vst [vmem:[#allocation7_spill] sm:$0xff] %v6534_v60  ;;  %5076 = vrcp.f32 %v6534_v60  ;;  %v6537_v47 = vpop.f32.mrb[70].mxu0 }
 0x45d   :  { %7590 = vst [vmem:[#allocation38_spill] sm:$0xff] %v6537_v47  ;;  %5078 = vrcp.f32 %v6537_v47  ;;  %v6540_v23 = vpop.f32.mrb[71].mxu0 }
 0x45e   :  { %7591 = vst [vmem:[#allocation14_spill] sm:$0xff] %v6540_v23  ;;  %5080 = vrcp.f32 %v6540_v23 }
 0x45f   :  { %5082 = vrcp.f32 %v6338_v52 }
 0x460   :  { %5084 = vrcp.f32 %v6330_v63 }
 0x461   :  { %5086 = vrcp.f32 %v6336_v5 }
 0x462   :  { %v6545_v57 = vpop.f32.mrb[72].mxu0  ;;  %5088 = vrcp.f32 %v6395_v41 }
 0x463   :  { %v6547_v34 = vpop.f32.mrb[73].mxu0  ;;  %5090 = vrcp.f32 %v6399_v9 }
 0x464   :  { %v6550_v49 = vpop.f32.mrb[74].mxu0  ;;  %5092 = vrcp.f32 %v6392_v31 }
 0x465   :  { %v5075_v58 = vpop.eup %5074  ;;  %v6552_v61 = vpop.f32.mrb[75].mxu0  ;;  %5094 = vrcp.f32 %v6397_v38 }
 0x466   :  { %v5077_v48 = vpop.eup %5076  ;;  %v2107_v26 = vmul.f32 %v5075_v58, %v6531_v13  ;;  %5096 = vrcp.f32 %v6436_v42 }
 0x467   :  { %v5079_v20 = vpop.eup %5078  ;;  %v2105_v2 = vmul.f32 %v5077_v48, %v6534_v60  ;;  %5098 = vrcp.f32 %v6440_v18 }
 0x468   :  { %v5081_v11 = vpop.eup %5080  ;;  %v2108_v30 = vmul.f32 %v5079_v20, %v6537_v47  ;;  %v2123_v37 = vsub.f32 2.0, %v2107_v26  ;;  %v694_v26 = vsub.f32 2.0, %v678_v62  ;;  %5100 = vrcp.f32 %v6434_v27 }
 0x469   :  { %v2121_v28 = vsub.f32 2.0, %v2105_v2  ;;  %v2106_v1 = vmul.f32 %v5081_v11, %v6540_v23  ;;  %v5083_v46 = vpop.eup %5082  ;;  %5102 = vrcp.f32 %v6438_v40 }
 0x46a   :  { %v6561_v14 = vpop.f32.mrb[76].mxu0  ;;  %v5085_v36 = vpop.eup %5084  ;;  %v679_v56 = vmul.f32 %v5083_v46, %v6338_v52  ;;  %v2124_v2 = vsub.f32 2.0, %v2108_v30  ;;  %5104 = vrcp.f32 %v6547_v34 }
 0x46b   :  { %v2137_v21 = vmul.f32 %v5077_v48, %v2121_v28  ;;  %v2122_v17 = vsub.f32 2.0, %v2106_v1  ;;  %v6564_v4 = vpop.f32.mrb[77].mxu0  ;;  %v5087_v23 = vpop.eup %5086  ;;  %v680_v48 = vmul.f32 %v5085_v36, %v6330_v63  ;;  %v2139_v28 = vmul.f32 %v5075_v58, %v2123_v37 }
 0x46c   :  { %v6567_v7 = vpop.f32.mrb[78].mxu0  ;;  %v5089_v1 = vpop.eup %5088  ;;  %v681_v32 = vmul.f32 %v5087_v23, %v6336_v5  ;;  %v695_v60 = vsub.f32 2.0, %v679_v56  ;;  %v2140_v52 = vmul.f32 %v5079_v20, %v2124_v2  ;;  %5106 = vrcp.f32 %v6552_v61 }
 0x46d   :  { %v2138_v47 = vmul.f32 %v5081_v11, %v2122_v17  ;;  %2171 = vperm.xlu1 %4836, %v2137_v21   ;;  %v6570_v13 = vpop.f32.mrb[79].mxu0  ;;  %v5091_v11 = vpop.eup %5090  ;;  %v696_v30 = vsub.f32 2.0, %v680_v48  ;;  %v710_v21 = vmul.f32 %v5073_v25, %v694_v26  ;;  %v1155_v17 = vmul.f32 %v5089_v1, %v6395_v41 }
 0x46e   :  { %v5093_v63 = vpop.eup %5092  ;;  %v711_v58 = vmul.f32 %v5083_v46, %v695_v60  ;;  %v1156_v62 = vmul.f32 %v5091_v11, %v6399_v9  ;;  %5108 = vrcp.f32 %v6545_v57 }
 0x46f   :  { %2176 = vperm.xlu0 %4837, %v2138_v47   ;;  %v697_v47 = vsub.f32 2.0, %v681_v32  ;;  %v5095_v37 = vpop.eup %5094  ;;  %v712_v20 = vmul.f32 %v5085_v36, %v696_v30  ;;  %v1157_v56 = vmul.f32 %v5093_v63, %v6392_v31  ;;  %v1171_v2 = vsub.f32 2.0, %v1155_v17 }
 0x470   :  { %v5097_v25 = vpop.eup %5096  ;;  %v1158_v48 = vmul.f32 %v5095_v37, %v6397_v38  ;;  %v1172_v26 = vsub.f32 2.0, %v1156_v62  ;;  %5110 = vrcp.f32 %v6550_v49 }
 0x471   :  { %2181 = vperm.xlu1 %4836, %v2139_v28   ;;  %v5099_v32 = vpop.eup %5098  ;;  %v1173_v60 = vsub.f32 2.0, %v1157_v56  ;;  %v1187_v46 = vmul.f32 %v5089_v1, %v1171_v2  ;;  %v1632_v28 = vmul.f32 %v5097_v25, %v6436_v42  ;;  %5112 = vrcp.f32 %v6354_v19 }
 0x472   :  { %v5101_v36 = vpop.eup %5100  ;;  %v1174_v30 = vsub.f32 2.0, %v1158_v48  ;;  %v1633_v17 = vmul.f32 %v5099_v32, %v6440_v18  ;;  %5114 = vrcp.f32 %v6358_v51 }
 0x473   :  { %2186 = vperm.xlu0 %4837, %v2140_v52   ;;  %v713_v52 = vmul.f32 %v5087_v23, %v697_v47  ;;  %v5103_v23 = vpop.eup %5102  ;;  %v1189_v47 = vmul.f32 %v5093_v63, %v1173_v60  ;;  %v1648_v62 = vsub.f32 2.0, %v1632_v28  ;;  %5116 = vrcp.f32 %v6352_v15 }
 0x474   :  { %v5105_v1 = vpop.eup %5104  ;;  %v1635_v56 = vmul.f32 %v5103_v23, %v6438_v40  ;;  %v1649_v2 = vsub.f32 2.0, %v1633_v17  ;;  %5118 = vrcp.f32 %v6356_v12 }
 0x475   :  { %760 = vperm.xlu1 %4836, %v710_v21   ;;  %v1188_v21 = vmul.f32 %v5091_v11, %v1172_v26  ;;  %v1664_v48 = vmul.f32 %v5097_v25, %v1648_v62  ;;  %v2109_v26 = vmul.f32 %v5105_v1, %v6547_v34  ;;  %5120 = vrcp.f32 %v6404_v22 }
 0x476   :  { %v5107_v11 = vpop.eup %5106  ;;  %v1651_v60 = vsub.f32 2.0, %v1635_v56  ;;  %5122 = vrcp.f32 %v6408_v10 }
 0x477   :  { %765 = vperm.xlu0 %4837, %v711_v58   ;;  %v1634_v58 = vmul.f32 %v5101_v36, %v6434_v27  ;;  %v2110_v28 = vmul.f32 %v5107_v11, %v6552_v61  ;;  %v2125_v17 = vsub.f32 2.0, %v2109_v26  ;;  %5124 = vrcp.f32 %v6402_v53 }
 0x478   :  { %v5109_v63 = vpop.eup %5108  ;;  %5126 = vrcp.f32 %v6406_v0 }
 0x479   :  { %770 = vperm.xlu1 %4836, %v712_v20   ;;  %v1190_v20 = vmul.f32 %v5095_v37, %v1174_v30  ;;  %v2126_v62 = vsub.f32 2.0, %v2110_v28  ;;  %5128 = vrcp.f32 %v6444_v55 }
 0x47a   :  { %v5111_v37 = vpop.eup %5110  ;;  %5130 = vrcp.f32 %v6448_v43 }
 0x47b   :  { %775 = vperm.xlu0 %4837, %v713_v52   ;;  %v1650_v52 = vsub.f32 2.0, %v1634_v58  ;;  %v5113_v25 = vpop.eup %5112  ;;  %v2112_v58 = vmul.f32 %v5111_v37, %v6550_v49  ;;  %v2142_v26 = vmul.f32 %v5107_v11, %v2126_v62  ;;  %5132 = vrcp.f32 %v6442_v59 }
 0x47c   :  { %5134 = vrcp.f32 %v6446_v8 }
 0x47d   :  { %1237 = vperm.xlu1 %4836, %v1187_v46   ;;  %v1665_v46 = vmul.f32 %v5099_v32, %v1649_v2  ;;  %v1666_v30 = vmul.f32 %v5101_v36, %v1650_v52  ;;  %v5115_v32 = vpop.eup %5114  ;;  %v2141_v2 = vmul.f32 %v5105_v1, %v2125_v17  ;;  %5136 = vrcp.f32 %v6564_v4 }
 0x47e   :  { %v5117_v36 = vpop.eup %5116  ;;  %v683_v52 = vmul.f32 %v5115_v32, %v6358_v51  ;;  %5138 = vrcp.f32 %v6570_v13 }
 0x47f   :  { %1242 = vperm.xlu0 %4837, %v1188_v21   ;;  %v2111_v21 = vmul.f32 %v5109_v63, %v6545_v57  ;;  %5140 = vrcp.f32 %v6561_v14 }
 0x480   :  { %5142 = vrcp.f32 %v6567_v7 }
 0x481   :  { %1247 = vperm.xlu1 %4836, %v1189_v47   ;;  %v1667_v47 = vmul.f32 %v5103_v23, %v1651_v60  ;;  %v2127_v56 = vsub.f32 2.0, %v2111_v21  ;;  %v5119_v23 = vpop.eup %5118  ;;  %v684_v60 = vmul.f32 %v5117_v36, %v6352_v15  ;;  %v699_v21 = vsub.f32 2.0, %v683_v52 }
 0x482   :  { %v685_v1 = vmul.f32 %v5119_v23, %v6356_v12 }
 0x483   :  { %1252 = vperm.xlu0 %4837, %v1190_v20   ;;  %v682_v20 = vmul.f32 %v5113_v25, %v6354_v19  ;;  %v2143_v28 = vmul.f32 %v5109_v63, %v2127_v56  ;;  %v700_v11 = vsub.f32 2.0, %v684_v60 }
 0x484   :  { %v701_v63 = vsub.f32 2.0, %v685_v1 }
 0x485   :  { %1714 = vperm.xlu1 %4836, %v1664_v48   ;;  %v2128_v48 = vsub.f32 2.0, %v2112_v58 }
 0x486   :  { %v717_v60 = vmul.f32 %v5119_v23, %v701_v63 }
 0x487   :  { %1719 = vperm.xlu0 %4837, %v1665_v46   ;;  %v698_v46 = vsub.f32 2.0, %v682_v20  ;;  %v2144_v17 = vmul.f32 %v5111_v37, %v2128_v48  ;;  %v715_v20 = vmul.f32 %v5115_v32, %v699_v21  ;;  %v716_v37 = vmul.f32 %v5117_v36, %v700_v11 }
 0x489   :  { %1724 = vperm.xlu1 %4836, %v1666_v30   ;;  %v5121_v30 = vpop.eup %5120  ;;  %v714_v58 = vmul.f32 %v5113_v25, %v698_v46 }
 0x48a   :  { %v1159_v62 = vmul.f32 %v5121_v30, %v6404_v22 }
 0x48b   :  { %1729 = vperm.xlu0 %4837, %v1667_v47   ;;  %v5123_v47 = vpop.eup %5122 }
 0x48c   :  { %v1160_v56 = vmul.f32 %v5123_v47, %v6408_v10  ;;  %v1175_v48 = vsub.f32 2.0, %v1159_v62 }
 0x48d   :  { %2191 = vperm.xlu1 %4836, %v2141_v2   ;;  %v5125_v2 = vpop.eup %5124 }
 0x48e   :  { %v1161_v52 = vmul.f32 %v5125_v2, %v6402_v53  ;;  %v1191_v21 = vmul.f32 %v5121_v30, %v1175_v48 }
 0x48f   :  { %2196 = vperm.xlu0 %4837, %v2142_v26   ;;  %v5127_v26 = vpop.eup %5126 }
 0x490   :  { %v5129_v25 = vpop.eup %5128  ;;  %v1162_v46 = vmul.f32 %v5127_v26, %v6406_v0  ;;  %v1177_v1 = vsub.f32 2.0, %v1161_v52 }
 0x491   :  { %2201 = vperm.xlu1 %4836, %v2143_v28   ;;  %v1176_v28 = vsub.f32 2.0, %v1160_v56  ;;  %v5131_v32 = vpop.eup %5130 }
 0x492   :  { %v5133_v36 = vpop.eup %5132  ;;  %v1178_v11 = vsub.f32 2.0, %v1162_v46  ;;  %v1637_v62 = vmul.f32 %v5131_v32, %v6448_v43  ;;  %v1193_v63 = vmul.f32 %v5125_v2, %v1177_v1 }
 0x493   :  { %2206 = vperm.xlu0 %4837, %v2144_v17   ;;  %v1636_v17 = vmul.f32 %v5129_v25, %v6444_v55  ;;  %v5135_v23 = vpop.eup %5134 }
 0x494   :  { %v1194_v52 = vmul.f32 %v5127_v26, %v1178_v11  ;;  %v1639_v30 = vmul.f32 %v5135_v23, %v6446_v8  ;;  %v1653_v48 = vsub.f32 2.0, %v1637_v62 }
 0x495   :  { %780 = vperm.xlu1 %4836, %v714_v58   ;;  %v1192_v58 = vmul.f32 %v5123_v47, %v1176_v28  ;;  %v1652_v56 = vsub.f32 2.0, %v1636_v17 }
 0x496   :  { %v1655_v28 = vsub.f32 2.0, %v1639_v30 }
 0x497   :  { %785 = vperm.xlu0 %4837, %v715_v20   ;;  %v1638_v20 = vmul.f32 %v5133_v36, %v6442_v59  ;;  %v1668_v0 = vmul.f32 %v5129_v25, %v1652_v56 }
 0x499   :  { %790 = vperm.xlu1 %4836, %v716_v37   ;;  %v5137_v37 = vpop.eup %5136  ;;  %v1654_v55 = vsub.f32 2.0, %v1638_v20 }
 0x49a   :  { %v2113_v47 = vmul.f32 %v5137_v37, %v6564_v4 }
 0x49b   :  { %795 = vperm.xlu0 %4837, %v717_v60   ;;  %v5139_v60 = vpop.eup %5138  ;;  %v1670_v17 = vmul.f32 %v5133_v36, %v1654_v55  ;;  %v7592_v55 = vmov 65  }
 0x49c   :  { %v5141_v46 = vpop.eup %5140  ;;  %v2114_v2 = vmul.f32 %v5139_v60, %v6570_v13  ;;  %v2129_v11 = vsub.f32 2.0, %v2113_v47 }
 0x49d   :  { %1257 = vperm.xlu1 %4836, %v1191_v21   ;;  %v1669_v21 = vmul.f32 %v5131_v32, %v1653_v48  ;;  %v5143_v1 = vpop.eup %5142  ;;  %v2115_v26 = vmul.f32 %v5141_v46, %v6561_v14 }
 0x49e   :  { %v2116_v62 = vmul.f32 %v5143_v1, %v6567_v7  ;;  %v2145_v20 = vmul.f32 %v5137_v37, %v2129_v11 }
 0x49f   :  { %1262 = vperm.xlu0 %4837, %v1192_v58   ;;  %v1671_v58 = vmul.f32 %v5135_v23, %v1655_v28  ;;  %v2131_v25 = vsub.f32 2.0, %v2115_v26 }
 0x4a0   :  { %v2132_v56 = vsub.f32 2.0, %v2116_v62 }
 0x4a1   :  { %1267 = vperm.xlu1 %4836, %v1193_v63   ;;  %v2130_v63 = vsub.f32 2.0, %v2114_v2  ;;  %v2147_v32 = vmul.f32 %v5141_v46, %v2131_v25  ;;  %v7593_v46 = vld [vmem:[#allocation32_spill] sm:$0xff] }
 0x4a3   :  { %1272 = vperm.xlu0 %4837, %v1194_v52   ;;  %v2146_v52 = vmul.f32 %v5139_v60, %v2130_v63 }
 0x4a5   :  { %1734 = vperm.xlu1 %4836, %v1668_v0   ;;  %v2148_v0 = vmul.f32 %v5143_v1, %v2132_v56 }
 0x4a7   :  { %1739 = vperm.xlu0 %4837, %v1669_v21  }
 0x4a9   :  { %1744 = vperm.xlu1 %4836, %v1670_v17  }
 0x4ab   :  { %1749 = vperm.xlu0 %4837, %v1671_v58  }
 0x4ad   :  { %2211 = vperm.xlu1 %4836, %v2145_v20  }
 0x4af   :  { %2216 = vperm.xlu0 %4837, %v2146_v52  }
 0x4b1   :  { %2221 = vperm.xlu1 %4836, %v2147_v32  }
 0x4b3   :  { %2226 = vperm.xlu0 %4837, %v2148_v0   ;;  %v7594_v0 = vld [vmem:[#allocation4_spill] sm:$0xff] }
 0x4b5   :  { %4838 = vset.pattern.permute.xlu1 %v7592_v55 }
 0x4b7   :  { %4839 = vset.pattern.permute.xlu0 %v7592_v55 }
 0x4bc   :  { %v2152_v36 = vpop.permute.xlu1 %2151 }
 0x4bd   :  { %v2229_v23 = vmul.f32 %v2152_v36, %v6455_v44  ;;  %v6638_v44 = vld [vmem:[%s7394_s4] ss:$0 sm:$0xff] }
 0x4be   :  { %v2157_v30 = vpop.permute.xlu0 %2156 }
 0x4bf   :  { %2297 = vst.msk [vmem:[#allocation2] sm:$0xff] %vm2296_vm6, %v2229_v23  ;;  %v2230_v37 = vmul.f32 %v2157_v30, %v6462_v45 }
 0x4c0   :  { %v2162_v48 = vpop.permute.xlu1 %2161 }
 0x4c1   :  { %2298 = vst.msk [vmem:[#allocation2 + $0x8] sm:$0xff] %vm2296_vm6, %v2230_v37  ;;  %v2231_v60 = vmul.f32 %v6452_v6, %v2162_v48 }
 0x4c2   :  { %v2167_v47 = vpop.permute.xlu0 %2166 }
 0x4c3   :  { %2299 = vst.msk [vmem:[#allocation2 + $0x10] sm:$0xff] %vm2296_vm6, %v2231_v60  ;;  %v2232_v28 = vmul.f32 %v7593_v46, %v2167_v47  ;;  %v7595_v60 = vmov 0.0   ;;  %v7596_v47 = vld [vmem:[#allocation29_spill] sm:$0xff] }
 0x4c4   :  { %v741_v21 = vpop.permute.xlu1 %740 }
 0x4c5   :  { %2300 = vst.msk [vmem:[#allocation2 + $0x18] sm:$0xff] %vm2296_vm6, %v2232_v28  ;;  %v802_v45 = vmul.f32 %v741_v21, %v6318_v35 }
 0x4c6   :  { %v746_v2 = vpop.permute.xlu0 %745  ;;  %v2313_v1 = vld [vmem:[#allocation2] sm:$0xff] }
 0x4c7   :  { %2250 = vst.msk [vmem:[#allocation2 + $0x20] sm:$0xff] %vm2245_vm3, %v802_v45  ;;  %v803_v6 = vmul.f32 %v746_v2, %v6323_v29  ;;  %v2334_v17 = vadd.f32 %v6638_v44, %v2313_v1  ;;  %v7597_v45 = vld [vmem:[#allocation34_spill] sm:$0xff] }
 0x4c8   :  { %v751_v26 = vpop.permute.xlu1 %750  ;;  %v2314_v11 = vld [vmem:[#allocation2 + $0x8] sm:$0xff] }
 0x4c9   :  { %2251 = vst.msk [vmem:[#allocation2 + $0x28] sm:$0xff] %vm2245_vm3, %v803_v6  ;;  %v804_v58 = vmul.f32 %v6315_v16, %v751_v26  ;;  %v2335_v62 = vadd.f32 %v6638_v44, %v2314_v11  ;;  %v2350_v20 = vmax.f32 %v2334_v17, 0.0 }
 0x4ca   :  { %v756_v63 = vpop.permute.xlu0 %755  ;;  %v2315_v25 = vld [vmem:[#allocation2 + $0x10] sm:$0xff] }
 0x4cb   :  { %2252 = vst.msk [vmem:[#allocation2 + $0x30] sm:$0xff] %vm2245_vm3, %v804_v58  ;;  %v805_v35 = vmul.f32 %v6321_v54, %v756_v63  ;;  %v2351_v56 = vmax.f32 %v2335_v62, 0.0  ;;  %v2336_v29 = vadd.f32 %v6638_v44, %v2315_v25  ;;  %v7598_v63 = vld [vmem:[#allocation7_spill] sm:$0xff] }
 0x4cc   :  { %v1218_v52 = vpop.permute.xlu1 %1217  ;;  %v2316_v32 = vld [vmem:[#allocation2 + $0x18] sm:$0xff] }
 0x4cd   :  { %2253 = vst.msk [vmem:[#allocation2 + $0x38] sm:$0xff] %vm2245_vm3, %v805_v35  ;;  %v1279_v55 = vmul.f32 %v1218_v52, %v7594_v0  ;;  %v2366_v36 = vpack.c.bf16 %v2351_v56, %v2350_v20  ;;  %v2337_v16 = vadd.f32 %v6638_v44, %v2316_v32  ;;  %v2352_v54 = vmax.f32 %v2336_v29, 0.0  ;;  %v7600_v29 = vld [vmem:[#allocation8_spill] sm:$0xff]  ;;  %v7601_v32 = vld [vmem:[#allocation38_spill] sm:$0xff] }
 0x4ce   :  { %v1223_v23 = vpop.permute.xlu0 %1222 }
 0x4cf   :  { %2267 = vst.msk [vmem:[#allocation2 + $0x20] sm:$0xff] %vm2262_vm4, %v1279_v55  ;;  %v1280_v30 = vmul.f32 %v1223_v23, %v6386_v33  ;;  %4697 = vmatprep.mubr.bf16.mxu1 %v2366_v36  ;;  %4714 = vmatpush3.bf16.xpose.msra.mxu0 %v2366_v36  ;;  %v2353_v37 = vmax.f32 %v2337_v16, 0.0  ;;  %v7602_v55 = vld [vmem:[#allocation31_spill] sm:$0xff] }
 0x4d0   :  { %v1228_v48 = vpop.permute.xlu1 %1227  ;;  %4715 = vmatprep.subr.bf16.mxu0 %v7595_v60 }
 0x4d1   :  { %2268 = vst.msk [vmem:[#allocation2 + $0x28] sm:$0xff] %vm2262_vm4, %v1280_v30  ;;  %v1281_v46 = vmul.f32 %v7596_v47, %v1228_v48  ;;  %v2367_v28 = vpack.c.bf16 %v2353_v37, %v2352_v54  ;;  %v7603_v30 = vld [vmem:[#allocation33_spill] sm:$0xff] }
 0x4d2   :  { %v1233_v21 = vpop.permute.xlu0 %1232 }
 0x4d3   :  { %2269 = vst.msk [vmem:[#allocation2 + $0x30] sm:$0xff] %vm2262_vm4, %v1281_v46  ;;  %v1282_v2 = vmul.f32 %v7597_v45, %v1233_v21  ;;  %4698 = vmatmul.mubr.bf16.vlgmr.msra.gmra.mrb[4].mxu1 %v2367_v28  ;;  %v7604_v46 = vld [vmem:[#allocation25_spill] sm:$0xff] }
 0x4d4   :  { %v1695_v1 = vpop.permute.xlu1 %1694 }
 0x4d5   :  { %2270 = vst.msk [vmem:[#allocation2 + $0x38] sm:$0xff] %vm2262_vm4, %v1282_v2  ;;  %v1756_v33 = vmul.f32 %v1695_v1, %v6428_v3 }
 0x4d6   :  { %v1700_v6 = vpop.permute.xlu0 %1699 }
 0x4d7   :  { %2284 = vst.msk [vmem:[#allocation2 + $0x20] sm:$0xff] %vm2279_vm5, %v1756_v33  ;;  %v1757_v17 = vmul.f32 %v1700_v6, %v6432_v39  ;;  %4716 = vmatpush3.bf16.xpose.msra.mxu0 %v2367_v28  ;;  %v7599_v39 = vld [vmem:[#allocation14_spill] sm:$0xff] }
 0x4d8   :  { %v1705_v26 = vpop.permute.xlu1 %1704  ;;  %4717 = vmatprep.subr.bf16.mxu0 %v7595_v60 }
 0x4d9   :  { %2285 = vst.msk [vmem:[#allocation2 + $0x28] sm:$0xff] %vm2279_vm5, %v1757_v17  ;;  %v1758_v11 = vmul.f32 %v6426_v24, %v1705_v26 }
 0x4da   :  { %v1710_v58 = vpop.permute.xlu0 %1709 }
 0x4db   :  { %2286 = vst.msk [vmem:[#allocation2 + $0x30] sm:$0xff] %vm2279_vm5, %v1758_v11  ;;  %v1759_v62 = vmul.f32 %v6430_v50, %v1710_v58 }
 0x4dd   :  { %2287 = vst.msk [vmem:[#allocation2 + $0x38] sm:$0xff] %vm2279_vm5, %v1759_v62 }
 0x4ec   :  { %v2172_v3 = vpop.permute.xlu1 %2171 }
 0x4ed   :  { %v2233_v25 = vmul.f32 %v2172_v3, %v7598_v63 }
 0x4ee   :  { %v2177_v35 = vpop.permute.xlu0 %2176 }
 0x4ef   :  { %2301 = vst.msk [vmem:[#allocation2 + $0x20] sm:$0xff] %vm2296_vm6, %v2233_v25  ;;  %v2234_v20 = vmul.f32 %v2177_v35, %v7599_v39 }
 0x4f0   :  { %v2182_v56 = vpop.permute.xlu1 %2181 }
 0x4f1   :  { %2302 = vst.msk [vmem:[#allocation2 + $0x28] sm:$0xff] %vm2296_vm6, %v2234_v20  ;;  %v2235_v24 = vmul.f32 %v7600_v29, %v2182_v56 }
 0x4f2   :  { %v2187_v52 = vpop.permute.xlu0 %2186 }
 0x4f3   :  { %2303 = vst.msk [vmem:[#allocation2 + $0x30] sm:$0xff] %vm2296_vm6, %v2235_v24  ;;  %v2236_v50 = vmul.f32 %v7601_v32, %v2187_v52 }
 0x4f4   :  { %v761_v0 = vpop.permute.xlu1 %760 }
 0x4f5   :  { %2304 = vst.msk [vmem:[#allocation2 + $0x38] sm:$0xff] %vm2296_vm6, %v2236_v50  ;;  %v806_v36 = vmul.f32 %v761_v0, %v7602_v55 }
 0x4f6   :  { %v766_v16 = vpop.permute.xlu0 %765  ;;  %v2317_v23 = vld [vmem:[#allocation2 + $0x20] sm:$0xff] }
 0x4f7   :  { %2254 = vst.msk [vmem:[#allocation2 + $0x40] sm:$0xff] %vm2245_vm3, %v806_v36  ;;  %v807_v54 = vmul.f32 %v766_v16, %v7603_v30  ;;  %v2338_v37 = vadd.f32 %v6638_v44, %v2317_v23 }
 0x4f8   :  { %v771_v48 = vpop.permute.xlu1 %770  ;;  %v2318_v47 = vld [vmem:[#allocation2 + $0x28] sm:$0xff] }
 0x4f9   :  { %2255 = vst.msk [vmem:[#allocation2 + $0x48] sm:$0xff] %vm2245_vm3, %v807_v54  ;;  %v808_v28 = vmul.f32 %v7604_v46, %v771_v48  ;;  %v2339_v21 = vadd.f32 %v6638_v44, %v2318_v47  ;;  %v2354_v33 = vmax.f32 %v2338_v37, 0.0 }
 0x4fa   :  { %v776_v45 = vpop.permute.xlu0 %775  ;;  %v2319_v2 = vld [vmem:[#allocation2 + $0x30] sm:$0xff] }
 0x4fb   :  { %2256 = vst.msk [vmem:[#allocation2 + $0x50] sm:$0xff] %vm2245_vm3, %v808_v28  ;;  %v809_v1 = vmul.f32 %v6336_v5, %v776_v45  ;;  %v2355_v6 = vmax.f32 %v2339_v21, 0.0  ;;  %v2340_v17 = vadd.f32 %v6638_v44, %v2319_v2 }
 0x4fc   :  { %v1238_v26 = vpop.permute.xlu1 %1237  ;;  %v2320_v11 = vld [vmem:[#allocation2 + $0x38] sm:$0xff] }
 0x4fd   :  { %2257 = vst.msk [vmem:[#allocation2 + $0x58] sm:$0xff] %vm2245_vm3, %v809_v1  ;;  %v1283_v58 = vmul.f32 %v1238_v26, %v6395_v41  ;;  %v2368_v62 = vpack.c.bf16 %v2355_v6, %v2354_v33  ;;  %v2341_v3 = vadd.f32 %v6638_v44, %v2320_v11  ;;  %v2356_v5 = vmax.f32 %v2340_v17, 0.0 }
 0x4fe   :  { %v1243_v63 = vpop.permute.xlu0 %1242 }
 0x4ff   :  { %2271 = vst.msk [vmem:[#allocation2 + $0x40] sm:$0xff] %vm2262_vm4, %v1283_v58  ;;  %v1284_v25 = vmul.f32 %v1243_v63, %v6399_v9  ;;  %4701 = vmatprep.mubr.bf16.mxu1 %v2368_v62  ;;  %4718 = vmatpush3.bf16.xpose.msra.mxu0 %v2368_v62  ;;  %v2357_v35 = vmax.f32 %v2341_v3, 0.0 }
 0x500   :  { %v1248_v39 = vpop.permute.xlu1 %1247  ;;  %4719 = vmatprep.subr.bf16.mxu0 %v7595_v60 }
 0x501   :  { %2272 = vst.msk [vmem:[#allocation2 + $0x48] sm:$0xff] %vm2262_vm4, %v1284_v25  ;;  %v1285_v20 = vmul.f32 %v6392_v31, %v1248_v39  ;;  %v2369_v41 = vpack.c.bf16 %v2357_v35, %v2356_v5  ;;  %v7605_v25 = vld [vmem:[#allocation35_spill] sm:$0xff] }
 0x502   :  { %v1253_v56 = vpop.permute.xlu0 %1252 }
 0x503   :  { %2273 = vst.msk [vmem:[#allocation2 + $0x50] sm:$0xff] %vm2262_vm4, %v1285_v20  ;;  %v1286_v29 = vmul.f32 %v6397_v38, %v1253_v56  ;;  %4702 = vmatmul.mubr.bf16.gmra.mrb[8].mxu1 %v2369_v41 }
 0x504   :  { %v1715_v24 = vpop.permute.xlu1 %1714 }
 0x505   :  { %2274 = vst.msk [vmem:[#allocation2 + $0x58] sm:$0xff] %vm2262_vm4, %v1286_v29  ;;  %v1760_v9 = vmul.f32 %v1715_v24, %v6436_v42 }
 0x506   :  { %v1720_v52 = vpop.permute.xlu0 %1719 }
 0x507   :  { %2288 = vst.msk [vmem:[#allocation2 + $0x40] sm:$0xff] %vm2279_vm5, %v1760_v9  ;;  %v1761_v32 = vmul.f32 %v1720_v52, %v6440_v18  ;;  %4720 = vmatpush3.bf16.xpose.msra.mxu0 %v2369_v41 }
 0x508   :  { %v1725_v50 = vpop.permute.xlu1 %1724  ;;  %4721 = vmatprep.subr.bf16.mxu0 %v7595_v60 }
 0x509   :  { %2289 = vst.msk [vmem:[#allocation2 + $0x48] sm:$0xff] %vm2279_vm5, %v1761_v32  ;;  %v1762_v31 = vmul.f32 %v6434_v27, %v1725_v50 }
 0x50a   :  { %v1730_v38 = vpop.permute.xlu0 %1729 }
 0x50b   :  { %2290 = vst.msk [vmem:[#allocation2 + $0x50] sm:$0xff] %vm2279_vm5, %v1762_v31  ;;  %v1763_v0 = vmul.f32 %v6438_v40, %v1730_v38 }
 0x50c   :  { %v2192_v55 = vpop.permute.xlu1 %2191 }
 0x50d   :  { %2291 = vst.msk [vmem:[#allocation2 + $0x58] sm:$0xff] %vm2279_vm5, %v1763_v0  ;;  %v2237_v42 = vmul.f32 %v2192_v55, %v6547_v34 }
 0x50e   :  { %v2197_v36 = vpop.permute.xlu0 %2196 }
 0x50f   :  { %2305 = vst.msk [vmem:[#allocation2 + $0x40] sm:$0xff] %vm2296_vm6, %v2237_v42  ;;  %v2238_v18 = vmul.f32 %v2197_v36, %v6552_v61 }
 0x510   :  { %v2202_v16 = vpop.permute.xlu1 %2201 }
 0x511   :  { %2306 = vst.msk [vmem:[#allocation2 + $0x48] sm:$0xff] %vm2296_vm6, %v2238_v18  ;;  %v2239_v27 = vmul.f32 %v6545_v57, %v2202_v16 }
 0x512   :  { %v2207_v23 = vpop.permute.xlu0 %2206 }
 0x513   :  { %2307 = vst.msk [vmem:[#allocation2 + $0x50] sm:$0xff] %vm2296_vm6, %v2239_v27  ;;  %v2240_v40 = vmul.f32 %v6550_v49, %v2207_v23 }
 0x514   :  { %v781_v30 = vpop.permute.xlu1 %780 }
 0x515   :  { %2308 = vst.msk [vmem:[#allocation2 + $0x58] sm:$0xff] %vm2296_vm6, %v2240_v40  ;;  %v810_v34 = vmul.f32 %v781_v30, %v6354_v19  ;;  %v4854_v30 = vld [vmem:[%s7392_s3] ss:$0 sps:$4 sm:$0x44]  }
 0x516   :  { %v786_v54 = vpop.permute.xlu0 %785  ;;  %v2321_v37 = vld [vmem:[#allocation2 + $0x40] sm:$0xff] }
 0x517   :  { %2258 = vst.msk [vmem:[#allocation2 + $0x60] sm:$0xff] %vm2245_vm3, %v810_v34  ;;  %v811_v61 = vmul.f32 %v786_v54, %v6358_v51  ;;  %v2342_v48 = vadd.f32 %v6638_v44, %v2321_v37  ;;  %v2539_v34 = vrot.slane %v4854_v30, 2 }
 0x518   :  { %v791_v47 = vpop.permute.xlu1 %790  ;;  %v2322_v57 = vld [vmem:[#allocation2 + $0x48] sm:$0xff] }
 0x519   :  { %2259 = vst.msk [vmem:[#allocation2 + $0x68] sm:$0xff] %vm2245_vm3, %v811_v61  ;;  %v812_v46 = vmul.f32 %v6352_v15, %v791_v47  ;;  %v2343_v49 = vadd.f32 %v6638_v44, %v2322_v57  ;;  %v2358_v45 = vmax.f32 %v2342_v48, 0.0 }
 0x51a   :  { %v796_v28 = vpop.permute.xlu0 %795  ;;  %v2323_v21 = vld [vmem:[#allocation2 + $0x50] sm:$0xff] }
 0x51b   :  { %2260 = vst.msk [vmem:[#allocation2 + $0x70] sm:$0xff] %vm2245_vm3, %v812_v46  ;;  %v813_v19 = vmul.f32 %v6356_v12, %v796_v28  ;;  %v2359_v2 = vmax.f32 %v2343_v49, 0.0  ;;  %v2344_v51 = vadd.f32 %v6638_v44, %v2323_v21 }
 0x51c   :  { %v1258_v1 = vpop.permute.xlu1 %1257  ;;  %v2324_v33 = vld [vmem:[#allocation2 + $0x58] sm:$0xff] }
 0x51d   :  { %2261 = vst.msk [vmem:[#allocation2 + $0x78] sm:$0xff] %vm2245_vm3, %v813_v19  ;;  %v1287_v6 = vmul.f32 %v1258_v1, %v6404_v22  ;;  %v2370_v17 = vpack.c.bf16 %v2359_v2, %v2358_v45  ;;  %v2345_v15 = vadd.f32 %v6638_v44, %v2324_v33  ;;  %v2360_v12 = vmax.f32 %v2344_v51, 0.0 }
 0x51e   :  { %v1263_v26 = vpop.permute.xlu0 %1262 }
 0x51f   :  { %2275 = vst.msk [vmem:[#allocation2 + $0x60] sm:$0xff] %vm2262_vm4, %v1287_v6  ;;  %v1288_v11 = vmul.f32 %v1263_v26, %v6408_v10  ;;  %4705 = vmatprep.mubr.bf16.mxu1 %v2370_v17  ;;  %4722 = vmatpush3.bf16.xpose.msra.mxu0 %v2370_v17  ;;  %v2361_v58 = vmax.f32 %v2345_v15, 0.0  ;;  %v7606_v10 = vld [vmem:[#allocation3_spill] sm:$0xff] }
 0x520   :  { %v1268_v62 = vpop.permute.xlu1 %1267  ;;  %4723 = vmatprep.subr.bf16.mxu0 %v7595_v60 }
 0x521   :  { %2276 = vst.msk [vmem:[#allocation2 + $0x68] sm:$0xff] %vm2262_vm4, %v1288_v11  ;;  %v1289_v3 = vmul.f32 %v6402_v53, %v1268_v62  ;;  %v2371_v22 = vpack.c.bf16 %v2361_v58, %v2360_v12  ;;  %v7607_v62 = vmov 64  }
 0x522   :  { %v1273_v63 = vpop.permute.xlu0 %1272 }
 0x523   :  { %2277 = vst.msk [vmem:[#allocation2 + $0x70] sm:$0xff] %vm2262_vm4, %v1289_v3  ;;  %v1290_v5 = vmul.f32 %v7605_v25, %v1273_v63  ;;  %4706 = vmatmul.mubr.bf16.gmra.mrb[12].mxu1 %v2371_v22 }
 0x524   :  { %v1735_v35 = vpop.permute.xlu1 %1734 }
 0x525   :  { %2278 = vst.msk [vmem:[#allocation2 + $0x78] sm:$0xff] %vm2262_vm4, %v1290_v5  ;;  %v1764_v39 = vmul.f32 %v1735_v35, %v7606_v10  ;;  %v7608_v35 = vld [vmem:[#allocation20_spill] sm:$0xff] }
 0x526   :  { %v1740_v20 = vpop.permute.xlu0 %1739 }
 0x527   :  { %2292 = vst.msk [vmem:[#allocation2 + $0x60] sm:$0xff] %vm2279_vm5, %v1764_v39  ;;  %v1765_v41 = vmul.f32 %v1740_v20, %v6448_v43  ;;  %4724 = vmatpush3.bf16.xpose.msra.mxu0 %v2371_v22 }
 0x528   :  { %v1745_v56 = vpop.permute.xlu1 %1744  ;;  %4725 = vmatprep.subr.bf16.mxu0 %v7595_v60 }
 0x529   :  { %2293 = vst.msk [vmem:[#allocation2 + $0x68] sm:$0xff] %vm2279_vm5, %v1765_v41  ;;  %v1766_v53 = vmul.f32 %v6442_v59, %v1745_v56 }
 0x52a   :  { %v1750_v29 = vpop.permute.xlu0 %1749 }
 0x52b   :  { %2294 = vst.msk [vmem:[#allocation2 + $0x70] sm:$0xff] %vm2279_vm5, %v1766_v53  ;;  %v1767_v24 = vmul.f32 %v6446_v8, %v1750_v29  ;;  %v4278_v53 = vld [vmem:[%s7393_s1] sm:$0xff]  }
 0x52c   :  { %v2212_v9 = vpop.permute.xlu1 %2211 }
 0x52d   :  { %2295 = vst.msk [vmem:[#allocation2 + $0x78] sm:$0xff] %vm2279_vm5, %v1767_v24  ;;  %v2241_v52 = vmul.f32 %v2212_v9, %v6564_v4  ;;  %v4279_v9 = vunpack.c.l.bf16 %v4278_v53 }
 0x52e   :  { %v2217_v32 = vpop.permute.xlu0 %2216 }
 0x52f   :  { %2309 = vst.msk [vmem:[#allocation2 + $0x60] sm:$0xff] %vm2296_vm6, %v2241_v52  ;;  %v2242_v43 = vmul.f32 %v2217_v32, %v6570_v13 }
 0x530   :  { %v2222_v50 = vpop.permute.xlu1 %2221 }
 0x531   :  { %2310 = vst.msk [vmem:[#allocation2 + $0x68] sm:$0xff] %vm2296_vm6, %v2242_v43  ;;  %v2243_v59 = vmul.f32 %v6561_v14, %v2222_v50 }
 0x532   :  { %v2227_v31 = vpop.permute.xlu0 %2226 }
 0x533   :  { %2311 = vst.msk [vmem:[#allocation2 + $0x70] sm:$0xff] %vm2296_vm6, %v2243_v59  ;;  %v2244_v8 = vmul.f32 %v6567_v7, %v2227_v31  ;;  %v4348_v59 = vld [vmem:[%s7393_s1 + $0x8] sm:$0xff]  }
 0x534   :  { %v4283_v31 = vunpack.c.l.bf16 %v4348_v59 }
 0x535   :  { %2312 = vst.msk [vmem:[#allocation2 + $0x78] sm:$0xff] %vm2296_vm6, %v2244_v8 }
 0x536   :  { %v2325_v38 = vld [vmem:[#allocation2 + $0x60] sm:$0xff] }
 0x537   :  { %v2346_v4 = vadd.f32 %v6638_v44, %v2325_v38 }
 0x538   :  { %v2326_v0 = vld [vmem:[#allocation2 + $0x68] sm:$0xff] }
 0x539   :  { %v2347_v55 = vadd.f32 %v6638_v44, %v2326_v0  ;;  %v2362_v13 = vmax.f32 %v2346_v4, 0.0 }
 0x53a   :  { %v2327_v42 = vld [vmem:[#allocation2 + $0x70] sm:$0xff] }
 0x53b   :  { %v2363_v36 = vmax.f32 %v2347_v55, 0.0  ;;  %v2348_v18 = vadd.f32 %v6638_v44, %v2327_v42  ;;  %v4280_v55 = vunpack.c.h.bf16 %v4278_v53 }
 0x53c   :  { %v2328_v16 = vld [vmem:[#allocation2 + $0x78] sm:$0xff] }
 0x53d   :  { %v2372_v14 = vpack.c.bf16 %v2363_v36, %v2362_v13  ;;  %v2349_v27 = vadd.f32 %v6638_v44, %v2328_v16  ;;  %v2364_v7 = vmax.f32 %v2348_v18, 0.0  ;;  %v4284_v18 = vunpack.c.h.bf16 %v4348_v59 }
 0x53f   :  { %4709 = vmatprep.mubr.bf16.mxu1 %v2372_v14  ;;  %4726 = vmatpush3.bf16.xpose.msra.mxu0 %v2372_v14  ;;  %v2365_v23 = vmax.f32 %v2349_v27, 0.0 }
 0x540   :  { %4727 = vmatprep.subr.bf16.mxu0 %v7595_v60 }
 0x541   :  { %v2373_v40 = vpack.c.bf16 %v2365_v23, %v2364_v7 }
 0x543   :  { %4710 = vmatmul.mubr.bf16.gmra.mrb[16].mxu1 %v2373_v40 }
 0x547   :  { %4728 = vmatpush3.bf16.xpose.msra.mxu0 %v2373_v40  ;;  %v4349_v40 = vld [vmem:[%s7393_s1 + $0x10] sm:$0xff]  }
 0x548   :  { %4765 = vmatprep.subr.bf16.mxu0 %v7595_v60 }
 0x54e   :  { %4730 = vmatmul.mubr.bf16.vlgmr.msra.gmra.mrb[80].mxu0 %v2539_v34 }
 0x54f   :  { %4781 = vmatprep.mubr.msk.bf16.mxu0 %vm5337_vm0, %v7595_v60 }
 0x5a6   :  { %v4699_v44 = vpop.f32.mrb[4].mxu1 }
 0x5a7   :  { %v2473_v54 = vpop.f32.mrb[5].mxu1  ;;  %2601 = vperm.xlu1 %4838, %v4699_v44  }
 0x5a8   :  { %v4700_v37 = vpop.f32.mrb[6].mxu1 }
 0x5a9   :  { %v2582_v61 = vpack.c.bf16 %v4700_v37, %v4699_v44  ;;  %v2476_v48 = vpop.f32.mrb[7].mxu1 }
 0x5aa   :  { %v2581_v47 = vpack.c.bf16 %v2476_v48, %v2473_v54  ;;  %2596 = vperm.xlu0 %4839, %v2476_v48  }
 0x5ab   :  { %2591 = vperm.xlu1 %4838, %v2473_v54  }
 0x5ac   :  { %4733 = vmatprep.subr.bf16.mxu1 %v2581_v47 }
 0x5ad   :  { %4734 = vmatpush3.bf16.msra.mxu1 %v2581_v47 }
 0x5ae   :  { %4735 = vmatprep.subr.bf16.mxu1 %v2582_v61 }
 0x5af   :  { %2606 = vperm.xlu1 %4838, %v4700_v37   ;;  %v4288_v37 = vunpack.c.h.bf16 %v4349_v40 }
 0x5b1   :  { %4736 = vmatpush3.bf16.msra.mxu1 %v2582_v61 }
 0x5d6   :  { %v4703_v57 = vpop.f32.mrb[8].mxu1 }
 0x5d7   :  { %v2489_v46 = vpop.f32.mrb[9].mxu1  ;;  %2621 = vperm.xlu0 %4839, %v4703_v57  }
 0x5d8   :  { %v4704_v49 = vpop.f32.mrb[10].mxu1 }
 0x5d9   :  { %v2584_v28 = vpack.c.bf16 %v4704_v49, %v4703_v57  ;;  %v2492_v21 = vpop.f32.mrb[11].mxu1  ;;  %v4287_v57 = vunpack.c.l.bf16 %v4349_v40 }
 0x5da   :  { %v2583_v19 = vpack.c.bf16 %v2492_v21, %v2489_v46  ;;  %2616 = vperm.xlu1 %4838, %v2492_v21  }
 0x5db   :  { %2611 = vperm.xlu0 %4839, %v2489_v46  }
 0x5dc   :  { %4737 = vmatprep.subr.bf16.mxu1 %v2583_v19 }
 0x5dd   :  { %4738 = vmatpush3.bf16.msra.mxu1 %v2583_v19 }
 0x5de   :  { %4739 = vmatprep.subr.bf16.mxu1 %v2584_v28  ;;  %2626 = vperm.xlu1 %4838, %v4704_v49  }
 0x5e1   :  { %4740 = vmatpush3.bf16.msra.mxu1 %v2584_v28  ;;  %v4350_v28 = vld [vmem:[%s7393_s1 + $0x18] sm:$0xff]  }
 0x5f6   :  { %v4707_v45 = vpop.f32.mrb[12].mxu1 }
 0x5f7   :  { %v2505_v2 = vpop.f32.mrb[13].mxu1  ;;  %2641 = vperm.xlu0 %4839, %v4707_v45  }
 0x5f8   :  { %v4708_v51 = vpop.f32.mrb[14].mxu1 }
 0x5f9   :  { %v2586_v1 = vpack.c.bf16 %v4708_v51, %v4707_v45  ;;  %v2508_v33 = vpop.f32.mrb[15].mxu1 }
 0x5fa   :  { %v2585_v6 = vpack.c.bf16 %v2508_v33, %v2505_v2  ;;  %2636 = vperm.xlu1 %4838, %v2508_v33   ;;  %v4291_v33 = vunpack.c.l.bf16 %v4350_v28 }
 0x5fb   :  { %2631 = vperm.xlu0 %4839, %v2505_v2   ;;  %v4292_v2 = vunpack.c.h.bf16 %v4350_v28 }
 0x5fc   :  { %4741 = vmatprep.subr.bf16.mxu1 %v2585_v6 }
 0x5fd   :  { %4742 = vmatpush3.bf16.msra.mxu1 %v2585_v6 }
 0x5fe   :  { %4743 = vmatprep.subr.bf16.mxu1 %v2586_v1  ;;  %2646 = vperm.xlu1 %4838, %v4708_v51  }
 0x601   :  { %4744 = vmatpush3.bf16.msra.mxu1 %v2586_v1 }
 0x616   :  { %v4711_v17 = vpop.f32.mrb[16].mxu1 }
 0x617   :  { %2661 = vperm.xlu0 %4839, %v4711_v17   ;;  %v2521_v15 = vpop.f32.mrb[17].mxu1 }
 0x618   :  { %v4712_v26 = vpop.f32.mrb[18].mxu1 }
 0x619   :  { %v2588_v11 = vpack.c.bf16 %v4712_v26, %v4711_v17  ;;  %v2524_v12 = vpop.f32.mrb[19].mxu1 }
 0x61a   :  { %v2587_v58 = vpack.c.bf16 %v2524_v12, %v2521_v15  ;;  %2656 = vperm.xlu1 %4838, %v2524_v12  }
 0x61b   :  { %2651 = vperm.xlu0 %4839, %v2521_v15  }
 0x61c   :  { %4745 = vmatprep.subr.bf16.mxu1 %v2587_v58 }
 0x61d   :  { %4746 = vmatpush3.bf16.msra.mxu1 %v2587_v58  ;;  %v4351_v58 = vld [vmem:[%s7393_s1 + $0x20] sm:$0xff]  }
 0x61e   :  { %2666 = vperm.xlu1 %4838, %v4712_v26   ;;  %4747 = vmatprep.subr.bf16.mxu1 %v2588_v11 }
 0x61f   :  { %4841 = vset.pattern.permute.xlu0 %v7607_v62 }
 0x621   :  { %4748 = vmatpush3.bf16.msra.mxu1 %v2588_v11  ;;  %v2575_v3 = vpop.f32.mrb[80].mxu0 }
 0x622   :  { %v4731_v22 = vpop.f32.mrb[81].mxu0  ;;  %4840 = vset.pattern.permute.xlu1 %v7607_v62  ;;  %v6769_v10 = vrot.slane %v2575_v3, %v7608_v35 }
 0x623   :  { %v2578_v63 = vpop.f32.mrb[82].mxu0 }
 0x624   :  { %v4732_v25 = vpop.f32.mrb[83].mxu0 }
 0x625   :  { %v4296_v25 = vunpack.c.h.bf16 %v4351_v58 }
 0x626   :  { %v2602_v5 = vpop.permute.xlu1 %2601 }
 0x627   :  { %v2675_v41 = vadd.f32 %v6769_v10, %v2602_v5 }
 0x629   :  { %v2597_v29 = vpop.permute.xlu0 %2596  ;;  %v2691_v52 = vmul.f32 0.2, %v2675_v41 }
 0x62a   :  { %v2592_v39 = vpop.permute.xlu1 %2591  ;;  %v2674_v32 = vadd.f32 %v6769_v10, %v2597_v29  ;;  %v4352_v29 = vld [vmem:[%s7393_s1 + $0x28] sm:$0xff]  }
 0x62b   :  { %v2673_v20 = vadd.f32 %v6769_v10, %v2592_v39  ;;  %v2707_v8 = vmax.f32 %v2675_v41, %v2691_v52  ;;  %v4295_v41 = vunpack.c.l.bf16 %v4351_v58  ;;  %v4299_v59 = vunpack.c.l.bf16 %v4352_v29 }
 0x62c   :  { %v2690_v38 = vmul.f32 0.2, %v2674_v32 }
 0x62d   :  { %v2689_v56 = vmul.f32 0.2, %v2673_v20  ;;  %v6784_v36 = vadd.f32 %v4283_v31, %v2707_v8 }
 0x62e   :  { %v2607_v24 = vpop.permute.xlu1 %2606  ;;  %v2706_v42 = vmax.f32 %v2674_v32, %v2690_v38  ;;  %v4300_v32 = vunpack.c.h.bf16 %v4352_v29 }
 0x62f   :  { %v2705_v43 = vmax.f32 %v2673_v20, %v2689_v56  ;;  %v2676_v50 = vadd.f32 %v6769_v10, %v2607_v24 }
 0x630   :  { %v6789_v14 = vadd.f32 %v4280_v55, %v2706_v42 }
 0x631   :  { %v2692_v4 = vmul.f32 0.2, %v2676_v50  ;;  %v6781_v0 = vadd.f32 %v4279_v9, %v2705_v43 }
 0x633   :  { %v2708_v13 = vmax.f32 %v2676_v50, %v2692_v4 }
 0x635   :  { %v6787_v16 = vadd.f32 %v4284_v18, %v2708_v13  ;;  %v4353_v13 = vld [vmem:[%s7393_s1 + $0x30] sm:$0xff]  }
 0x636   :  { %v4304_v40 = vunpack.c.h.bf16 %v4353_v13 }
 0x63a   :  { %2769 = vmax.xlane.f32.xlu0 %v6781_v0 }
 0x63e   :  { %2773 = vmax.xlane.f32.xlu0 %v6784_v36 }
 0x642   :  { %2775 = vmax.xlane.f32.xlu0 %v6787_v16  ;;  %2771 = vmax.xlane.f32.xlu1 %v6789_v14 }
 0x656   :  { %v2622_v27 = vpop.permute.xlu0 %2621 }
 0x657   :  { %v2679_v7 = vadd.f32 %v6769_v10, %v2622_v27 }
 0x659   :  { %v2617_v23 = vpop.permute.xlu1 %2616  ;;  %v2695_v61 = vmul.f32 0.2, %v2679_v7 }
 0x65a   :  { %v2678_v30 = vadd.f32 %v6769_v10, %v2617_v23  ;;  %v2612_v34 = vpop.permute.xlu0 %2611 }
 0x65b   :  { %v2677_v44 = vadd.f32 %v6769_v10, %v2612_v34  ;;  %v2711_v51 = vmax.f32 %v2679_v7, %v2695_v61 }
 0x65c   :  { %v2694_v54 = vmul.f32 0.2, %v2678_v30 }
 0x65d   :  { %v2693_v48 = vmul.f32 0.2, %v2677_v44  ;;  %v2627_v47 = vpop.permute.xlu1 %2626  ;;  %v6811_v15 = vadd.f32 %v4291_v33, %v2711_v51 }
 0x65e   :  { %v2710_v46 = vmax.f32 %v2678_v30, %v2694_v54  ;;  %v2680_v49 = vadd.f32 %v6769_v10, %v2627_v47  ;;  %v4303_v54 = vunpack.c.l.bf16 %v4353_v13 }
 0x65f   :  { %v2709_v21 = vmax.f32 %v2677_v44, %v2693_v48  ;;  %v4354_v48 = vld [vmem:[%s7393_s1 + $0x38] sm:$0xff]  }
 0x660   :  { %v2696_v19 = vmul.f32 0.2, %v2680_v49  ;;  %v6803_v45 = vadd.f32 %v4288_v37, %v2710_v46 }
 0x661   :  { %v6805_v1 = vadd.f32 %v4287_v57, %v2709_v21 }
 0x662   :  { %v2712_v6 = vmax.f32 %v2680_v49, %v2696_v19  ;;  %2779 = vmax.xlane.f32.xlu0 %v6803_v45  ;;  %v4308_v49 = vunpack.c.h.bf16 %v4354_v48  ;;  %v4307_v19 = vunpack.c.l.bf16 %v4354_v48 }
 0x663   :  { %2777 = vmax.xlane.f32.xlu1 %v6805_v1 }
 0x664   :  { %v6809_v17 = vadd.f32 %v4292_v2, %v2712_v6 }
 0x666   :  { %2783 = vmax.xlane.f32.xlu0 %v6809_v17 }
 0x667   :  { %2781 = vmax.xlane.f32.xlu1 %v6811_v15 }
 0x676   :  { %v2642_v26 = vpop.permute.xlu0 %2641 }
 0x677   :  { %v2683_v11 = vadd.f32 %v6769_v10, %v2642_v26 }
 0x679   :  { %v2637_v12 = vpop.permute.xlu1 %2636  ;;  %v2699_v5 = vmul.f32 0.2, %v2683_v11 }
 0x67a   :  { %v2682_v62 = vadd.f32 %v6769_v10, %v2637_v12  ;;  %v2632_v3 = vpop.permute.xlu0 %2631 }
 0x67b   :  { %v2681_v22 = vadd.f32 %v6769_v10, %v2632_v3  ;;  %v2715_v43 = vmax.f32 %v2683_v11, %v2699_v5 }
 0x67c   :  { %v2698_v63 = vmul.f32 0.2, %v2682_v62 }
 0x67d   :  { %v2697_v39 = vmul.f32 0.2, %v2681_v22  ;;  %v2647_v20 = vpop.permute.xlu1 %2646  ;;  %v6833_v38 = vadd.f32 %v4299_v59, %v2715_v43 }
 0x67e   :  { %v2714_v56 = vmax.f32 %v2682_v62, %v2698_v63  ;;  %v2684_v53 = vadd.f32 %v6769_v10, %v2647_v20 }
 0x67f   :  { %v2713_v24 = vmax.f32 %v2681_v22, %v2697_v39 }
 0x680   :  { %v2700_v9 = vmul.f32 0.2, %v2684_v53  ;;  %v6825_v52 = vadd.f32 %v4296_v25, %v2714_v56 }
 0x681   :  { %v6827_v50 = vadd.f32 %v4295_v41, %v2713_v24 }
 0x682   :  { %v2716_v31 = vmax.f32 %v2684_v53, %v2700_v9  ;;  %2787 = vmax.xlane.f32.xlu0 %v6825_v52 }
 0x683   :  { %2785 = vmax.xlane.f32.xlu1 %v6827_v50 }
 0x684   :  { %v6831_v8 = vadd.f32 %v4300_v32, %v2716_v31 }
 0x686   :  { %2791 = vmax.xlane.f32.xlu0 %v6831_v8 }
 0x687   :  { %2789 = vmax.xlane.f32.xlu1 %v6833_v38 }
 0x696   :  { %v2662_v4 = vpop.permute.xlu0 %2661 }
 0x697   :  { %v2687_v55 = vadd.f32 %v6769_v10, %v2662_v4 }
 0x699   :  { %v2657_v42 = vpop.permute.xlu1 %2656  ;;  %v2703_v30 = vmul.f32 0.2, %v2687_v55 }
 0x69a   :  { %v2686_v18 = vadd.f32 %v6769_v10, %v2657_v42  ;;  %v2652_v27 = vpop.permute.xlu0 %2651 }
 0x69b   :  { %v2685_v7 = vadd.f32 %v6769_v10, %v2652_v27  ;;  %v2719_v28 = vmax.f32 %v2687_v55, %v2703_v30 }
 0x69c   :  { %v2702_v23 = vmul.f32 0.2, %v2686_v18 }
 0x69d   :  { %v2701_v34 = vmul.f32 0.2, %v2685_v7  ;;  %v2667_v44 = vpop.permute.xlu1 %2666 }
 0x69e   :  { %v2718_v37 = vmax.f32 %v2686_v18, %v2702_v23  ;;  %v2688_v61 = vadd.f32 %v6769_v10, %v2667_v44  ;;  %v6855_v10 = vadd.f32 %v4307_v19, %v2719_v28 }
 0x69f   :  { %v2717_v47 = vmax.f32 %v2685_v7, %v2701_v34 }
 0x6a0   :  { %v2704_v57 = vmul.f32 0.2, %v2688_v61  ;;  %v6847_v46 = vadd.f32 %v4304_v40, %v2718_v37 }
 0x6a1   :  { %v6849_v21 = vadd.f32 %v4303_v54, %v2717_v47 }
 0x6a2   :  { %v2720_v2 = vmax.f32 %v2688_v61, %v2704_v57  ;;  %2795 = vmax.xlane.f32.xlu0 %v6847_v46 }
 0x6a3   :  { %2793 = vmax.xlane.f32.xlu1 %v6849_v21 }
 0x6a4   :  { %v6853_v51 = vadd.f32 %v4308_v49, %v2720_v2 }
 0x6a6   :  { %2799 = vmax.xlane.f32.xlu0 %v6853_v51 }
 0x6a7   :  { %2797 = vmax.xlane.f32.xlu1 %v6855_v10 }
 0x6c7   :  { %v2770_v33 = vpop.xlane.xlu0 %2769 }
 0x6c8   :  { %v2801_v6 = vsub.f32 %v6781_v0, %v2770_v33 }
 0x6ca   :  { %v2817_v12 = vmul.f32 1.442695, %v2801_v6 }
 0x6cb   :  { %v2774_v26 = vpop.xlane.xlu0 %2773 }
 0x6cc   :  { %v2803_v11 = vsub.f32 %v6784_v36, %v2774_v26  ;;  %5144 = vpow2.f32 %v2817_v12 }
 0x6ce   :  { %v2821_v58 = vmul.f32 1.442695, %v2803_v11 }
 0x6cf   :  { %v2772_v62 = vpop.xlane.xlu1 %2771  ;;  %v2776_v3 = vpop.xlane.xlu0 %2775 }
 0x6d0   :  { %v2802_v22 = vsub.f32 %v6789_v14, %v2772_v62  ;;  %v2804_v63 = vsub.f32 %v6787_v16, %v2776_v3  ;;  %5146 = vpow2.f32 %v2821_v58 }
 0x6d2   :  { %v2819_v25 = vmul.f32 1.442695, %v2802_v22  ;;  %v2823_v5 = vmul.f32 1.442695, %v2804_v63 }
 0x6d4   :  { %5148 = vpow2.f32 %v2819_v25 }
 0x6d5   :  { %5150 = vpow2.f32 %v2823_v5 }
 0x6d6   :  { %v5145_v39 = vpop.eup %5144 }
 0x6da   :  { %v5147_v20 = vpop.eup %5146 }
 0x6de   :  { %v5149_v0 = vpop.eup %5148 }
 0x6df   :  { %v5151_v41 = vpop.eup %5150  ;;  %v2849_v56 = vpack.c.bf16 %v5149_v0, %v5145_v39  ;;  %v4869_v39 = vld [vmem:[%s7390_s2 + $0x2c] ss:$16 sps:$4 sm:$0xff]   ;;  %v4867_v0 = vld [vmem:[%s7390_s2 + $0x28] ss:$16 sps:$4 sm:$0xff]  }
 0x6e0   :  { %v2850_v36 = vpack.c.bf16 %v5151_v41, %v5147_v20 }
 0x6e1   :  { %4749 = vmatprep.mubr.bf16.mxu1 %v2849_v56  ;;  %v4872_v56 = vld [vmem:[%s7390_s2 + $0x4c] ss:$16 sps:$4 sm:$0xff]  }
 0x6e2   :  { %4750 = vmatmul.mubr.bf16.vlgmr.msra.gmra.mrb[20].mxu1 %v2850_v36 }
 0x6ef   :  { %v2780_v53 = vpop.xlane.xlu0 %2779 }
 0x6f0   :  { %v2806_v29 = vsub.f32 %v6803_v45, %v2780_v53  ;;  %v2778_v14 = vpop.xlane.xlu1 %2777 }
 0x6f1   :  { %v2805_v16 = vsub.f32 %v6805_v1, %v2778_v14  ;;  %v4875_v14 = vld [vmem:[%s7390_s2 + $0x6c] ss:$16 sps:$4 sm:$0xff]  }
 0x6f2   :  { %v2827_v24 = vmul.f32 1.442695, %v2806_v29  ;;  %v4870_v29 = vld [vmem:[%s7390_s2 + $0x48] ss:$16 sps:$4 sm:$0xff]  }
 0x6f3   :  { %v2825_v9 = vmul.f32 1.442695, %v2805_v16  ;;  %v2784_v32 = vpop.xlane.xlu0 %2783  ;;  %v4873_v16 = vld [vmem:[%s7390_s2 + $0x68] ss:$16 sps:$4 sm:$0xff]  }
 0x6f4   :  { %5152 = vpow2.f32 %v2827_v24  ;;  %v2808_v43 = vsub.f32 %v6809_v17, %v2784_v32  ;;  %v2782_v59 = vpop.xlane.xlu1 %2781 }
 0x6f5   :  { %5154 = vpow2.f32 %v2825_v9  ;;  %v2807_v31 = vsub.f32 %v6811_v15, %v2782_v59 }
 0x6f6   :  { %v2831_v4 = vmul.f32 1.442695, %v2808_v43 }
 0x6f7   :  { %v2829_v55 = vmul.f32 1.442695, %v2807_v31 }
 0x6f8   :  { %5156 = vpow2.f32 %v2831_v4 }
 0x6f9   :  { %5158 = vpow2.f32 %v2829_v55 }
 0x6fe   :  { %v5153_v42 = vpop.eup %5152 }
 0x6ff   :  { %v5155_v13 = vpop.eup %5154 }
 0x700   :  { %v2851_v45 = vpack.c.bf16 %v5153_v42, %v5155_v13 }
 0x702   :  { %v5157_v18 = vpop.eup %5156  ;;  %4753 = vmatprep.mubr.bf16.mxu1 %v2851_v45 }
 0x703   :  { %v5159_v1 = vpop.eup %5158 }
 0x704   :  { %v2852_v27 = vpack.c.bf16 %v5157_v18, %v5159_v1 }
 0x706   :  { %4754 = vmatmul.mubr.bf16.gmra.mrb[24].mxu1 %v2852_v27  ;;  %v4878_v27 = vld [vmem:[%s7390_s2 + $0x8c] ss:$16 sps:$4 sm:$0xff]  }
 0x70f   :  { %v2788_v7 = vpop.xlane.xlu0 %2787 }
 0x710   :  { %v2810_v23 = vsub.f32 %v6825_v52, %v2788_v7  ;;  %v2786_v17 = vpop.xlane.xlu1 %2785 }
 0x711   :  { %v2809_v40 = vsub.f32 %v6827_v50, %v2786_v17  ;;  %v4876_v17 = vld [vmem:[%s7390_s2 + $0x88] ss:$16 sps:$4 sm:$0xff]  }
 0x712   :  { %v2835_v30 = vmul.f32 1.442695, %v2810_v23 }
 0x713   :  { %v2833_v15 = vmul.f32 1.442695, %v2809_v40  ;;  %v2792_v34 = vpop.xlane.xlu0 %2791  ;;  %v4881_v40 = vld [vmem:[%s7390_s2 + $0xac] ss:$16 sps:$4 sm:$0xff]  }
 0x714   :  { %5160 = vpow2.f32 %v2835_v30  ;;  %v2812_v44 = vsub.f32 %v6831_v8, %v2792_v34  ;;  %v2790_v54 = vpop.xlane.xlu1 %2789  ;;  %v4884_v34 = vld [vmem:[%s7390_s2 + $0xcc] ss:$16 sps:$4 sm:$0xff]  }
 0x715   :  { %5162 = vpow2.f32 %v2833_v15  ;;  %v2811_v37 = vsub.f32 %v6833_v38, %v2790_v54  ;;  %v4879_v15 = vld [vmem:[%s7390_s2 + $0xa8] ss:$16 sps:$4 sm:$0xff]   ;;  %v4887_v54 = vld [vmem:[%s7390_s2 + $0xec] ss:$16 sps:$4 sm:$0xff]  }
 0x716   :  { %v2839_v61 = vmul.f32 1.442695, %v2812_v44  ;;  %v4882_v44 = vld [vmem:[%s7390_s2 + $0xc8] ss:$16 sps:$4 sm:$0xff]  }
 0x717   :  { %v2837_v48 = vmul.f32 1.442695, %v2811_v37  ;;  %v4885_v37 = vld [vmem:[%s7390_s2 + $0xe8] ss:$16 sps:$4 sm:$0xff]  }
 0x718   :  { %5164 = vpow2.f32 %v2839_v61  ;;  %v5344_v61 = vmov 0  }
 0x719   :  { %5166 = vpow2.f32 %v2837_v48 }
 0x71e   :  { %v5161_v47 = vpop.eup %5160 }
 0x71f   :  { %v5163_v57 = vpop.eup %5162 }
 0x720   :  { %v2853_v52 = vpack.c.bf16 %v5161_v47, %v5163_v57 }
 0x722   :  { %v5165_v49 = vpop.eup %5164  ;;  %4757 = vmatprep.mubr.bf16.mxu1 %v2853_v52 }
 0x723   :  { %v5167_v50 = vpop.eup %5166 }
 0x724   :  { %v2854_v28 = vpack.c.bf16 %v5165_v49, %v5167_v50 }
 0x726   :  { %4758 = vmatmul.mubr.bf16.gmra.mrb[28].mxu1 %v2854_v28 }
 0x72f   :  { %v2796_v19 = vpop.xlane.xlu0 %2795 }
 0x730   :  { %v2814_v2 = vsub.f32 %v6847_v46, %v2796_v19  ;;  %v2794_v8 = vpop.xlane.xlu1 %2793 }
 0x731   :  { %v2813_v33 = vsub.f32 %v6849_v21, %v2794_v8 }
 0x732   :  { %v2843_v6 = vmul.f32 1.442695, %v2814_v2 }
 0x733   :  { %v2841_v38 = vmul.f32 1.442695, %v2813_v33  ;;  %v2800_v26 = vpop.xlane.xlu0 %2799 }
 0x734   :  { %5168 = vpow2.f32 %v2843_v6  ;;  %v2816_v11 = vsub.f32 %v6853_v51, %v2800_v26  ;;  %v2798_v12 = vpop.xlane.xlu1 %2797  ;;  %v4864_v51 = vld [vmem:[%s7390_s2 + $0x8] ss:$16 sps:$4 sm:$0xff]  }
 0x735   :  { %5170 = vpow2.f32 %v2841_v38  ;;  %v2815_v58 = vsub.f32 %v6855_v10, %v2798_v12  ;;  %v4866_v10 = vld [vmem:[%s7390_s2 + $0xc] ss:$16 sps:$4 sm:$0xff]  }
 0x736   :  { %v2847_v62 = vmul.f32 1.442695, %v2816_v11  ;;  %3289 = vmatprep.subr.bf16.mxu1 %v4866_v10 }
 0x737   :  { %v2845_v3 = vmul.f32 1.442695, %v2815_v58  ;;  %3290 = vmatpush1.bf16.msra.mxu1 %v4864_v51 }
 0x738   :  { %5172 = vpow2.f32 %v2847_v62  ;;  %3291 = vmatprep.subr.bf16.mxu1 %v4869_v39 }
 0x739   :  { %5174 = vpow2.f32 %v2845_v3 }
 0x73b   :  { %3292 = vmatpush1.bf16.msra.mxu1 %v4867_v0 }
 0x73c   :  { %3293 = vmatprep.subr.bf16.mxu1 %v4872_v56 }
 0x73e   :  { %v5169_v22 = vpop.eup %5168 }
 0x73f   :  { %v5171_v63 = vpop.eup %5170  ;;  %3294 = vmatpush1.bf16.msra.mxu1 %v4870_v29 }
 0x740   :  { %v2855_v46 = vpack.c.bf16 %v5169_v22, %v5171_v63  ;;  %3295 = vmatprep.subr.bf16.mxu1 %v4875_v14 }
 0x742   :  { %v5173_v25 = vpop.eup %5172  ;;  %4761 = vmatprep.mubr.bf16.mxu1 %v2855_v46 }
 0x743   :  { %v5175_v21 = vpop.eup %5174  ;;  %3296 = vmatpush1.bf16.msra.mxu1 %v4873_v16 }
 0x744   :  { %v2856_v5 = vpack.c.bf16 %v5173_v25, %v5175_v21  ;;  %3297 = vmatprep.subr.bf16.mxu1 %v4878_v27 }
 0x746   :  { %4762 = vmatmul.mubr.bf16.gmra.mrb[32].mxu1 %v2856_v5 }
 0x747   :  { %3298 = vmatpush1.bf16.msra.mxu1 %v4876_v17  ;;  %3321 = vmatprep.mubr.bf16.mxu1 %v5344_v61 }
 0x748   :  { %3299 = vmatprep.subr.bf16.mxu1 %v4881_v40 }
 0x74b   :  { %3300 = vmatpush1.bf16.msra.mxu1 %v4879_v15 }
 0x74c   :  { %3301 = vmatprep.subr.bf16.mxu1 %v4884_v34 }
 0x74f   :  { %3302 = vmatpush1.bf16.msra.mxu1 %v4882_v44 }
 0x750   :  { %3303 = vmatprep.subr.bf16.mxu1 %v4887_v54 }
 0x753   :  { %3304 = vmatpush1.bf16.msra.mxu1 %v4885_v37 }
 0x7b5   :  { %v6884_v20 = vpop.f32.mrb[20].mxu1 }
 0x7b6   :  { %5176 = vrcp.f32 %v6884_v20  ;;  %v6890_v41 = vpop.f32.mrb[21].mxu1 }
 0x7b7   :  { %5178 = vrcp.f32 %v6890_v41  ;;  %v6896_v36 = vpop.f32.mrb[22].mxu1 }
 0x7b8   :  { %5180 = vrcp.f32 %v6896_v36  ;;  %v6899_v53 = vpop.f32.mrb[23].mxu1 }
 0x7b9   :  { %5182 = vrcp.f32 %v6899_v53 }
 0x7c0   :  { %v5177_v24 = vpop.eup %5176 }
 0x7c1   :  { %v5179_v9 = vpop.eup %5178  ;;  %v2972_v43 = vmul.f32 %v5177_v24, %v6884_v20 }
 0x7c2   :  { %v5181_v32 = vpop.eup %5180  ;;  %v2970_v59 = vmul.f32 %v5179_v9, %v6890_v41 }
 0x7c3   :  { %v5183_v31 = vpop.eup %5182  ;;  %v2988_v42 = vsub.f32 2.0, %v2972_v43  ;;  %v2973_v45 = vmul.f32 %v5181_v32, %v6896_v36 }
 0x7c4   :  { %v2986_v4 = vsub.f32 2.0, %v2970_v59  ;;  %v2971_v55 = vmul.f32 %v5183_v31, %v6899_v53 }
 0x7c5   :  { %v3004_v7 = vmul.f32 %v5177_v24, %v2988_v42  ;;  %v2989_v23 = vsub.f32 2.0, %v2973_v45 }
 0x7c6   :  { %v3002_v13 = vmul.f32 %v5179_v9, %v2986_v4  ;;  %v2987_v18 = vsub.f32 2.0, %v2971_v55 }
 0x7c7   :  { %v3005_v30 = vmul.f32 %v5181_v32, %v2989_v23 }
 0x7c8   :  { %v3003_v1 = vmul.f32 %v5183_v31, %v2987_v18  ;;  %3020 = vperm.xlu1 %4840, %v3002_v13  }
 0x7ca   :  { %3025 = vperm.xlu0 %4841, %v3003_v1  }
 0x7cc   :  { %3030 = vperm.xlu1 %4840, %v3004_v7  }
 0x7d0   :  { %3035 = vperm.xlu1 %4840, %v3005_v30  }
 0x7d9   :  { %v6940_v48 = vpop.f32.mrb[24].mxu1 }
 0x7da   :  { %v6942_v47 = vpop.f32.mrb[25].mxu1 }
 0x7db   :  { %5184 = vrcp.f32 %v6942_v47  ;;  %v6945_v57 = vpop.f32.mrb[26].mxu1 }
 0x7dc   :  { %5186 = vrcp.f32 %v6940_v48  ;;  %v6948_v52 = vpop.f32.mrb[27].mxu1 }
 0x7dd   :  { %5188 = vrcp.f32 %v6948_v52 }
 0x7de   :  { %5190 = vrcp.f32 %v6945_v57 }
 0x7e5   :  { %v5185_v49 = vpop.eup %5184 }
 0x7e6   :  { %v5187_v50 = vpop.eup %5186  ;;  %v2974_v28 = vmul.f32 %v5185_v49, %v6942_v47 }
 0x7e7   :  { %v5189_v19 = vpop.eup %5188  ;;  %v2976_v33 = vmul.f32 %v5187_v50, %v6940_v48 }
 0x7e8   :  { %v2990_v2 = vsub.f32 2.0, %v2974_v28  ;;  %v2975_v8 = vmul.f32 %v5189_v19, %v6948_v52  ;;  %v5191_v26 = vpop.eup %5190 }
 0x7e9   :  { %v2992_v11 = vsub.f32 2.0, %v2976_v33  ;;  %v2977_v12 = vmul.f32 %v5191_v26, %v6945_v57 }
 0x7ea   :  { %v3006_v6 = vmul.f32 %v5185_v49, %v2990_v2  ;;  %v2991_v38 = vsub.f32 2.0, %v2975_v8 }
 0x7eb   :  { %v3008_v62 = vmul.f32 %v5187_v50, %v2992_v11  ;;  %v2993_v3 = vsub.f32 2.0, %v2977_v12 }
 0x7ec   :  { %3040 = vperm.xlu1 %4840, %v3006_v6   ;;  %v3007_v58 = vmul.f32 %v5189_v19, %v2991_v38 }
 0x7ed   :  { %v3009_v22 = vmul.f32 %v5191_v26, %v2993_v3  ;;  %v6997_v26 = vld [vmem:[%s7394_s4 + $0x1] ss:$0 sm:$0xff] }
 0x7f0   :  { %3045 = vperm.xlu1 %4840, %v3007_v58  }
 0x7f4   :  { %3050 = vperm.xlu1 %4840, %v3008_v62  }
 0x7f8   :  { %3055 = vperm.xlu1 %4840, %v3009_v22  }
 0x7f9   :  { %v6956_v63 = vpop.f32.mrb[28].mxu1 }
 0x7fa   :  { %5192 = vrcp.f32 %v6956_v63  ;;  %v6959_v46 = vpop.f32.mrb[29].mxu1 }
 0x7fb   :  { %5194 = vrcp.f32 %v6959_v46  ;;  %v6962_v25 = vpop.f32.mrb[30].mxu1 }
 0x7fc   :  { %5196 = vrcp.f32 %v6962_v25  ;;  %v6965_v21 = vpop.f32.mrb[31].mxu1 }
 0x7fd   :  { %5198 = vrcp.f32 %v6965_v21 }
 0x804   :  { %v5193_v5 = vpop.eup %5192 }
 0x805   :  { %v5195_v51 = vpop.eup %5194  ;;  %v2980_v10 = vmul.f32 %v5193_v5, %v6956_v63 }
 0x806   :  { %v5197_v39 = vpop.eup %5196  ;;  %v2978_v0 = vmul.f32 %v5195_v51, %v6959_v46 }
 0x807   :  { %v5199_v56 = vpop.eup %5198  ;;  %v2996_v29 = vsub.f32 2.0, %v2980_v10  ;;  %v2981_v32 = vmul.f32 %v5197_v39, %v6962_v25 }
 0x808   :  { %v2994_v14 = vsub.f32 2.0, %v2978_v0  ;;  %v2979_v16 = vmul.f32 %v5199_v56, %v6965_v21 }
 0x809   :  { %v3012_v24 = vmul.f32 %v5193_v5, %v2996_v29  ;;  %v2997_v59 = vsub.f32 2.0, %v2981_v32 }
 0x80a   :  { %v3010_v9 = vmul.f32 %v5195_v51, %v2994_v14  ;;  %v2995_v43 = vsub.f32 2.0, %v2979_v16 }
 0x80b   :  { %3070 = vperm.xlu0 %4841, %v3012_v24   ;;  %v3013_v4 = vmul.f32 %v5197_v39, %v2997_v59 }
 0x80c   :  { %3060 = vperm.xlu1 %4840, %v3010_v9   ;;  %v3011_v31 = vmul.f32 %v5199_v56, %v2995_v43 }
 0x810   :  { %3065 = vperm.xlu1 %4840, %v3011_v31  }
 0x814   :  { %3075 = vperm.xlu1 %4840, %v3013_v4  }
 0x819   :  { %v6972_v55 = vpop.f32.mrb[32].mxu1 }
 0x81a   :  { %5200 = vrcp.f32 %v6972_v55  ;;  %v6975_v42 = vpop.f32.mrb[33].mxu1 }
 0x81b   :  { %5202 = vrcp.f32 %v6975_v42  ;;  %v6978_v13 = vpop.f32.mrb[34].mxu1 }
 0x81c   :  { %5204 = vrcp.f32 %v6978_v13  ;;  %v6981_v45 = vpop.f32.mrb[35].mxu1 }
 0x81d   :  { %5206 = vrcp.f32 %v6981_v45 }
 0x824   :  { %v5201_v18 = vpop.eup %5200 }
 0x825   :  { %v5203_v1 = vpop.eup %5202  ;;  %v2984_v7 = vmul.f32 %v5201_v18, %v6972_v55 }
 0x826   :  { %v5205_v27 = vpop.eup %5204  ;;  %v2982_v23 = vmul.f32 %v5203_v1, %v6975_v42 }
 0x827   :  { %v5207_v17 = vpop.eup %5206  ;;  %v2985_v30 = vmul.f32 %v5205_v27, %v6978_v13  ;;  %v3000_v34 = vsub.f32 2.0, %v2984_v7 }
 0x828   :  { %v2998_v40 = vsub.f32 2.0, %v2982_v23  ;;  %v2983_v15 = vmul.f32 %v5207_v17, %v6981_v45 }
 0x829   :  { %v3001_v37 = vsub.f32 2.0, %v2985_v30  ;;  %v3016_v50 = vmul.f32 %v5201_v18, %v3000_v34 }
 0x82a   :  { %v3014_v44 = vmul.f32 %v5203_v1, %v2998_v40  ;;  %v2999_v54 = vsub.f32 2.0, %v2983_v15 }
 0x82b   :  { %v3017_v28 = vmul.f32 %v5205_v27, %v3001_v37 }
 0x82c   :  { %v3015_v49 = vmul.f32 %v5207_v17, %v2999_v54  ;;  %3080 = vperm.xlu0 %4841, %v3014_v44  }
 0x82e   :  { %3085 = vperm.xlu1 %4840, %v3015_v49  }
 0x830   :  { %3090 = vperm.xlu0 %4841, %v3016_v50  }
 0x832   :  { %3095 = vperm.xlu1 %4840, %v3017_v28  }
 0x847   :  { %v3021_v19 = vpop.permute.xlu1 %3020 }
 0x848   :  { %v3098_v2 = vmul.f32 %v3021_v19, %v6890_v41 }
 0x849   :  { %v3026_v8 = vpop.permute.xlu0 %3025 }
 0x84a   :  { %3115 = vst.msk [vmem:[#allocation2] sm:$0xff] %vm3114_vm7, %v3098_v2  ;;  %v3099_v33 = vmul.f32 %v3026_v8, %v6899_v53 }
 0x84b   :  { %v3031_v6 = vpop.permute.xlu1 %3030 }
 0x84c   :  { %3116 = vst.msk [vmem:[#allocation2 + $0x8] sm:$0xff] %vm3114_vm7, %v3099_v33  ;;  %v3100_v38 = vmul.f32 %v6884_v20, %v3031_v6 }
 0x84e   :  { %3117 = vst.msk [vmem:[#allocation2 + $0x10] sm:$0xff] %vm3114_vm7, %v3100_v38 }
 0x84f   :  { %v3036_v11 = vpop.permute.xlu1 %3035 }
 0x850   :  { %v3101_v41 = vmul.f32 %v6896_v36, %v3036_v11 }
 0x851   :  { %v3131_v12 = vld [vmem:[#allocation2] sm:$0xff] }
 0x852   :  { %3118 = vst.msk [vmem:[#allocation2 + $0x18] sm:$0xff] %vm3114_vm7, %v3101_v41  ;;  %v3152_v53 = vadd.f32 %v6997_v26, %v3131_v12 }
 0x853   :  { %v3132_v58 = vld [vmem:[#allocation2 + $0x8] sm:$0xff] }
 0x854   :  { %v3153_v62 = vadd.f32 %v6997_v26, %v3132_v58  ;;  %v3168_v3 = vmax.f32 %v3152_v53, 0.0 }
 0x855   :  { %v3133_v22 = vld [vmem:[#allocation2 + $0x10] sm:$0xff] }
 0x856   :  { %v3169_v20 = vmax.f32 %v3153_v62, 0.0  ;;  %v3154_v10 = vadd.f32 %v6997_v26, %v3133_v22  ;;  %v5345_v22 = vmov 1  }
 0x857   :  { %4842 = vset.pattern.permute.xlu0 %v5345_v22  ;;  %4843 = vset.pattern.permute.xlu1 %v5345_v22 }
 0x858   :  { %v3184_v5 = vpack.c.bf16 %v3169_v20, %v3168_v3  ;;  %v3170_v0 = vmax.f32 %v3154_v10, 0.0 }
 0x859   :  { %v3134_v51 = vld [vmem:[#allocation2 + $0x18] sm:$0xff] }
 0x85a   :  { %3322 = vmatmul.mubr.bf16.vlgmr.msra.gmra.mrb[36].mxu1 %v3184_v5  ;;  %4766 = vmatpush3.bf16.xpose.msra.mxu0 %v3184_v5  ;;  %v3155_v39 = vadd.f32 %v6997_v26, %v3134_v51 }
 0x85b   :  { %3331 = vmatprep.mubr.bf16.mxu1 %v5344_v61  ;;  %4767 = vmatprep.subr.bf16.mxu0 %v7595_v60 }
 0x85c   :  { %v3171_v36 = vmax.f32 %v3155_v39, 0.0 }
 0x85e   :  { %v3185_v56 = vpack.c.bf16 %v3171_v36, %v3170_v0 }
 0x862   :  { %3332 = vmatmul.mubr.bf16.gmra.mrb[40].mxu1 %v3185_v56  ;;  %4768 = vmatpush3.bf16.xpose.msra.mxu0 %v3185_v56 }
 0x863   :  { %3341 = vmatprep.mubr.bf16.mxu1 %v5344_v61  ;;  %4769 = vmatprep.subr.bf16.mxu0 %v7595_v60 }
 0x86b   :  { %v3041_v29 = vpop.permute.xlu1 %3040 }
 0x86c   :  { %v3102_v14 = vmul.f32 %v3041_v29, %v6942_v47 }
 0x86e   :  { %3119 = vst.msk [vmem:[#allocation2 + $0x20] sm:$0xff] %vm3114_vm7, %v3102_v14 }
 0x86f   :  { %v3046_v16 = vpop.permute.xlu1 %3045 }
 0x870   :  { %v3103_v24 = vmul.f32 %v3046_v16, %v6948_v52 }
 0x872   :  { %3120 = vst.msk [vmem:[#allocation2 + $0x28] sm:$0xff] %vm3114_vm7, %v3103_v24 }
 0x873   :  { %v3051_v9 = vpop.permute.xlu1 %3050 }
 0x874   :  { %v3104_v32 = vmul.f32 %v6940_v48, %v3051_v9 }
 0x875   :  { %v3135_v43 = vld [vmem:[#allocation2 + $0x20] sm:$0xff] }
 0x876   :  { %3121 = vst.msk [vmem:[#allocation2 + $0x30] sm:$0xff] %vm3114_vm7, %v3104_v32  ;;  %v3156_v4 = vadd.f32 %v6997_v26, %v3135_v43  ;;  %v4855_v32 = vld [vmem:[%s7392_s3] ss:$0 sps:$4 sm:$0x44]  }
 0x877   :  { %v3056_v59 = vpop.permute.xlu1 %3055 }
 0x878   :  { %v3105_v31 = vmul.f32 %v6945_v57, %v3056_v59  ;;  %v3172_v1 = vmax.f32 %v3156_v4, 0.0 }
 0x879   :  { %v3136_v18 = vld [vmem:[#allocation2 + $0x28] sm:$0xff] }
 0x87a   :  { %3122 = vst.msk [vmem:[#allocation2 + $0x38] sm:$0xff] %vm3114_vm7, %v3105_v31  ;;  %v3157_v47 = vadd.f32 %v6997_v26, %v3136_v18  ;;  %v3406_v31 = vshrl.u32 %v4855_v32, 16 }
 0x87c   :  { %v3173_v52 = vmax.f32 %v3157_v47, 0.0  ;;  %v3408_v4 = vrot.slane %v3406_v31, 2 }
 0x87d   :  { %v3137_v27 = vld [vmem:[#allocation2 + $0x30] sm:$0xff] }
 0x87e   :  { %v3186_v7 = vpack.c.bf16 %v3173_v52, %v3172_v1  ;;  %v3158_v48 = vadd.f32 %v6997_v26, %v3137_v27 }
 0x880   :  { %3342 = vmatmul.mubr.bf16.gmra.mrb[44].mxu1 %v3186_v7  ;;  %4770 = vmatpush3.bf16.xpose.msra.mxu0 %v3186_v7  ;;  %v3174_v17 = vmax.f32 %v3158_v48, 0.0 }
 0x881   :  { %3351 = vmatprep.mubr.bf16.mxu1 %v5344_v61  ;;  %4771 = vmatprep.subr.bf16.mxu0 %v7595_v60  ;;  %v3138_v57 = vld [vmem:[#allocation2 + $0x38] sm:$0xff] }
 0x882   :  { %v3159_v23 = vadd.f32 %v6997_v26, %v3138_v57 }
 0x884   :  { %v3175_v40 = vmax.f32 %v3159_v23, 0.0 }
 0x886   :  { %v3187_v30 = vpack.c.bf16 %v3175_v40, %v3174_v17 }
 0x888   :  { %3352 = vmatmul.mubr.bf16.gmra.mrb[48].mxu1 %v3187_v30  ;;  %4772 = vmatpush3.bf16.xpose.msra.mxu0 %v3187_v30 }
 0x889   :  { %3361 = vmatprep.mubr.bf16.mxu1 %v5344_v61  ;;  %4773 = vmatprep.subr.bf16.mxu0 %v7595_v60 }
 0x88a   :  { %v3071_v15 = vpop.permute.xlu0 %3070 }
 0x88b   :  { %v3108_v34 = vmul.f32 %v6956_v63, %v3071_v15  ;;  %v3061_v44 = vpop.permute.xlu1 %3060 }
 0x88c   :  { %v3106_v54 = vmul.f32 %v3061_v44, %v6959_v46 }
 0x88d   :  { %3125 = vst.msk [vmem:[#allocation2 + $0x50] sm:$0xff] %vm3114_vm7, %v3108_v34 }
 0x88e   :  { %3123 = vst.msk [vmem:[#allocation2 + $0x40] sm:$0xff] %vm3114_vm7, %v3106_v54 }
 0x88f   :  { %v3066_v37 = vpop.permute.xlu1 %3065 }
 0x890   :  { %v3107_v49 = vmul.f32 %v3066_v37, %v6965_v21 }
 0x892   :  { %3124 = vst.msk [vmem:[#allocation2 + $0x48] sm:$0xff] %vm3114_vm7, %v3107_v49 }
 0x893   :  { %v3076_v50 = vpop.permute.xlu1 %3075 }
 0x894   :  { %v3109_v28 = vmul.f32 %v6962_v25, %v3076_v50  ;;  %v3141_v6 = vld [vmem:[#allocation2 + $0x50] sm:$0xff] }
 0x895   :  { %v3139_v19 = vld [vmem:[#allocation2 + $0x40] sm:$0xff]  ;;  %v3162_v41 = vadd.f32 %v6997_v26, %v3141_v6 }
 0x896   :  { %3126 = vst.msk [vmem:[#allocation2 + $0x58] sm:$0xff] %vm3114_vm7, %v3109_v28  ;;  %v3160_v63 = vadd.f32 %v6997_v26, %v3139_v19 }
 0x897   :  { %v3178_v12 = vmax.f32 %v3162_v41, 0.0 }
 0x898   :  { %v3176_v8 = vmax.f32 %v3160_v63, 0.0 }
 0x899   :  { %v3140_v2 = vld [vmem:[#allocation2 + $0x48] sm:$0xff] }
 0x89a   :  { %v3161_v46 = vadd.f32 %v6997_v26, %v3140_v2 }
 0x89c   :  { %v3177_v33 = vmax.f32 %v3161_v46, 0.0 }
 0x89d   :  { %v3142_v38 = vld [vmem:[#allocation2 + $0x58] sm:$0xff] }
 0x89e   :  { %v3188_v11 = vpack.c.bf16 %v3177_v33, %v3176_v8  ;;  %v3163_v21 = vadd.f32 %v6997_v26, %v3142_v38 }
 0x8a0   :  { %3362 = vmatmul.mubr.bf16.gmra.mrb[52].mxu1 %v3188_v11  ;;  %4774 = vmatpush3.bf16.xpose.msra.mxu0 %v3188_v11  ;;  %v3179_v25 = vmax.f32 %v3163_v21, 0.0 }
 0x8a1   :  { %3371 = vmatprep.mubr.bf16.mxu1 %v5344_v61  ;;  %4775 = vmatprep.subr.bf16.mxu0 %v7595_v60 }
 0x8a2   :  { %v3189_v53 = vpack.c.bf16 %v3179_v25, %v3178_v12 }
 0x8a8   :  { %3372 = vmatmul.mubr.bf16.gmra.mrb[56].mxu1 %v3189_v53  ;;  %4776 = vmatpush3.bf16.xpose.msra.mxu0 %v3189_v53 }
 0x8a9   :  { %3381 = vmatprep.mubr.bf16.mxu1 %v5344_v61  ;;  %4777 = vmatprep.subr.bf16.mxu0 %v7595_v60 }
 0x8ab   :  { %v3081_v58 = vpop.permute.xlu0 %3080 }
 0x8ac   :  { %v3110_v62 = vmul.f32 %v3081_v58, %v6975_v42 }
 0x8ad   :  { %v3086_v3 = vpop.permute.xlu1 %3085 }
 0x8ae   :  { %3127 = vst.msk [vmem:[#allocation2 + $0x60] sm:$0xff] %vm3114_vm7, %v3110_v62  ;;  %v3111_v20 = vmul.f32 %v3086_v3, %v6981_v45 }
 0x8af   :  { %v3091_v5 = vpop.permute.xlu0 %3090 }
 0x8b0   :  { %3128 = vst.msk [vmem:[#allocation2 + $0x68] sm:$0xff] %vm3114_vm7, %v3111_v20  ;;  %v3112_v51 = vmul.f32 %v6972_v55, %v3091_v5 }
 0x8b1   :  { %v3096_v10 = vpop.permute.xlu1 %3095 }
 0x8b2   :  { %3129 = vst.msk [vmem:[#allocation2 + $0x70] sm:$0xff] %vm3114_vm7, %v3112_v51  ;;  %v3113_v39 = vmul.f32 %v6978_v13, %v3096_v10 }
 0x8b4   :  { %3130 = vst.msk [vmem:[#allocation2 + $0x78] sm:$0xff] %vm3114_vm7, %v3113_v39 }
 0x8b5   :  { %v3143_v42 = vld [vmem:[#allocation2 + $0x60] sm:$0xff] }
 0x8b6   :  { %v3164_v36 = vadd.f32 %v6997_v26, %v3143_v42 }
 0x8b7   :  { %v3144_v0 = vld [vmem:[#allocation2 + $0x68] sm:$0xff] }
 0x8b8   :  { %v3165_v45 = vadd.f32 %v6997_v26, %v3144_v0  ;;  %v3180_v56 = vmax.f32 %v3164_v36, 0.0 }
 0x8b9   :  { %v3145_v14 = vld [vmem:[#allocation2 + $0x70] sm:$0xff] }
 0x8ba   :  { %v3181_v29 = vmax.f32 %v3165_v45, 0.0  ;;  %v3166_v9 = vadd.f32 %v6997_v26, %v3145_v14 }
 0x8bb   :  { %v3146_v16 = vld [vmem:[#allocation2 + $0x78] sm:$0xff] }
 0x8bc   :  { %v3190_v24 = vpack.c.bf16 %v3181_v29, %v3180_v56  ;;  %v3167_v55 = vadd.f32 %v6997_v26, %v3146_v16  ;;  %v3182_v43 = vmax.f32 %v3166_v9, 0.0 }
 0x8be   :  { %3382 = vmatmul.mubr.bf16.gmra.mrb[60].mxu1 %v3190_v24  ;;  %4778 = vmatpush3.bf16.xpose.msra.mxu0 %v3190_v24  ;;  %v3183_v13 = vmax.f32 %v3167_v55, 0.0 }
 0x8bf   :  { %3391 = vmatprep.mubr.bf16.mxu1 %v5344_v61  ;;  %4779 = vmatprep.subr.bf16.mxu0 %v7595_v60 }
 0x8c0   :  { %v3191_v59 = vpack.c.bf16 %v3183_v13, %v3182_v43 }
 0x8c6   :  { %3392 = vmatmul.mubr.bf16.gmra.mrb[64].mxu1 %v3191_v59  ;;  %4780 = vmatpush3.bf16.xpose.msra.mxu0 %v3191_v59  ;;  %v4310_v59 = vld [vmem:[%s7393_s1] sm:$0xff]  }
 0x8c7   :  { %3766 = vmatprep.mubr.bf16.mxu1 %v5344_v61 }
 0x8cd   :  { %4782 = vmatmul.mubr.bf16.vlgmr.msra.gmra.mrb[84].mxu0 %v3408_v4 }
 0x92d   :  { %v3323_v18 = vpop.f32.mrb[36].mxu1 }
 0x92e   :  { %v3325_v26 = vpop.f32.mrb[37].mxu1 }
 0x92f   :  { %3468 = vperm.xlu0 %4842, %v3325_v26   ;;  %v3327_v47 = vpop.f32.mrb[38].mxu1 }
 0x930   :  { %v3450_v1 = vpack.c.bf16 %v3327_v47, %v3323_v18  ;;  %v3329_v60 = vpop.f32.mrb[39].mxu1  ;;  %v4312_v18 = vunpack.c.h.bf16 %v4310_v59 }
 0x931   :  { %v3451_v52 = vpack.c.bf16 %v3329_v60, %v3325_v26  ;;  %3473 = vperm.xlu1 %4843, %v3329_v60  }
 0x933   :  { %3734 = vmatprep.subr.bf16.mxu1 %v3451_v52 }
 0x934   :  { %3735 = vmatpush1.bf16.msra.mxu1 %v3450_v1  ;;  %v4311_v1 = vunpack.c.l.bf16 %v4310_v59 }
 0x935   :  { %v3333_v27 = vpop.f32.mrb[40].mxu1 }
 0x936   :  { %v3335_v7 = vpop.f32.mrb[41].mxu1 }
 0x937   :  { %3478 = vperm.xlu1 %4843, %v3335_v7   ;;  %v3337_v48 = vpop.f32.mrb[42].mxu1 }
 0x938   :  { %v3452_v57 = vpack.c.bf16 %v3337_v48, %v3333_v27  ;;  %v3339_v23 = vpop.f32.mrb[43].mxu1 }
 0x939   :  { %v3453_v17 = vpack.c.bf16 %v3339_v23, %v3335_v7  ;;  %3483 = vperm.xlu0 %4842, %v3339_v23  }
 0x93b   :  { %3736 = vmatprep.subr.bf16.mxu1 %v3453_v17 }
 0x93c   :  { %3737 = vmatpush1.bf16.msra.mxu1 %v3452_v57 }
 0x953   :  { %v3343_v40 = vpop.f32.mrb[44].mxu1 }
 0x954   :  { %v3345_v30 = vpop.f32.mrb[45].mxu1 }
 0x955   :  { %3488 = vperm.xlu1 %4843, %v3345_v30   ;;  %v3347_v15 = vpop.f32.mrb[46].mxu1 }
 0x956   :  { %v3454_v34 = vpack.c.bf16 %v3347_v15, %v3343_v40  ;;  %v3349_v44 = vpop.f32.mrb[47].mxu1 }
 0x957   :  { %v3455_v54 = vpack.c.bf16 %v3349_v44, %v3345_v30  ;;  %3493 = vperm.xlu0 %4842, %v3349_v44  }
 0x959   :  { %3738 = vmatprep.subr.bf16.mxu1 %v3455_v54  ;;  %v4356_v54 = vld [vmem:[%s7393_s1 + $0x10] sm:$0xff]  }
 0x95a   :  { %3739 = vmatpush1.bf16.msra.mxu1 %v3454_v34 }
 0x95b   :  { %v3353_v37 = vpop.f32.mrb[48].mxu1 }
 0x95c   :  { %v3355_v49 = vpop.f32.mrb[49].mxu1 }
 0x95d   :  { %3498 = vperm.xlu1 %4843, %v3355_v49   ;;  %v3357_v50 = vpop.f32.mrb[50].mxu1 }
 0x95e   :  { %v3456_v28 = vpack.c.bf16 %v3357_v50, %v3353_v37  ;;  %v3359_v19 = vpop.f32.mrb[51].mxu1 }
 0x95f   :  { %v3457_v63 = vpack.c.bf16 %v3359_v19, %v3355_v49  ;;  %3503 = vperm.xlu0 %4842, %v3359_v19   ;;  %v4319_v19 = vunpack.c.l.bf16 %v4356_v54 }
 0x961   :  { %3740 = vmatprep.subr.bf16.mxu1 %v3457_v63 }
 0x962   :  { %3741 = vmatpush1.bf16.msra.mxu1 %v3456_v28 }
 0x973   :  { %v3363_v2 = vpop.f32.mrb[52].mxu1 }
 0x974   :  { %v3365_v46 = vpop.f32.mrb[53].mxu1 }
 0x975   :  { %3508 = vperm.xlu1 %4843, %v3365_v46   ;;  %v3367_v8 = vpop.f32.mrb[54].mxu1 }
 0x976   :  { %v3458_v33 = vpack.c.bf16 %v3367_v8, %v3363_v2  ;;  %v3369_v6 = vpop.f32.mrb[55].mxu1 }
 0x977   :  { %v3459_v38 = vpack.c.bf16 %v3369_v6, %v3365_v46  ;;  %3513 = vperm.xlu0 %4842, %v3369_v6   ;;  %v4320_v46 = vunpack.c.h.bf16 %v4356_v54 }
 0x979   :  { %3742 = vmatprep.subr.bf16.mxu1 %v3459_v38  ;;  %v4357_v38 = vld [vmem:[%s7393_s1 + $0x18] sm:$0xff]  }
 0x97a   :  { %3743 = vmatpush1.bf16.msra.mxu1 %v3458_v33 }
 0x97b   :  { %v3373_v11 = vpop.f32.mrb[56].mxu1 }
 0x97c   :  { %v3375_v21 = vpop.f32.mrb[57].mxu1 }
 0x97d   :  { %3518 = vperm.xlu1 %4843, %v3375_v21   ;;  %v3377_v41 = vpop.f32.mrb[58].mxu1 }
 0x97e   :  { %v3460_v25 = vpack.c.bf16 %v3377_v41, %v3373_v11  ;;  %v3379_v12 = vpop.f32.mrb[59].mxu1 }
 0x97f   :  { %v3461_v53 = vpack.c.bf16 %v3379_v12, %v3375_v21  ;;  %3523 = vperm.xlu0 %4842, %v3379_v12  }
 0x981   :  { %3744 = vmatprep.subr.bf16.mxu1 %v3461_v53  ;;  %v4323_v53 = vunpack.c.l.bf16 %v4357_v38 }
 0x982   :  { %3745 = vmatpush1.bf16.msra.mxu1 %v3460_v25 }
 0x991   :  { %v3383_v58 = vpop.f32.mrb[60].mxu1 }
 0x992   :  { %v3385_v62 = vpop.f32.mrb[61].mxu1 }
 0x993   :  { %3528 = vperm.xlu1 %4843, %v3385_v62   ;;  %v3387_v3 = vpop.f32.mrb[62].mxu1 }
 0x994   :  { %v3462_v20 = vpack.c.bf16 %v3387_v3, %v3383_v58  ;;  %v3389_v22 = vpop.f32.mrb[63].mxu1  ;;  %v4324_v3 = vunpack.c.h.bf16 %v4357_v38 }
 0x995   :  { %v3463_v5 = vpack.c.bf16 %v3389_v22, %v3385_v62  ;;  %3533 = vperm.xlu0 %4842, %v3389_v22  }
 0x997   :  { %3746 = vmatprep.subr.bf16.mxu1 %v3463_v5 }
 0x998   :  { %3747 = vmatpush1.bf16.msra.mxu1 %v3462_v20 }
 0x999   :  { %v3393_v51 = vpop.f32.mrb[64].mxu1 }
 0x99a   :  { %v3395_v10 = vpop.f32.mrb[65].mxu1 }
 0x99b   :  { %3538 = vperm.xlu1 %4843, %v3395_v10   ;;  %v3397_v39 = vpop.f32.mrb[66].mxu1 }
 0x99c   :  { %v3464_v42 = vpack.c.bf16 %v3397_v39, %v3393_v51  ;;  %v3399_v36 = vpop.f32.mrb[67].mxu1 }
 0x99d   :  { %v3465_v0 = vpack.c.bf16 %v3399_v36, %v3395_v10  ;;  %3543 = vperm.xlu0 %4842, %v3399_v36   ;;  %v4358_v10 = vld [vmem:[%s7393_s1 + $0x20] sm:$0xff]  }
 0x99f   :  { %3748 = vmatprep.subr.bf16.mxu1 %v3465_v0  ;;  %4845 = vset.pattern.permute.xlu1 %v5344_v61 }
 0x9a0   :  { %3749 = vmatpush1.bf16.msra.mxu1 %v3464_v42  ;;  %v3444_v45 = vpop.f32.mrb[84].mxu0 }
 0x9a1   :  { %v4783_v56 = vpop.f32.mrb[85].mxu0  ;;  %4844 = vset.pattern.permute.xlu0 %v5344_v61  ;;  %v7062_v16 = vrot.slane %v3444_v45, %v7608_v35  ;;  %v4355_v35 = vld [vmem:[%s7393_s1 + $0x8] sm:$0xff]   ;;  %v4327_v45 = vunpack.c.l.bf16 %v4358_v10 }
 0x9a2   :  { %v3447_v29 = vpop.f32.mrb[86].mxu0  ;;  %v4315_v7 = vunpack.c.l.bf16 %v4355_v35  ;;  %v4316_v15 = vunpack.c.h.bf16 %v4355_v35 }
 0x9a3   :  { %v4784_v14 = vpop.f32.mrb[87].mxu0 }
 0x9a4   :  { %v4328_v14 = vunpack.c.h.bf16 %v4358_v10 }
 0x9ae   :  { %v3469_v24 = vpop.permute.xlu0 %3468 }
 0x9af   :  { %v3550_v9 = vadd.f32 %v7062_v16, %v3469_v24 }
 0x9b0   :  { %v3474_v55 = vpop.permute.xlu1 %3473 }
 0x9b1   :  { %v3551_v13 = vadd.f32 %v7062_v16, %v3474_v55  ;;  %v3566_v43 = vmul.f32 0.2, %v3550_v9 }
 0x9b3   :  { %v3567_v32 = vmul.f32 0.2, %v3551_v13  ;;  %v3582_v60 = vmax.f32 %v3550_v9, %v3566_v43 }
 0x9b5   :  { %v3583_v31 = vmax.f32 %v3551_v13, %v3567_v32  ;;  %v7077_v40 = vadd.f32 %v4311_v1, %v3582_v60  ;;  %v4359_v13 = vld [vmem:[%s7393_s1 + $0x28] sm:$0xff]  }
 0x9b6   :  { %v3479_v4 = vpop.permute.xlu1 %3478 }
 0x9b7   :  { %v3552_v26 = vadd.f32 %v7062_v16, %v3479_v4  ;;  %v7074_v48 = vadd.f32 %v4312_v18, %v3583_v31  ;;  %v4331_v18 = vunpack.c.l.bf16 %v4359_v13 }
 0x9b8   :  { %v3484_v47 = vpop.permute.xlu0 %3483 }
 0x9b9   :  { %v3568_v52 = vmul.f32 0.2, %v3552_v26  ;;  %v3553_v27 = vadd.f32 %v7062_v16, %v3484_v47  ;;  %v4332_v47 = vunpack.c.h.bf16 %v4359_v13 }
 0x9bb   :  { %v3584_v57 = vmax.f32 %v3552_v26, %v3568_v52  ;;  %v3569_v23 = vmul.f32 0.2, %v3553_v27 }
 0x9bc   :  { %3648 = vmax.xlane.f32.xlu0 %v7074_v48 }
 0x9bd   :  { %v3585_v17 = vmax.f32 %v3553_v27, %v3569_v23  ;;  %v7079_v30 = vadd.f32 %v4315_v7, %v3584_v57  ;;  %v4360_v7 = vld [vmem:[%s7393_s1 + $0x30] sm:$0xff]  }
 0x9bf   :  { %3646 = vmax.xlane.f32.xlu1 %v7077_v40  ;;  %v7083_v34 = vadd.f32 %v4316_v15, %v3585_v17 }
 0x9c0   :  { %3650 = vmax.xlane.f32.xlu0 %v7079_v30 }
 0x9c3   :  { %3652 = vmax.xlane.f32.xlu1 %v7083_v34 }
 0x9d4   :  { %v3489_v44 = vpop.permute.xlu1 %3488 }
 0x9d5   :  { %v3554_v37 = vadd.f32 %v7062_v16, %v3489_v44  ;;  %v4335_v44 = vunpack.c.l.bf16 %v4360_v7 }
 0x9d6   :  { %v3494_v49 = vpop.permute.xlu0 %3493 }
 0x9d7   :  { %v3570_v50 = vmul.f32 0.2, %v3554_v37  ;;  %v3555_v28 = vadd.f32 %v7062_v16, %v3494_v49  ;;  %v4336_v49 = vunpack.c.h.bf16 %v4360_v7 }
 0x9d9   :  { %v3586_v63 = vmax.f32 %v3554_v37, %v3570_v50  ;;  %v3571_v2 = vmul.f32 0.2, %v3555_v28 }
 0x9db   :  { %v3587_v8 = vmax.f32 %v3555_v28, %v3571_v2  ;;  %v7091_v33 = vadd.f32 %v4319_v19, %v3586_v63  ;;  %v4361_v63 = vld [vmem:[%s7393_s1 + $0x38] sm:$0xff]  }
 0x9dc   :  { %v3499_v6 = vpop.permute.xlu1 %3498 }
 0x9dd   :  { %v3556_v11 = vadd.f32 %v7062_v16, %v3499_v6  ;;  %3654 = vmax.xlane.f32.xlu0 %v7091_v33  ;;  %v7098_v21 = vadd.f32 %v4320_v46, %v3587_v8 }
 0x9de   :  { %v3504_v41 = vpop.permute.xlu0 %3503 }
 0x9df   :  { %v3572_v25 = vmul.f32 0.2, %v3556_v11  ;;  %v3557_v12 = vadd.f32 %v7062_v16, %v3504_v41  ;;  %3656 = vmax.xlane.f32.xlu1 %v7098_v21 }
 0x9e1   :  { %v3588_v58 = vmax.f32 %v3556_v11, %v3572_v25  ;;  %v3573_v62 = vmul.f32 0.2, %v3557_v12  ;;  %v4339_v11 = vunpack.c.l.bf16 %v4361_v63 }
 0x9e3   :  { %v3589_v20 = vmax.f32 %v3557_v12, %v3573_v62  ;;  %v7102_v22 = vadd.f32 %v4323_v53, %v3588_v58  ;;  %v4340_v12 = vunpack.c.h.bf16 %v4361_v63 }
 0x9e5   :  { %3658 = vmax.xlane.f32.xlu0 %v7102_v22  ;;  %v7105_v5 = vadd.f32 %v4324_v3, %v3589_v20 }
 0x9e7   :  { %3660 = vmax.xlane.f32.xlu1 %v7105_v5 }
 0x9f4   :  { %v3509_v51 = vpop.permute.xlu1 %3508 }
 0x9f5   :  { %v3558_v39 = vadd.f32 %v7062_v16, %v3509_v51 }
 0x9f6   :  { %v3514_v42 = vpop.permute.xlu0 %3513 }
 0x9f7   :  { %v3574_v36 = vmul.f32 0.2, %v3558_v39  ;;  %v3559_v0 = vadd.f32 %v7062_v16, %v3514_v42 }
 0x9f9   :  { %v3590_v56 = vmax.f32 %v3558_v39, %v3574_v36  ;;  %v3575_v29 = vmul.f32 0.2, %v3559_v0 }
 0x9fb   :  { %v3591_v24 = vmax.f32 %v3559_v0, %v3575_v29  ;;  %v7113_v55 = vadd.f32 %v4327_v45, %v3590_v56 }
 0x9fc   :  { %v3519_v9 = vpop.permute.xlu1 %3518 }
 0x9fd   :  { %v3560_v32 = vadd.f32 %v7062_v16, %v3519_v9  ;;  %3662 = vmax.xlane.f32.xlu0 %v7113_v55  ;;  %v7120_v43 = vadd.f32 %v4328_v14, %v3591_v24 }
 0x9fe   :  { %v3524_v59 = vpop.permute.xlu0 %3523 }
 0x9ff   :  { %v3576_v31 = vmul.f32 0.2, %v3560_v32  ;;  %v3561_v4 = vadd.f32 %v7062_v16, %v3524_v59  ;;  %3664 = vmax.xlane.f32.xlu1 %v7120_v43 }
 0xa01   :  { %v3592_v35 = vmax.f32 %v3560_v32, %v3576_v31  ;;  %v3577_v26 = vmul.f32 0.2, %v3561_v4 }
 0xa03   :  { %v3593_v1 = vmax.f32 %v3561_v4, %v3577_v26  ;;  %v7124_v60 = vadd.f32 %v4331_v18, %v3592_v35 }
 0xa05   :  { %3666 = vmax.xlane.f32.xlu0 %v7124_v60  ;;  %v7127_v52 = vadd.f32 %v4332_v47, %v3593_v1 }
 0xa07   :  { %3668 = vmax.xlane.f32.xlu1 %v7127_v52 }
 0xa12   :  { %v3529_v27 = vpop.permute.xlu1 %3528 }
 0xa13   :  { %v3562_v57 = vadd.f32 %v7062_v16, %v3529_v27 }
 0xa14   :  { %v3534_v23 = vpop.permute.xlu0 %3533 }
 0xa15   :  { %v3578_v17 = vmul.f32 0.2, %v3562_v57  ;;  %v3563_v15 = vadd.f32 %v7062_v16, %v3534_v23 }
 0xa17   :  { %v3594_v54 = vmax.f32 %v3562_v57, %v3578_v17  ;;  %v3579_v37 = vmul.f32 0.2, %v3563_v15 }
 0xa19   :  { %v3595_v50 = vmax.f32 %v3563_v15, %v3579_v37  ;;  %v7135_v28 = vadd.f32 %v4335_v44, %v3594_v54 }
 0xa1a   :  { %v3539_v19 = vpop.permute.xlu1 %3538 }
 0xa1b   :  { %v3564_v2 = vadd.f32 %v7062_v16, %v3539_v19  ;;  %3670 = vmax.xlane.f32.xlu0 %v7135_v28  ;;  %v7142_v46 = vadd.f32 %v4336_v49, %v3595_v50 }
 0xa1c   :  { %v3544_v8 = vpop.permute.xlu0 %3543 }
 0xa1d   :  { %v3580_v6 = vmul.f32 0.2, %v3564_v2  ;;  %v3565_v38 = vadd.f32 %v7062_v16, %v3544_v8  ;;  %3672 = vmax.xlane.f32.xlu1 %v7142_v46 }
 0xa1f   :  { %v3596_v41 = vmax.f32 %v3564_v2, %v3580_v6  ;;  %v3581_v25 = vmul.f32 0.2, %v3565_v38 }
 0xa21   :  { %v3597_v53 = vmax.f32 %v3565_v38, %v3581_v25  ;;  %v7146_v58 = vadd.f32 %v4339_v11, %v3596_v41 }
 0xa23   :  { %3674 = vmax.xlane.f32.xlu0 %v7146_v58  ;;  %v7149_v62 = vadd.f32 %v4340_v12, %v3597_v53 }
 0xa25   :  { %3676 = vmax.xlane.f32.xlu1 %v7149_v62 }
 0xa49   :  { %v3649_v3 = vpop.xlane.xlu0 %3648 }
 0xa4a   :  { %v3679_v20 = vsub.f32 %v7074_v48, %v3649_v3 }
 0xa4c   :  { %v3696_v51 = vmul.f32 1.442695, %v3679_v20  ;;  %v3647_v16 = vpop.xlane.xlu1 %3646 }
 0xa4d   :  { %v3678_v10 = vsub.f32 %v7077_v40, %v3647_v16  ;;  %v3651_v39 = vpop.xlane.xlu0 %3650 }
 0xa4e   :  { %5208 = vpow2.f32 %v3696_v51  ;;  %v3680_v0 = vsub.f32 %v7079_v30, %v3651_v39 }
 0xa4f   :  { %v3694_v42 = vmul.f32 1.442695, %v3678_v10 }
 0xa50   :  { %v3653_v36 = vpop.xlane.xlu1 %3652  ;;  %v3698_v29 = vmul.f32 1.442695, %v3680_v0 }
 0xa51   :  { %5210 = vpow2.f32 %v3694_v42  ;;  %v3681_v45 = vsub.f32 %v7083_v34, %v3653_v36 }
 0xa53   :  { %v3700_v56 = vmul.f32 1.442695, %v3681_v45 }
 0xa55   :  { %5212 = vpow2.f32 %v3700_v56 }
 0xa56   :  { %5214 = vpow2.f32 %v3698_v29 }
 0xa58   :  { %v5209_v14 = vpop.eup %5208 }
 0xa5b   :  { %v5211_v24 = vpop.eup %5210 }
 0xa5c   :  { %v3726_v48 = vpack.c.bf16 %v5209_v14, %v5211_v24 }
 0xa5e   :  { %3767 = vmatmul.mubr.bf16.vlgmr.msra.gmra.mrb[68].mxu1 %v3726_v48 }
 0xa5f   :  { %3776 = vmatprep.mubr.bf16.mxu1 %v5344_v61  ;;  %v5213_v40 = vpop.eup %5212 }
 0xa60   :  { %v5215_v9 = vpop.eup %5214 }
 0xa61   :  { %v3727_v13 = vpack.c.bf16 %v5213_v40, %v5215_v9 }
 0xa66   :  { %3777 = vmatmul.mubr.bf16.gmra.mrb[72].mxu1 %v3727_v13 }
 0xa67   :  { %3786 = vmatprep.mubr.bf16.mxu1 %v5344_v61 }
 0xa6a   :  { %v3655_v32 = vpop.xlane.xlu0 %3654 }
 0xa6b   :  { %v3682_v30 = vsub.f32 %v7091_v33, %v3655_v32 }
 0xa6c   :  { %v3657_v34 = vpop.xlane.xlu1 %3656 }
 0xa6d   :  { %v3702_v59 = vmul.f32 1.442695, %v3682_v30  ;;  %v3683_v31 = vsub.f32 %v7098_v21, %v3657_v34 }
 0xa6f   :  { %v3704_v4 = vmul.f32 1.442695, %v3683_v31  ;;  %5216 = vpow2.f32 %v3702_v59 }
 0xa71   :  { %5218 = vpow2.f32 %v3704_v4 }
 0xa72   :  { %v3659_v18 = vpop.xlane.xlu0 %3658 }
 0xa73   :  { %v3684_v35 = vsub.f32 %v7102_v22, %v3659_v18 }
 0xa74   :  { %v3661_v26 = vpop.xlane.xlu1 %3660 }
 0xa75   :  { %v3706_v47 = vmul.f32 1.442695, %v3684_v35  ;;  %v3685_v1 = vsub.f32 %v7105_v5, %v3661_v26 }
 0xa77   :  { %v3708_v27 = vmul.f32 1.442695, %v3685_v1  ;;  %5220 = vpow2.f32 %v3706_v47 }
 0xa79   :  { %5222 = vpow2.f32 %v3708_v27  ;;  %v5217_v7 = vpop.eup %5216 }
 0xa7b   :  { %v5219_v57 = vpop.eup %5218 }
 0xa7c   :  { %v3728_v33 = vpack.c.bf16 %v5219_v57, %v5217_v7 }
 0xa7e   :  { %3787 = vmatmul.mubr.bf16.gmra.mrb[76].mxu1 %v3728_v33 }
 0xa7f   :  { %3796 = vmatprep.mubr.bf16.mxu1 %v5344_v61 }
 0xa81   :  { %v5221_v21 = vpop.eup %5220 }
 0xa83   :  { %v5223_v23 = vpop.eup %5222 }
 0xa84   :  { %v3729_v17 = vpack.c.bf16 %v5223_v23, %v5221_v21 }
 0xa86   :  { %3797 = vmatmul.mubr.bf16.gmra.mrb[80].mxu1 %v3729_v17 }
 0xa87   :  { %3806 = vmatprep.mubr.bf16.mxu1 %v5344_v61 }
 0xa8a   :  { %v3663_v22 = vpop.xlane.xlu0 %3662 }
 0xa8b   :  { %v3686_v15 = vsub.f32 %v7113_v55, %v3663_v22 }
 0xa8c   :  { %v3665_v44 = vpop.xlane.xlu1 %3664 }
 0xa8d   :  { %v3710_v5 = vmul.f32 1.442695, %v3686_v15  ;;  %v3687_v54 = vsub.f32 %v7120_v43, %v3665_v44 }
 0xa8f   :  { %v3712_v37 = vmul.f32 1.442695, %v3687_v54  ;;  %5224 = vpow2.f32 %v3710_v5 }
 0xa91   :  { %5226 = vpow2.f32 %v3712_v37 }
 0xa92   :  { %v3667_v49 = vpop.xlane.xlu0 %3666 }
 0xa93   :  { %v3688_v50 = vsub.f32 %v7124_v60, %v3667_v49 }
 0xa94   :  { %v3669_v19 = vpop.xlane.xlu1 %3668 }
 0xa95   :  { %v3714_v63 = vmul.f32 1.442695, %v3688_v50  ;;  %v3689_v2 = vsub.f32 %v7127_v52, %v3669_v19 }
 0xa97   :  { %v3716_v8 = vmul.f32 1.442695, %v3689_v2  ;;  %5228 = vpow2.f32 %v3714_v63 }
 0xa99   :  { %5230 = vpow2.f32 %v3716_v8  ;;  %v5225_v6 = vpop.eup %5224 }
 0xa9b   :  { %v5227_v38 = vpop.eup %5226 }
 0xa9c   :  { %v3730_v55 = vpack.c.bf16 %v5227_v38, %v5225_v6 }
 0xa9e   :  { %3807 = vmatmul.mubr.bf16.gmra.mrb[84].mxu1 %v3730_v55 }
 0xa9f   :  { %3816 = vmatprep.mubr.bf16.mxu1 %v5344_v61 }
 0xaa1   :  { %v5229_v43 = vpop.eup %5228 }
 0xaa3   :  { %v5231_v11 = vpop.eup %5230 }
 0xaa4   :  { %v3731_v41 = vpack.c.bf16 %v5231_v11, %v5229_v43 }
 0xaa6   :  { %3817 = vmatmul.mubr.bf16.gmra.mrb[88].mxu1 %v3731_v41 }
 0xaa7   :  { %3826 = vmatprep.mubr.bf16.mxu1 %v5344_v61 }
 0xaa8   :  { %v3671_v60 = vpop.xlane.xlu0 %3670 }
 0xaa9   :  { %v3690_v25 = vsub.f32 %v7135_v28, %v3671_v60 }
 0xaaa   :  { %v3673_v12 = vpop.xlane.xlu1 %3672 }
 0xaab   :  { %v3718_v52 = vmul.f32 1.442695, %v3690_v25  ;;  %v3691_v53 = vsub.f32 %v7142_v46, %v3673_v12 }
 0xaad   :  { %v3720_v3 = vmul.f32 1.442695, %v3691_v53  ;;  %5232 = vpow2.f32 %v3718_v52 }
 0xaaf   :  { %5234 = vpow2.f32 %v3720_v3 }
 0xab0   :  { %v3675_v20 = vpop.xlane.xlu0 %3674 }
 0xab1   :  { %v3692_v51 = vsub.f32 %v7146_v58, %v3675_v20 }
 0xab2   :  { %v3677_v16 = vpop.xlane.xlu1 %3676 }
 0xab3   :  { %v3722_v10 = vmul.f32 1.442695, %v3692_v51  ;;  %v3693_v39 = vsub.f32 %v7149_v62, %v3677_v16 }
 0xab5   :  { %v3724_v42 = vmul.f32 1.442695, %v3693_v39  ;;  %5236 = vpow2.f32 %v3722_v10 }
 0xab7   :  { %5238 = vpow2.f32 %v3724_v42  ;;  %v5233_v36 = vpop.eup %5232 }
 0xab9   :  { %v5235_v0 = vpop.eup %5234 }
 0xaba   :  { %v3732_v28 = vpack.c.bf16 %v5235_v0, %v5233_v36 }
 0xabc   :  { %3827 = vmatmul.mubr.bf16.gmra.mrb[92].mxu1 %v3732_v28 }
 0xabd   :  { %3836 = vmatprep.mubr.bf16.mxu1 %v5344_v61 }
 0xabf   :  { %v5237_v46 = vpop.eup %5236 }
 0xac1   :  { %v5239_v45 = vpop.eup %5238 }
 0xac2   :  { %v3733_v56 = vpack.c.bf16 %v5239_v45, %v5237_v46 }
 0xac4   :  { %3837 = vmatmul.mubr.bf16.gmra.mrb[96].mxu1 %v3733_v56 }
 0xb31   :  { %v7175_v29 = vpop.f32.mrb[68].mxu1 }
 0xb32   :  { %v3770_v58 = vpop.f32.mrb[69].mxu1 }
 0xb33   :  { %5240 = vrcp.f32 %v3770_v58  ;;  %v7177_v14 = vpop.f32.mrb[70].mxu1 }
 0xb34   :  { %v3774_v62 = vpop.f32.mrb[71].mxu1 }
 0xb35   :  { %5242 = vrcp.f32 %v3774_v62 }
 0xb39   :  { %v7179_v24 = vpop.f32.mrb[72].mxu1 }
 0xb3a   :  { %v3780_v48 = vpop.f32.mrb[73].mxu1 }
 0xb3b   :  { %5244 = vrcp.f32 %v3780_v48  ;;  %v7181_v40 = vpop.f32.mrb[74].mxu1 }
 0xb3c   :  { %v3784_v9 = vpop.f32.mrb[75].mxu1 }
 0xb3d   :  { %v5241_v61 = vpop.eup %5240  ;;  %5246 = vrcp.f32 %v3784_v9 }
 0xb3e   :  { %v3863_v13 = vmul.f32 %v5241_v61, %v3770_v58 }
 0xb3f   :  { %v5243_v32 = vpop.eup %5242 }
 0xb40   :  { %v3879_v30 = vsub.f32 2.0, %v3863_v13  ;;  %v3864_v34 = vmul.f32 %v5243_v32, %v3774_v62 }
 0xb42   :  { %v3895_v59 = vmul.f32 %v5241_v61, %v3879_v30  ;;  %v3880_v31 = vsub.f32 2.0, %v3864_v34 }
 0xb44   :  { %v3896_v4 = vmul.f32 %v5243_v32, %v3880_v31  ;;  %3913 = vperm.xlu0 %4844, %v3895_v59  }
 0xb45   :  { %v5245_v18 = vpop.eup %5244 }
 0xb46   :  { %v3865_v35 = vmul.f32 %v5245_v18, %v3780_v48  ;;  %3918 = vperm.xlu1 %4845, %v3896_v4  }
 0xb47   :  { %v5247_v26 = vpop.eup %5246 }
 0xb48   :  { %v3881_v47 = vsub.f32 2.0, %v3865_v35  ;;  %v3866_v1 = vmul.f32 %v5247_v26, %v3784_v9 }
 0xb4a   :  { %v3897_v27 = vmul.f32 %v5245_v18, %v3881_v47  ;;  %v3882_v7 = vsub.f32 2.0, %v3866_v1 }
 0xb4c   :  { %3923 = vperm.xlu1 %4845, %v3897_v27   ;;  %v3898_v57 = vmul.f32 %v5247_v26, %v3882_v7 }
 0xb50   :  { %3928 = vperm.xlu1 %4845, %v3898_v57  }
 0xb51   :  { %v7183_v33 = vpop.f32.mrb[76].mxu1 }
 0xb52   :  { %v3790_v21 = vpop.f32.mrb[77].mxu1 }
 0xb53   :  { %5248 = vrcp.f32 %v3790_v21  ;;  %v7185_v23 = vpop.f32.mrb[78].mxu1 }
 0xb54   :  { %v3794_v17 = vpop.f32.mrb[79].mxu1 }
 0xb55   :  { %5250 = vrcp.f32 %v3794_v17 }
 0xb59   :  { %v7187_v22 = vpop.f32.mrb[80].mxu1 }
 0xb5a   :  { %v3800_v15 = vpop.f32.mrb[81].mxu1 }
 0xb5b   :  { %5252 = vrcp.f32 %v3800_v15  ;;  %v7189_v44 = vpop.f32.mrb[82].mxu1 }
 0xb5c   :  { %v3804_v5 = vpop.f32.mrb[83].mxu1 }
 0xb5d   :  { %v5249_v54 = vpop.eup %5248  ;;  %5254 = vrcp.f32 %v3804_v5 }
 0xb5e   :  { %v3867_v37 = vmul.f32 %v5249_v54, %v3790_v21 }
 0xb5f   :  { %v5251_v49 = vpop.eup %5250 }
 0xb60   :  { %v3883_v50 = vsub.f32 2.0, %v3867_v37  ;;  %v3868_v19 = vmul.f32 %v5251_v49, %v3794_v17 }
 0xb62   :  { %v3899_v63 = vmul.f32 %v5249_v54, %v3883_v50  ;;  %v3884_v2 = vsub.f32 2.0, %v3868_v19 }
 0xb64   :  { %3933 = vperm.xlu1 %4845, %v3899_v63   ;;  %v3900_v6 = vmul.f32 %v5251_v49, %v3884_v2 }
 0xb65   :  { %v5253_v8 = vpop.eup %5252 }
 0xb66   :  { %v3869_v38 = vmul.f32 %v5253_v8, %v3800_v15 }
 0xb67   :  { %v5255_v55 = vpop.eup %5254 }
 0xb68   :  { %v3885_v43 = vsub.f32 2.0, %v3869_v38  ;;  %v3870_v11 = vmul.f32 %v5255_v55, %v3804_v5  ;;  %3938 = vperm.xlu1 %4845, %v3900_v6   ;;  %v4244_v6 = vld [vmem:[%s7394_s4 + $0x2] ss:$0 sm:$0xff] }
 0xb6a   :  { %v3901_v41 = vmul.f32 %v5253_v8, %v3885_v43  ;;  %v3886_v60 = vsub.f32 2.0, %v3870_v11 }
 0xb6c   :  { %3943 = vperm.xlu1 %4845, %v3901_v41   ;;  %v3902_v25 = vmul.f32 %v5255_v55, %v3886_v60 }
 0xb70   :  { %3948 = vperm.xlu1 %4845, %v3902_v25  }
 0xb71   :  { %v7191_v12 = vpop.f32.mrb[84].mxu1 }
 0xb72   :  { %v3810_v52 = vpop.f32.mrb[85].mxu1 }
 0xb73   :  { %5256 = vrcp.f32 %v3810_v52  ;;  %v7193_v53 = vpop.f32.mrb[86].mxu1 }
 0xb74   :  { %v3814_v3 = vpop.f32.mrb[87].mxu1 }
 0xb75   :  { %5258 = vrcp.f32 %v3814_v3 }
 0xb79   :  { %v7195_v20 = vpop.f32.mrb[88].mxu1 }
 0xb7a   :  { %v3820_v51 = vpop.f32.mrb[89].mxu1 }
 0xb7b   :  { %5260 = vrcp.f32 %v3820_v51  ;;  %v7197_v16 = vpop.f32.mrb[90].mxu1 }
 0xb7c   :  { %v3824_v10 = vpop.f32.mrb[91].mxu1 }
 0xb7d   :  { %v5257_v39 = vpop.eup %5256  ;;  %5262 = vrcp.f32 %v3824_v10 }
 0xb7e   :  { %v3871_v42 = vmul.f32 %v5257_v39, %v3810_v52 }
 0xb7f   :  { %v5259_v36 = vpop.eup %5258 }
 0xb80   :  { %v3887_v0 = vsub.f32 2.0, %v3871_v42  ;;  %v3872_v28 = vmul.f32 %v5259_v36, %v3814_v3 }
 0xb82   :  { %v3903_v46 = vmul.f32 %v5257_v39, %v3887_v0  ;;  %v3888_v45 = vsub.f32 2.0, %v3872_v28 }
 0xb84   :  { %v3904_v56 = vmul.f32 %v5259_v36, %v3888_v45  ;;  %3953 = vperm.xlu0 %4844, %v3903_v46  }
 0xb85   :  { %v5261_v58 = vpop.eup %5260 }
 0xb86   :  { %v3873_v62 = vmul.f32 %v5261_v58, %v3820_v51  ;;  %3958 = vperm.xlu1 %4845, %v3904_v56  }
 0xb87   :  { %v5263_v48 = vpop.eup %5262 }
 0xb88   :  { %v3889_v9 = vsub.f32 2.0, %v3873_v62  ;;  %v3874_v61 = vmul.f32 %v5263_v48, %v3824_v10 }
 0xb8a   :  { %v3905_v13 = vmul.f32 %v5261_v58, %v3889_v9  ;;  %v3890_v32 = vsub.f32 2.0, %v3874_v61 }
 0xb8c   :  { %v3906_v30 = vmul.f32 %v5263_v48, %v3890_v32  ;;  %3963 = vperm.xlu0 %4844, %v3905_v13  }
 0xb8e   :  { %3968 = vperm.xlu1 %4845, %v3906_v30  }
 0xb8f   :  { %v7199_v34 = vpop.f32.mrb[92].mxu1 }
 0xb90   :  { %v3830_v59 = vpop.f32.mrb[93].mxu1 }
 0xb91   :  { %5264 = vrcp.f32 %v3830_v59  ;;  %v7201_v31 = vpop.f32.mrb[94].mxu1 }
 0xb92   :  { %v3834_v4 = vpop.f32.mrb[95].mxu1 }
 0xb93   :  { %5266 = vrcp.f32 %v3834_v4 }
 0xb97   :  { %v7203_v18 = vpop.f32.mrb[96].mxu1 }
 0xb98   :  { %v3840_v35 = vpop.f32.mrb[97].mxu1 }
 0xb99   :  { %5268 = vrcp.f32 %v3840_v35  ;;  %v7205_v26 = vpop.f32.mrb[98].mxu1 }
 0xb9a   :  { %v3844_v47 = vpop.f32.mrb[99].mxu1 }
 0xb9b   :  { %v5265_v1 = vpop.eup %5264  ;;  %5270 = vrcp.f32 %v3844_v47 }
 0xb9c   :  { %v3875_v27 = vmul.f32 %v5265_v1, %v3830_v59 }
 0xb9d   :  { %v5267_v7 = vpop.eup %5266 }
 0xb9e   :  { %v3891_v57 = vsub.f32 2.0, %v3875_v27  ;;  %v3876_v21 = vmul.f32 %v5267_v7, %v3834_v4 }
 0xba0   :  { %v3907_v17 = vmul.f32 %v5265_v1, %v3891_v57  ;;  %v3892_v15 = vsub.f32 2.0, %v3876_v21 }
 0xba2   :  { %v3908_v5 = vmul.f32 %v5267_v7, %v3892_v15  ;;  %3973 = vperm.xlu0 %4844, %v3907_v17  }
 0xba3   :  { %v5269_v54 = vpop.eup %5268 }
 0xba4   :  { %v3877_v37 = vmul.f32 %v5269_v54, %v3840_v35  ;;  %3978 = vperm.xlu1 %4845, %v3908_v5  }
 0xba5   :  { %v5271_v49 = vpop.eup %5270 }
 0xba6   :  { %v3893_v50 = vsub.f32 2.0, %v3877_v37  ;;  %v3878_v19 = vmul.f32 %v5271_v49, %v3844_v47 }
 0xba8   :  { %v3909_v63 = vmul.f32 %v5269_v54, %v3893_v50  ;;  %v3894_v2 = vsub.f32 2.0, %v3878_v19 }
 0xbaa   :  { %v3910_v8 = vmul.f32 %v5271_v49, %v3894_v2  ;;  %3983 = vperm.xlu0 %4844, %v3909_v63  }
 0xbac   :  { %3988 = vperm.xlu1 %4845, %v3910_v8  }
 0xbc3   :  { %v3914_v38 = vpop.permute.xlu0 %3913 }
 0xbc4   :  { %v3991_v55 = vmul.f32 %v3914_v38, %v7175_v29 }
 0xbc5   :  { %v3919_v11 = vpop.permute.xlu1 %3918 }
 0xbc6   :  { %v7211_v43 = vadd.f32 %v4244_v6, %v3991_v55  ;;  %v3992_v41 = vmul.f32 %v3919_v11, %v7177_v14 }
 0xbc8   :  { %v4013_v52 = vadd.f32 %v4244_v6, %v3992_v41 }
 0xbc9   :  { %4028 = vmax.xlane.f32.xlu0 %v7211_v43 }
 0xbcb   :  { %v3924_v60 = vpop.permute.xlu1 %3923 }
 0xbcc   :  { %v3993_v25 = vmul.f32 %v3924_v60, %v7179_v24 }
 0xbce   :  { %v4014_v3 = vadd.f32 %v4244_v6, %v3993_v25 }
 0xbcf   :  { %v3929_v51 = vpop.permute.xlu1 %3928 }
 0xbd0   :  { %v3994_v10 = vmul.f32 %v3929_v51, %v7181_v40  ;;  %4030 = vmax.xlane.f32.xlu1 %v4013_v52  ;;  %4032 = vmax.xlane.f32.xlu0 %v4014_v3 }
 0xbd2   :  { %v4015_v39 = vadd.f32 %v4244_v6, %v3994_v10 }
 0xbd4   :  { %4034 = vmax.xlane.f32.xlu0 %v4015_v39 }
 0xbe3   :  { %v3934_v29 = vpop.permute.xlu1 %3933 }
 0xbe4   :  { %v3995_v42 = vmul.f32 %v3934_v29, %v7183_v33 }
 0xbe6   :  { %v7218_v36 = vadd.f32 %v4244_v6, %v3995_v42 }
 0xbe7   :  { %v3939_v0 = vpop.permute.xlu1 %3938 }
 0xbe8   :  { %v3996_v14 = vmul.f32 %v3939_v0, %v7185_v23  ;;  %4036 = vmax.xlane.f32.xlu1 %v7218_v36 }
 0xbea   :  { %v7222_v24 = vadd.f32 %v4244_v6, %v3996_v14 }
 0xbeb   :  { %v3944_v28 = vpop.permute.xlu1 %3943 }
 0xbec   :  { %v3997_v46 = vmul.f32 %v3944_v28, %v7187_v22  ;;  %4038 = vmax.xlane.f32.xlu0 %v7222_v24 }
 0xbee   :  { %v7226_v40 = vadd.f32 %v4244_v6, %v3997_v46 }
 0xbef   :  { %v3949_v45 = vpop.permute.xlu1 %3948 }
 0xbf0   :  { %v3998_v56 = vmul.f32 %v3949_v45, %v7189_v44  ;;  %4040 = vmax.xlane.f32.xlu1 %v7226_v40 }
 0xbf2   :  { %v7230_v33 = vadd.f32 %v4244_v6, %v3998_v56 }
 0xbf4   :  { %4042 = vmax.xlane.f32.xlu0 %v7230_v33 }
 0xc03   :  { %v3954_v23 = vpop.permute.xlu0 %3953 }
 0xc04   :  { %v3999_v58 = vmul.f32 %v3954_v23, %v7191_v12 }
 0xc05   :  { %v3959_v62 = vpop.permute.xlu1 %3958 }
 0xc06   :  { %v7234_v48 = vadd.f32 %v4244_v6, %v3999_v58  ;;  %v4000_v22 = vmul.f32 %v3959_v62, %v7193_v53 }
 0xc08   :  { %v7237_v9 = vadd.f32 %v4244_v6, %v4000_v22  ;;  %4044 = vmax.xlane.f32.xlu1 %v7234_v48 }
 0xc0a   :  { %4046 = vmax.xlane.f32.xlu0 %v7237_v9 }
 0xc0b   :  { %v3964_v44 = vpop.permute.xlu0 %3963 }
 0xc0c   :  { %v4001_v61 = vmul.f32 %v3964_v44, %v7195_v20 }
 0xc0d   :  { %v3969_v13 = vpop.permute.xlu1 %3968 }
 0xc0e   :  { %v7242_v32 = vadd.f32 %v4244_v6, %v4001_v61  ;;  %v4002_v30 = vmul.f32 %v3969_v13, %v7197_v16 }
 0xc10   :  { %v7245_v12 = vadd.f32 %v4244_v6, %v4002_v30  ;;  %4048 = vmax.xlane.f32.xlu1 %v7242_v32 }
 0xc12   :  { %4050 = vmax.xlane.f32.xlu0 %v7245_v12 }
 0xc21   :  { %v3974_v53 = vpop.permute.xlu0 %3973 }
 0xc22   :  { %v4003_v59 = vmul.f32 %v3974_v53, %v7199_v34 }
 0xc23   :  { %v3979_v4 = vpop.permute.xlu1 %3978 }
 0xc24   :  { %v7250_v35 = vadd.f32 %v4244_v6, %v4003_v59  ;;  %v4004_v47 = vmul.f32 %v3979_v4, %v7201_v31 }
 0xc26   :  { %v7253_v20 = vadd.f32 %v4244_v6, %v4004_v47  ;;  %4052 = vmax.xlane.f32.xlu1 %v7250_v35 }
 0xc28   :  { %4054 = vmax.xlane.f32.xlu0 %v7253_v20 }
 0xc29   :  { %v3984_v16 = vpop.permute.xlu0 %3983 }
 0xc2a   :  { %v4005_v1 = vmul.f32 %v3984_v16, %v7203_v18 }
 0xc2b   :  { %v3989_v27 = vpop.permute.xlu1 %3988 }
 0xc2c   :  { %v7258_v7 = vadd.f32 %v4244_v6, %v4005_v1  ;;  %v4006_v57 = vmul.f32 %v3989_v27, %v7205_v26 }
 0xc2e   :  { %v7261_v34 = vadd.f32 %v4244_v6, %v4006_v57  ;;  %4056 = vmax.xlane.f32.xlu1 %v7258_v7 }
 0xc30   :  { %4058 = vmax.xlane.f32.xlu0 %v7261_v34 }
 0xc56   :  { %v4029_v31 = vpop.xlane.xlu0 %4028 }
 0xc57   :  { %v7266_v21 = vsub.f32 %v7211_v43, %v4029_v31 }
 0xc59   :  { %v4076_v17 = vmul.f32 1.442695, %v7266_v21 }
 0xc5b   :  { %5272 = vpow2.f32 %v4076_v17 }
 0xc5d   :  { %v4031_v15 = vpop.xlane.xlu1 %4030  ;;  %v4033_v18 = vpop.xlane.xlu0 %4032 }
 0xc5e   :  { %v7269_v5 = vsub.f32 %v4013_v52, %v4031_v15  ;;  %v7271_v54 = vsub.f32 %v4014_v3, %v4033_v18 }
 0xc60   :  { %v4078_v26 = vmul.f32 1.442695, %v7269_v5  ;;  %v4080_v37 = vmul.f32 1.442695, %v7271_v54 }
 0xc61   :  { %v4035_v49 = vpop.xlane.xlu0 %4034 }
 0xc62   :  { %5274 = vpow2.f32 %v4078_v26  ;;  %v7275_v50 = vsub.f32 %v4015_v39, %v4035_v49 }
 0xc63   :  { %5276 = vpow2.f32 %v4080_v37 }
 0xc64   :  { %v4082_v19 = vmul.f32 1.442695, %v7275_v50 }
 0xc65   :  { %v5273_v63 = vpop.eup %5272 }
 0xc66   :  { %5278 = vpow2.f32 %v4082_v19  ;;  %4108 = vadd.xlane.f32.xlu1 %v5273_v63 }
 0xc6c   :  { %v5275_v2 = vpop.eup %5274 }
 0xc6d   :  { %v5277_v8 = vpop.eup %5276  ;;  %4110 = vadd.xlane.f32.xlu0 %v5275_v2 }
 0xc6e   :  { %4112 = vadd.xlane.f32.xlu1 %v5277_v8 }
 0xc70   :  { %v5279_v6 = vpop.eup %5278 }
 0xc71   :  { %4114 = vadd.xlane.f32.xlu0 %v5279_v6 }
 0xc75   :  { %v4037_v38 = vpop.xlane.xlu1 %4036 }
 0xc76   :  { %v7279_v55 = vsub.f32 %v7218_v36, %v4037_v38 }
 0xc78   :  { %v4084_v43 = vmul.f32 1.442695, %v7279_v55 }
 0xc79   :  { %v4039_v11 = vpop.xlane.xlu0 %4038 }
 0xc7a   :  { %5280 = vpow2.f32 %v4084_v43  ;;  %v7283_v41 = vsub.f32 %v7222_v24, %v4039_v11 }
 0xc7c   :  { %v4086_v60 = vmul.f32 1.442695, %v7283_v41 }
 0xc7d   :  { %v4041_v25 = vpop.xlane.xlu1 %4040 }
 0xc7e   :  { %5282 = vpow2.f32 %v4086_v60  ;;  %v7287_v52 = vsub.f32 %v7226_v40, %v4041_v25 }
 0xc80   :  { %v4088_v3 = vmul.f32 1.442695, %v7287_v52 }
 0xc81   :  { %v4043_v51 = vpop.xlane.xlu0 %4042 }
 0xc82   :  { %5284 = vpow2.f32 %v4088_v3  ;;  %v7291_v10 = vsub.f32 %v7230_v33, %v4043_v51 }
 0xc84   :  { %v5281_v39 = vpop.eup %5280  ;;  %v4090_v29 = vmul.f32 1.442695, %v7291_v10 }
 0xc85   :  { %4116 = vadd.xlane.f32.xlu1 %v5281_v39 }
 0xc86   :  { %5286 = vpow2.f32 %v4090_v29 }
 0xc88   :  { %v5283_v42 = vpop.eup %5282 }
 0xc89   :  { %4118 = vadd.xlane.f32.xlu0 %v5283_v42 }
 0xc8c   :  { %v5285_v36 = vpop.eup %5284 }
 0xc8d   :  { %4120 = vadd.xlane.f32.xlu1 %v5285_v36 }
 0xc90   :  { %v5287_v0 = vpop.eup %5286 }
 0xc91   :  { %4122 = vadd.xlane.f32.xlu0 %v5287_v0 }
 0xc95   :  { %v4045_v14 = vpop.xlane.xlu1 %4044 }
 0xc96   :  { %v7295_v24 = vsub.f32 %v7234_v48, %v4045_v14 }
 0xc97   :  { %v4047_v28 = vpop.xlane.xlu0 %4046 }
 0xc98   :  { %v4092_v46 = vmul.f32 1.442695, %v7295_v24  ;;  %v7299_v40 = vsub.f32 %v7237_v9, %v4047_v28 }
 0xc9a   :  { %5288 = vpow2.f32 %v4092_v46  ;;  %v4094_v45 = vmul.f32 1.442695, %v7299_v40 }
 0xc9c   :  { %5290 = vpow2.f32 %v4094_v45 }
 0xc9d   :  { %v4049_v56 = vpop.xlane.xlu1 %4048 }
 0xc9e   :  { %v7303_v33 = vsub.f32 %v7242_v32, %v4049_v56 }
 0xc9f   :  { %v4051_v23 = vpop.xlane.xlu0 %4050 }
 0xca0   :  { %v4096_v58 = vmul.f32 1.442695, %v7303_v33  ;;  %v7307_v62 = vsub.f32 %v7245_v12, %v4051_v23 }
 0xca2   :  { %5292 = vpow2.f32 %v4096_v58  ;;  %v4098_v48 = vmul.f32 1.442695, %v7307_v62 }
 0xca4   :  { %v5289_v22 = vpop.eup %5288  ;;  %5294 = vpow2.f32 %v4098_v48 }
 0xca5   :  { %4124 = vadd.xlane.f32.xlu1 %v5289_v22 }
 0xca6   :  { %v5291_v9 = vpop.eup %5290 }
 0xca7   :  { %4126 = vadd.xlane.f32.xlu0 %v5291_v9 }
 0xcac   :  { %v5293_v44 = vpop.eup %5292 }
 0xcad   :  { %4128 = vadd.xlane.f32.xlu1 %v5293_v44 }
 0xcae   :  { %v5295_v61 = vpop.eup %5294 }
 0xcaf   :  { %4130 = vadd.xlane.f32.xlu0 %v5295_v61 }
 0xcb3   :  { %v4053_v13 = vpop.xlane.xlu1 %4052 }
 0xcb4   :  { %v7311_v32 = vsub.f32 %v7250_v35, %v4053_v13 }
 0xcb5   :  { %v4055_v30 = vpop.xlane.xlu0 %4054 }
 0xcb6   :  { %v4100_v12 = vmul.f32 1.442695, %v7311_v32  ;;  %v7315_v53 = vsub.f32 %v7253_v20, %v4055_v30 }
 0xcb8   :  { %5296 = vpow2.f32 %v4100_v12  ;;  %v4102_v59 = vmul.f32 1.442695, %v7315_v53 }
 0xcba   :  { %5298 = vpow2.f32 %v4102_v59 }
 0xcbb   :  { %v4057_v4 = vpop.xlane.xlu1 %4056 }
 0xcbc   :  { %v7319_v47 = vsub.f32 %v7258_v7, %v4057_v4 }
 0xcbd   :  { %v4059_v16 = vpop.xlane.xlu0 %4058 }
 0xcbe   :  { %v4104_v1 = vmul.f32 1.442695, %v7319_v47  ;;  %v7323_v35 = vsub.f32 %v7261_v34, %v4059_v16 }
 0xcc0   :  { %5300 = vpow2.f32 %v4104_v1  ;;  %v4106_v27 = vmul.f32 1.442695, %v7323_v35 }
 0xcc2   :  { %v5297_v57 = vpop.eup %5296  ;;  %5302 = vpow2.f32 %v4106_v27 }
 0xcc3   :  { %4132 = vadd.xlane.f32.xlu1 %v5297_v57 }
 0xcc4   :  { %v5299_v20 = vpop.eup %5298 }
 0xcc5   :  { %4134 = vadd.xlane.f32.xlu0 %v5299_v20 }
 0xcca   :  { %v5301_v31 = vpop.eup %5300 }
 0xccb   :  { %4136 = vadd.xlane.f32.xlu1 %v5301_v31 }
 0xccc   :  { %v5303_v17 = vpop.eup %5302 }
 0xccd   :  { %4138 = vadd.xlane.f32.xlu0 %v5303_v17 }
 0xcf3   :  { %v4109_v7 = vpop.xlane.xlu1 %4108 }
 0xcf4   :  { %5304 = vlog2.f32 %v4109_v7 }
 0xcfa   :  { %v4111_v15 = vpop.xlane.xlu0 %4110 }
 0xcfb   :  { %v4113_v18 = vpop.xlane.xlu1 %4112  ;;  %5306 = vlog2.f32 %v4111_v15 }
 0xcfc   :  { %5308 = vlog2.f32 %v4113_v18 }
 0xcfe   :  { %v5305_v34 = vpop.eup %5304  ;;  %v4115_v26 = vpop.xlane.xlu0 %4114 }
 0xcff   :  { %v4141_v37 = vmul.f32 0.6931472, %v5305_v34  ;;  %5310 = vlog2.f32 %v4115_v26 }
 0xd01   :  { %v4172_v49 = vsub.f32 %v7266_v21, %v4141_v37 }
 0xd03   :  { %4188 = vst [vmem:[%s7395_s5] sm:$0xff] %v4172_v49 }
 0xd05   :  { %v5307_v19 = vpop.eup %5306 }
 0xd06   :  { %v5309_v63 = vpop.eup %5308  ;;  %v4143_v2 = vmul.f32 0.6931472, %v5307_v19 }
 0xd07   :  { %v4145_v8 = vmul.f32 0.6931472, %v5309_v63 }
 0xd08   :  { %v4173_v6 = vsub.f32 %v7269_v5, %v4143_v2 }
 0xd09   :  { %v5311_v38 = vpop.eup %5310  ;;  %v4174_v43 = vsub.f32 %v7271_v54, %v4145_v8 }
 0xd0a   :  { %4189 = vst [vmem:[%s7395_s5 + $0x8] sm:$0xff] %v4173_v6  ;;  %v4147_v11 = vmul.f32 0.6931472, %v5311_v38 }
 0xd0b   :  { %4190 = vst [vmem:[%s7395_s5 + $0x10] sm:$0xff] %v4174_v43 }
 0xd0c   :  { %v4175_v21 = vsub.f32 %v7275_v50, %v4147_v11 }
 0xd0e   :  { %4191 = vst [vmem:[%s7395_s5 + $0x18] sm:$0xff] %v4175_v21 }
 0xd12   :  { %v4117_v60 = vpop.xlane.xlu1 %4116 }
 0xd13   :  { %5312 = vlog2.f32 %v4117_v60 }
 0xd16   :  { %v4119_v5 = vpop.xlane.xlu0 %4118 }
 0xd17   :  { %5314 = vlog2.f32 %v4119_v5 }
 0xd1a   :  { %v4121_v54 = vpop.xlane.xlu1 %4120 }
 0xd1b   :  { %5316 = vlog2.f32 %v4121_v54 }
 0xd1d   :  { %v5313_v25 = vpop.eup %5312 }
 0xd1e   :  { %v4149_v3 = vmul.f32 0.6931472, %v5313_v25  ;;  %v4123_v51 = vpop.xlane.xlu0 %4122 }
 0xd1f   :  { %5318 = vlog2.f32 %v4123_v51 }
 0xd20   :  { %v4176_v39 = vsub.f32 %v7279_v55, %v4149_v3 }
 0xd21   :  { %v5315_v29 = vpop.eup %5314 }
 0xd22   :  { %4192 = vst [vmem:[%s7395_s5 + $0x20] sm:$0xff] %v4176_v39  ;;  %v4151_v50 = vmul.f32 0.6931472, %v5315_v29 }
 0xd24   :  { %v4177_v42 = vsub.f32 %v7283_v41, %v4151_v50 }
 0xd25   :  { %v5317_v36 = vpop.eup %5316 }
 0xd26   :  { %4193 = vst [vmem:[%s7395_s5 + $0x28] sm:$0xff] %v4177_v42  ;;  %v4153_v0 = vmul.f32 0.6931472, %v5317_v36 }
 0xd28   :  { %v4178_v14 = vsub.f32 %v7287_v52, %v4153_v0 }
 0xd29   :  { %v5319_v28 = vpop.eup %5318 }
 0xd2a   :  { %4194 = vst [vmem:[%s7395_s5 + $0x30] sm:$0xff] %v4178_v14  ;;  %v4155_v55 = vmul.f32 0.6931472, %v5319_v28 }
 0xd2c   :  { %v4179_v46 = vsub.f32 %v7291_v10, %v4155_v55 }
 0xd2e   :  { %4195 = vst [vmem:[%s7395_s5 + $0x38] sm:$0xff] %v4179_v46 }
 0xd32   :  { %v4125_v41 = vpop.xlane.xlu1 %4124 }
 0xd33   :  { %5320 = vlog2.f32 %v4125_v41 }
 0xd34   :  { %v4127_v45 = vpop.xlane.xlu0 %4126 }
 0xd35   :  { %5322 = vlog2.f32 %v4127_v45 }
 0xd3a   :  { %v4129_v56 = vpop.xlane.xlu1 %4128 }
 0xd3b   :  { %5324 = vlog2.f32 %v4129_v56 }
 0xd3c   :  { %v4131_v23 = vpop.xlane.xlu0 %4130 }
 0xd3d   :  { %v5321_v52 = vpop.eup %5320  ;;  %5326 = vlog2.f32 %v4131_v23 }
 0xd3e   :  { %v4157_v58 = vmul.f32 0.6931472, %v5321_v52 }
 0xd3f   :  { %v5323_v48 = vpop.eup %5322 }
 0xd40   :  { %v4180_v22 = vsub.f32 %v7295_v24, %v4157_v58  ;;  %v4159_v9 = vmul.f32 0.6931472, %v5323_v48 }
 0xd42   :  { %4196 = vst [vmem:[%s7395_s5 + $0x40] sm:$0xff] %v4180_v22  ;;  %v4181_v10 = vsub.f32 %v7299_v40, %v4159_v9 }
 0xd44   :  { %4197 = vst [vmem:[%s7395_s5 + $0x48] sm:$0xff] %v4181_v10 }
 0xd45   :  { %v5325_v44 = vpop.eup %5324 }
 0xd46   :  { %v4161_v61 = vmul.f32 0.6931472, %v5325_v44 }
 0xd47   :  { %v5327_v13 = vpop.eup %5326 }
 0xd48   :  { %v4182_v30 = vsub.f32 %v7303_v33, %v4161_v61  ;;  %v4163_v12 = vmul.f32 0.6931472, %v5327_v13 }
 0xd4a   :  { %4198 = vst [vmem:[%s7395_s5 + $0x50] sm:$0xff] %v4182_v30  ;;  %v4183_v24 = vsub.f32 %v7307_v62, %v4163_v12 }
 0xd4c   :  { %4199 = vst [vmem:[%s7395_s5 + $0x58] sm:$0xff] %v4183_v24 }
 0xd50   :  { %v4133_v40 = vpop.xlane.xlu1 %4132 }
 0xd51   :  { %5328 = vlog2.f32 %v4133_v40 }
 0xd52   :  { %v4135_v59 = vpop.xlane.xlu0 %4134 }
 0xd53   :  { %5330 = vlog2.f32 %v4135_v59 }
 0xd58   :  { %v4137_v4 = vpop.xlane.xlu1 %4136 }
 0xd59   :  { %5332 = vlog2.f32 %v4137_v4 }
 0xd5a   :  { %v4139_v16 = vpop.xlane.xlu0 %4138 }
 0xd5b   :  { %v5329_v1 = vpop.eup %5328  ;;  %5334 = vlog2.f32 %v4139_v16 }
 0xd5c   :  { %v4165_v33 = vmul.f32 0.6931472, %v5329_v1 }
 0xd5d   :  { %v5331_v27 = vpop.eup %5330 }
 0xd5e   :  { %v4184_v57 = vsub.f32 %v7311_v32, %v4165_v33  ;;  %v4167_v20 = vmul.f32 0.6931472, %v5331_v27 }
 0xd60   :  { %4200 = vst [vmem:[%s7395_s5 + $0x60] sm:$0xff] %v4184_v57  ;;  %v4185_v62 = vsub.f32 %v7315_v53, %v4167_v20 }
 0xd62   :  { %4201 = vst [vmem:[%s7395_s5 + $0x68] sm:$0xff] %v4185_v62 }
 0xd63   :  { %v5333_v31 = vpop.eup %5332 }
 0xd64   :  { %v4169_v17 = vmul.f32 0.6931472, %v5333_v31 }
 0xd65   :  { %v5335_v7 = vpop.eup %5334 }
 0xd66   :  { %v4186_v15 = vsub.f32 %v7319_v47, %v4169_v17  ;;  %v4171_v18 = vmul.f32 0.6931472, %v5335_v7 }
 0xd68   :  { %4202 = vst [vmem:[%s7395_s5 + $0x70] sm:$0xff] %v4186_v15  ;;  %v4187_v32 = vsub.f32 %v7323_v35, %v4171_v18 }
 0xd6a   :  { %4203 = vst [vmem:[%s7395_s5 + $0x78] sm:$0xff] %v4187_v32 }

</bundles_post_ra>
